<compile_context>
chip_gen: v7x
topology: tpu7x:2x2x1
jax: 0.10.0
libtpu: 0.0.40
codegen_flags: <defaults>
</compile_context>

<pallas_src>
import functools

import jax
import jax.numpy as jnp
from jax import lax
from jax.experimental import pallas as pl
from jax.experimental.pallas import tpu as pltpu

EPS = 1e-5                      # torch BatchNorm2d default
_VMEM_LIMIT = 48 * 1024 * 1024  # leave headroom vs v7x's 64 MiB physical VMEM


def _relu6(x):
    return jnp.clip(x, 0.0, 6.0)


def _cparams(*sems):
    return pltpu.CompilerParams(dimension_semantics=sems,
                                vmem_limit_bytes=_VMEM_LIMIT)


def _pick_tile(n, target, align, allow_ragged=False):
    """Tile size <= target, multiple of `align` when possible.

    Returns (tile, ragged).  Prefers exact divisors of n; with
    allow_ragged=True falls back to a cdiv grid (last tile masked in-kernel)
    instead of ever putting the whole extent in one block."""
    if n <= target:
        return n, False
    t = max(align, (target // align) * align)
    for d in range(t, 0, -align):
        if n % d == 0:
            return d, False
    if allow_ragged:
        return t, True
    return n, False   # per-image extents only; bounded


def _bn_fold(sum_, sumsq, count, gamma, beta):
    """One-pass BN statistics -> per-channel affine (scale, shift).

    Note: E[x^2]-E[x]^2 in f32; fine at these sizes (see review caveat)."""
    mean = sum_ / count
    var = jnp.maximum(sumsq / count - mean * mean, 0.0)   # biased variance
    scale = gamma * lax.rsqrt(var + EPS)
    return scale, beta - mean * scale


# ---------------- Stage 1: BN1 statistics via Gram matrix -------------------
def _gram_kernel(x_ref, g_ref, cs_ref):
    xc = x_ref[...].astype(jnp.float32)                       # (Cin, TP)
    # G = X X^T : "NT" matmul, contraction over the pixel (lane) axis.
    g_ref[...] = lax.dot_general(xc, xc, (((1,), (1,)), ((), ())),
                                 preferred_element_type=jnp.float32)
    cs_ref[...] = jnp.sum(xc, axis=1, keepdims=True)          # (Cin, 1)


# --------- Stage 2: expansion + BN1 + ReLU6 + 3x3 depthwise (+BN2 stats) ----
def _depthwise_kernel(stride, H, W, x_ref, wexp_ref, s1_ref, b1_ref, wdw_ref,
                      dw_ref, sum_ref, sumsq_ref):
    Cexp = wexp_ref.shape[1]
    Ho, Wo, _ = dw_ref.shape

    # 1x1 expansion: x arrives channel-major straight from NCHW HBM; one
    # in-kernel tile transpose instead of a wrapper-side HBM round trip.
    xt = jnp.transpose(x_ref[...].astype(jnp.float32))        # (H*W, Cin)
    h1 = jnp.dot(xt.astype(jnp.bfloat16), wexp_ref[...].astype(jnp.bfloat16),
                 preferred_element_type=jnp.float32)          # (H*W, Cexp)
    h1 = _relu6(h1 * s1_ref[...] + b1_ref[...]).reshape(H, W, Cexp)

    # Zero-pad along H only (outer dim: contiguous, no relayout).
    zrow = jnp.zeros((1, W, Cexp), jnp.float32)
    h1h = jnp.concatenate([zrow, h1, zrow], axis=0)           # (H+2, W, Cexp)

    # W offsets handled with a sublane roll + boundary mask (XLU), no W-pad.
    w_idx = lax.broadcasted_iota(jnp.int32, (1, W, 1), 1)
    wdw = wdw_ref[...]                                        # (9, Cexp)

    acc = None
    for kh in range(3):
        row = h1h[kh:kh + (Ho - 1) * stride + 1:stride]       # (Ho, W, Cexp)
        for kw in range(3):
            d = kw - 1
            if d == 0:
                tap = row
            else:
                rolled = pltpu.roll(row, (-d) % W, axis=1)
                ok = (w_idx < W - d) if d > 0 else (w_idx >= -d)
                tap = jnp.where(ok, rolled, 0.0)
            term = tap * wdw[kh * 3 + kw]
            acc = term if acc is None else acc + term         # value accum
    # Single W subsample for stride > 1 (one cross-sublane op, not 9).
    dwv = acc if stride == 1 else acc[:, ::stride, :]         # (Ho, Wo, Cexp)

    dw_ref[...] = dwv.astype(dw_ref.dtype)                    # single store
    sum_ref[...] = jnp.sum(dwv, axis=(0, 1))[None, :]
    sumsq_ref[...] = jnp.sum(dwv * dwv, axis=(0, 1))[None, :]


# --------- Stage 3: BN2 + ReLU6 + 1x1 projection (channel-major h3) ---------
def _project_kernel(m2, ragged, dw_ref, s2_ref, b2_ref, wpT_ref,
                    h3_ref, sum_ref, sumsq_ref):
    dw = dw_ref[...].astype(jnp.float32)                      # (TM, Cexp)
    h2 = _relu6(dw * s2_ref[...] + b2_ref[...])
    # h3^T = W_proj @ h2^T : "NT" matmul -> channel-major, lane-dense store.
    h3t = lax.dot_general(
        wpT_ref[...].astype(jnp.bfloat16), h2.astype(jnp.bfloat16),
        (((1,), (1,)), ((), ())), preferred_element_type=jnp.float32)  # (Cout, TM)
    h3_ref[...] = h3t
    if ragged:  # mask the (possibly OOB) tail of the last tile for the stats
        col = pl.program_id(0) * h3t.shape[1] + lax.broadcasted_iota(
            jnp.int32, (1, h3t.shape[1]), 1)
        h3t = jnp.where(col < m2, h3t, 0.0)
    sum_ref[...] = jnp.sum(h3t, axis=1, keepdims=True)        # (Cout, 1)
    sumsq_ref[...] = jnp.sum(h3t * h3t, axis=1, keepdims=True)


# --------- Stage 4: BN3 (+ residual), NCHW-native lane-dense output ---------
def _finalize_kernel(residual, h3_ref, s3_ref, b3_ref, *rest):
    if residual:
        x_ref, o_ref = rest
    else:
        (o_ref,) = rest
    y = h3_ref[...] * s3_ref[...] + b3_ref[...]               # (Cout, TP)
    if residual:
        y = y + x_ref[...].astype(jnp.float32)
    o_ref[...] = y.astype(o_ref.dtype)


# ----------------------------- parameters -----------------------------------
def init_params(key, in_channels, out_channels, expansion_rate=4):
    cexp = int(in_channels * expansion_rate)
    k1, k2, k3 = jax.random.split(key, 3)
    params = {
        # torch Conv2d(Cin->Cexp, 1x1).weight (Cexp, Cin, 1, 1) -> (Cin, Cexp)
        "w_exp": jax.random.normal(k1, (in_channels, cexp), jnp.float32)
                 * (in_channels ** -0.5),
        "g1": jnp.ones((cexp,), jnp.float32),
        "b1": jnp.zeros((cexp,), jnp.float32),
        # torch depthwise (Cexp, 1, 3, 3) -> (9, Cexp), row = kh*3+kw
        "w_dw": 0.3 + 0.3 * jax.random.normal(k2, (9, cexp), jnp.float32),
        "g2": jnp.ones((cexp,), jnp.float32),
        "b2": jnp.zeros((cexp,), jnp.float32),
        # torch Conv2d(Cexp->Cout, 1x1).weight (Cout, Cexp, 1, 1) -> (Cout, Cexp)
        "w_projT": 0.1 + jax.random.normal(k3, (out_channels, cexp), jnp.float32)
                   * (cexp ** -0.5),
        "g3": jnp.ones((out_channels,), jnp.float32),
        "b3": jnp.zeros((out_channels,), jnp.float32),
    }
    return params, cexp


# ------------------------------- wrapper -------------------------------------
def inverted_bottleneck(x_nchw, params, *, in_channels, out_channels,
                        expansion_rate=4, stride=1):
    N, Cin, H, W = x_nchw.shape
    assert Cin == in_channels
    Cexp = int(in_channels * expansion_rate)
    Cout = out_channels
    Ho = (H - 1) // stride + 1
    Wo = (W - 1) // stride + 1
    P, P2 = H * W, Ho * Wo
    m1, m2 = N * P, N * P2
    residual = (stride != 2) and (in_channels == out_channels)

    x3 = x_nchw.reshape(N, Cin, P)            # free view; x stays NCHW in HBM

    # ---- Stage 1: BN1 stats via per-tile Gram partials + tiny JAX fold ------
    tp1, _ = _pick_tile(P, 4096, 128)
    g1n = P // tp1
    gram_p, cs_p = pl.pallas_call(
        _gram_kernel,
        grid=(N, g1n),
        in_specs=[pl.BlockSpec((None, Cin, tp1), lambda n, j: (n, 0, j))],
        out_specs=[
            pl.BlockSpec((None, None, Cin, Cin), lambda n, j: (n, j, 0, 0)),
            pl.BlockSpec((None, None, Cin, 1), lambda n, j: (n, j, 0, 0)),
        ],
        out_shape=[
            jax.ShapeDtypeStruct((N, g1n, Cin, Cin), jnp.float32),
            jax.ShapeDtypeStruct((N, g1n, Cin, 1), jnp.float32),
        ],
        compiler_params=_cparams("parallel", "parallel"),
    )(x3)
    w_exp = params["w_exp"]
    G = gram_p.sum(axis=(0, 1))                               # (Cin, Cin)
    cs = cs_p.sum(axis=(0, 1))[:, 0]                          # (Cin,)
    sum1 = cs @ w_exp                                         # (Cexp,)
    sumsq1 = jnp.sum(w_exp * (G @ w_exp), axis=0)             # (Cexp,)
    scale1, shift1 = _bn_fold(sum1, sumsq1, float(m1),
                              params["g1"], params["b1"])
    scale1, shift1 = scale1.reshape(1, Cexp), shift1.reshape(1, Cexp)

    # ---- Stage 2: expand + BN1 + ReLU6 + depthwise (value-accumulated) ------
    dw, psum2, psumsq2 = pl.pallas_call(
        functools.partial(_depthwise_kernel, stride, H, W),
        grid=(N,),
        in_specs=[
            pl.BlockSpec((None, Cin, P), lambda n: (n, 0, 0)),
            pl.BlockSpec((Cin, Cexp), lambda n: (0, 0)),
            pl.BlockSpec((1, Cexp), lambda n: (0, 0)),
            pl.BlockSpec((1, Cexp), lambda n: (0, 0)),
            pl.BlockSpec((9, Cexp), lambda n: (0, 0)),
        ],
        out_specs=[
            pl.BlockSpec((None, Ho, Wo, Cexp), lambda n: (n, 0, 0, 0)),
            pl.BlockSpec((None, 1, Cexp), lambda n: (n, 0, 0)),
            pl.BlockSpec((None, 1, Cexp), lambda n: (n, 0, 0)),
        ],
        out_shape=[
            jax.ShapeDtypeStruct((N, Ho, Wo, Cexp), jnp.bfloat16),
            jax.ShapeDtypeStruct((N, 1, Cexp), jnp.float32),
            jax.ShapeDtypeStruct((N, 1, Cexp), jnp.float32),
        ],
        compiler_params=_cparams("parallel"),
    )(x3, w_exp, scale1, shift1, params["w_dw"])
    scale2, shift2 = _bn_fold(psum2.sum(axis=0)[0], psumsq2.sum(axis=0)[0],
                              float(m2), params["g2"], params["b2"])
    scale2, shift2 = scale2.reshape(1, Cexp), shift2.reshape(1, Cexp)

    # ---- Stage 3: BN2 + ReLU6 + projection; emits channel-major h3 ----------
    dw2d = dw.reshape(m2, Cexp)                               # free view
    tm3, ragged3 = _pick_tile(m2, 4096, 128, allow_ragged=True)
    g3n = pl.cdiv(m2, tm3)
    h3t, psum3, psumsq3 = pl.pallas_call(
        functools.partial(_project_kernel, m2, ragged3),
        grid=(g3n,),
        in_specs=[
            pl.BlockSpec((tm3, Cexp), lambda i: (i, 0)),
            pl.BlockSpec((1, Cexp), lambda i: (0, 0)),
            pl.BlockSpec((1, Cexp), lambda i: (0, 0)),
            pl.BlockSpec((Cout, Cexp), lambda i: (0, 0)),
        ],
        out_specs=[
            pl.BlockSpec((Cout, tm3), lambda i: (0, i)),
            pl.BlockSpec((None, Cout, 1), lambda i: (i, 0, 0)),
            pl.BlockSpec((None, Cout, 1), lambda i: (i, 0, 0)),
        ],
        out_shape=[
            jax.ShapeDtypeStruct((Cout, m2), jnp.float32),
            jax.ShapeDtypeStruct((g3n, Cout, 1), jnp.float32),
            jax.ShapeDtypeStruct((g3n, Cout, 1), jnp.float32),
        ],
        compiler_params=_cparams("parallel"),
    )(dw2d, scale2, shift2, params["w_projT"])
    scale3, shift3 = _bn_fold(psum3.sum(axis=0)[:, 0], psumsq3.sum(axis=0)[:, 0],
                              float(m2), params["g3"], params["b3"])
    scale3, shift3 = scale3.reshape(Cout, 1), shift3.reshape(Cout, 1)

    # ---- Stage 4: BN3 (+ residual), writes NCHW output directly -------------
    tp4, _ = _pick_tile(P2, 2048, 128)
    g4n = P2 // tp4
    in_specs = [
        pl.BlockSpec((Cout, tp4), lambda n, j: (0, n * g4n + j)),
        pl.BlockSpec((Cout, 1), lambda n, j: (0, 0)),
        pl.BlockSpec((Cout, 1), lambda n, j: (0, 0)),
    ]
    args = [h3t, scale3, shift3]
    if residual:
        in_specs.append(pl.BlockSpec((None, Cin, tp4), lambda n, j: (n, 0, j)))
        args.append(x3)
    out3 = pl.pallas_call(
        functools.partial(_finalize_kernel, residual),
        grid=(N, g4n),
        in_specs=in_specs,
        out_specs=pl.BlockSpec((None, Cout, tp4), lambda n, j: (n, 0, j)),
        out_shape=jax.ShapeDtypeStruct((N, Cout, P2), x_nchw.dtype),
        compiler_params=_cparams("parallel", "parallel"),
    )(*args)
    return out3.reshape(N, Cout, Ho, Wo)


# --------------------------- pure-JAX reference ------------------------------
def _reference(x_nchw, params, *, stride, residual):
    x = jnp.transpose(x_nchw, (0, 2, 3, 1)).astype(jnp.float32)

    def bn(h, g, b):
        m = h.mean(axis=(0, 1, 2), keepdims=True)
        v = ((h - m) ** 2).mean(axis=(0, 1, 2), keepdims=True)
        return (h - m) * lax.rsqrt(v + EPS) * g.reshape(1, 1, 1, -1) \
            + b.reshape(1, 1, 1, -1)

    h1 = jnp.einsum("nhwc,cd->nhwd", x, params["w_exp"])
    h1 = jnp.clip(bn(h1, params["g1"], params["b1"]), 0.0, 6.0)
    hp = jnp.pad(h1, ((0, 0), (1, 1), (1, 1), (0, 0)))
    N, H, W, Cexp = h1.shape
    Ho = (H - 1) // stride + 1
    Wo = (W - 1) // stride + 1
    acc = jnp.zeros((N, Ho, Wo, Cexp), jnp.float32)
    for kh in range(3):
        for kw in range(3):
            sl = hp[:, kh:kh + (Ho - 1) * stride + 1:stride,
                    kw:kw + (Wo - 1) * stride + 1:stride, :]
            acc = acc + sl * params["w_dw"][kh * 3 + kw]
    h2 = jnp.clip(bn(acc, params["g2"], params["b2"]), 0.0, 6.0)
    h3 = jnp.einsum("nhwc,dc->nhwd", h2, params["w_projT"])
    h3 = bn(h3, params["g3"], params["b3"])
    if residual:
        h3 = h3 + x
    return jnp.transpose(h3, (0, 3, 1, 2))


if __name__ == "__main__":
    key = jax.random.PRNGKey(0)
    kx, kp = jax.random.split(key)

    N, Cin, H, W = 2, 4, 16, 16
    Cout, expansion, stride = 4, 4, 1            # residual path active

    x = jax.random.normal(kx, (N, Cin, H, W), jnp.float32)
    params, _ = init_params(kp, Cin, Cout, expansion)

    fwd = jax.jit(functools.partial(
        inverted_bottleneck, in_channels=Cin, out_channels=Cout,
        expansion_rate=expansion, stride=stride))
    out = fwd(x, params)
    jax.block_until_ready(out)
    assert out.shape == (N, Cout, H, W)

    ref = _reference(x, params, stride=stride,
                     residual=(stride != 2 and Cin == Cout))
    err = float(jnp.max(jnp.abs(out - ref)))
    # Mixed precision (bf16 MXU inputs + bf16 depthwise intermediate) vs the
    # all-f32 reference: ~1e-2-scale deviations after BN renormalization are
    # expected, so the bound is deliberately loose.
    assert err < 1e-1, f"max abs err {err}"
    print("KERNEL_OK")
</pallas_src>

<mosaic_0001>
module attributes {stable_mosaic.version = 11 : i64} {
  func.func @_gram_kernel(%arg0: i32, %arg1: i32, %arg2: memref<1x4x256xf32, #tpu.memory_space<vmem>>, %arg3: memref<1x1x4x4xf32, #tpu.memory_space<vmem>>, %arg4: memref<1x1x4x1xf32, #tpu.memory_space<vmem>>) attributes {dimension_semantics = [#tpu.dimension_semantics<parallel>, #tpu.dimension_semantics<parallel>], iteration_bounds = array<i64: 2, 1>, scalar_prefetch = 0 : i64, scratch_operands = 0 : i64, tpu.core_type = #tpu.core_type<tc>, window_params = [{transform_indices = @transform_0, window_bounds = array<i64: 1, 4, 256>}, {transform_indices = @transform_1, window_bounds = array<i64: 1, 1, 4, 4>}, {transform_indices = @transform_2, window_bounds = array<i64: 1, 1, 4, 1>}]} {
    %c0 = arith.constant 0 : index
    %c0_0 = arith.constant 0 : index
    %c0_1 = arith.constant 0 : index
    %0 = vector.load %arg2[%c0, %c0_0, %c0_1] : memref<1x4x256xf32, #tpu.memory_space<vmem>>, vector<1x4x256xf32>
    %1 = vector.shape_cast %0 : vector<1x4x256xf32> to vector<4x256xf32>
    %cst = arith.constant dense<0.000000e+00> : vector<4x4xf32>
    %2 = tpu.matmul %1, %1, %cst {dimension_numbers = #tpu.dot_dimension_numbers<[1], [1], [0], [0], [0, 0, 1, 0], [], []>} : vector<4x256xf32>, vector<4x256xf32>, vector<4x4xf32> -> vector<4x4xf32>
    %c0_2 = arith.constant 0 : index
    %c0_3 = arith.constant 0 : index
    %c0_4 = arith.constant 0 : index
    %c0_5 = arith.constant 0 : index
    %3 = vector.load %arg3[%c0_2, %c0_3, %c0_4, %c0_5] : memref<1x1x4x4xf32, #tpu.memory_space<vmem>>, vector<1x1x4x4xf32>
    %4 = vector.shape_cast %3 : vector<1x1x4x4xf32> to vector<4x4xf32>
    %5 = vector.shape_cast %2 : vector<4x4xf32> to vector<1x1x4x4xf32>
    tpu.vector_store %arg3[%c0_2, %c0_3, %c0_4, %c0_5], %5 {strides = array<i32>} : memref<1x1x4x4xf32, #tpu.memory_space<vmem>>, vector<1x1x4x4xf32>,
    %cst_6 = arith.constant dense<0.000000e+00> : vector<4xf32>
    %6 = vector.multi_reduction <add>, %1, %cst_6 [1] : vector<4x256xf32> to vector<4xf32>
    %7 = vector.shape_cast %6 : vector<4xf32> to vector<4x1xf32>
    %c0_7 = arith.constant 0 : index
    %c0_8 = arith.constant 0 : index
    %c0_9 = arith.constant 0 : index
    %c0_10 = arith.constant 0 : index
    %8 = vector.load %arg4[%c0_7, %c0_8, %c0_9, %c0_10] : memref<1x1x4x1xf32, #tpu.memory_space<vmem>>, vector<1x1x4x1xf32>
    %9 = vector.shape_cast %8 : vector<1x1x4x1xf32> to vector<4x1xf32>
    %10 = vector.shape_cast %7 : vector<4x1xf32> to vector<1x1x4x1xf32>
    tpu.vector_store %arg4[%c0_7, %c0_8, %c0_9, %c0_10], %10 {strides = array<i32>} : memref<1x1x4x1xf32, #tpu.memory_space<vmem>>, vector<1x1x4x1xf32>,
    return
  }
  func.func @transform_0(%arg0: i32, %arg1: i32) -> (i32, i32, i32) {
    %c0_i32 = arith.constant 0 : i32
    %c0_i32_0 = arith.constant 0 : i32
    return %arg0, %c0_i32, %arg1 : i32, i32, i32
  }
  func.func @transform_1(%arg0: i32, %arg1: i32) -> (i32, i32, i32, i32) {
    %c0_i32 = arith.constant 0 : i32
    %c0_i32_0 = arith.constant 0 : i32
    %c0_i32_1 = arith.constant 0 : i32
    return %arg0, %arg1, %c0_i32, %c0_i32_0 : i32, i32, i32, i32
  }
  func.func @transform_2(%arg0: i32, %arg1: i32) -> (i32, i32, i32, i32) {
    %c0_i32 = arith.constant 0 : i32
    %c0_i32_0 = arith.constant 0 : i32
    %c0_i32_1 = arith.constant 0 : i32
    return %arg0, %arg1, %c0_i32, %c0_i32_0 : i32, i32, i32, i32
  }
}

module attributes {stable_mosaic.version = 11 : i64} {
  func.func @_depthwise_kernel(%arg0: i32, %arg1: memref<1x4x256xf32, #tpu.memory_space<vmem>>, %arg2: memref<4x16xf32, #tpu.memory_space<vmem>>, %arg3: memref<1x16xf32, #tpu.memory_space<vmem>>, %arg4: memref<1x16xf32, #tpu.memory_space<vmem>>, %arg5: memref<9x16xf32, #tpu.memory_space<vmem>>, %arg6: memref<1x16x16x16xbf16, #tpu.memory_space<vmem>>, %arg7: memref<1x1x16xf32, #tpu.memory_space<vmem>>, %arg8: memref<1x1x16xf32, #tpu.memory_space<vmem>>) attributes {dimension_semantics = [#tpu.dimension_semantics<parallel>], iteration_bounds = array<i64: 2>, scalar_prefetch = 0 : i64, scratch_operands = 0 : i64, tpu.core_type = #tpu.core_type<tc>, window_params = [{transform_indices = @transform_0, window_bounds = array<i64: 1, 4, 256>}, {pipeline_mode = #tpu.pipeline_mode<synchronous>, transform_indices = @transform_1, window_bounds = array<i64: 4, 16>}, {pipeline_mode = #tpu.pipeline_mode<synchronous>, transform_indices = @transform_2, window_bounds = array<i64: 1, 16>}, {pipeline_mode = #tpu.pipeline_mode<synchronous>, transform_indices = @transform_3, window_bounds = array<i64: 1, 16>}, {pipeline_mode = #tpu.pipeline_mode<synchronous>, transform_indices = @transform_4, window_bounds = array<i64: 9, 16>}, {transform_indices = @transform_5, window_bounds = array<i64: 1, 16, 16, 16>}, {transform_indices = @transform_6, window_bounds = array<i64: 1, 1, 16>}, {transform_indices = @transform_7, window_bounds = array<i64: 1, 1, 16>}]} {
    %c0 = arith.constant 0 : index
    %c0_0 = arith.constant 0 : index
    %c0_1 = arith.constant 0 : index
    %0 = vector.load %arg1[%c0, %c0_0, %c0_1] : memref<1x4x256xf32, #tpu.memory_space<vmem>>, vector<1x4x256xf32>
    %1 = vector.shape_cast %0 : vector<1x4x256xf32> to vector<4x256xf32>
    %2 = tpu.transpose %1, [1, 0] : vector<4x256xf32> -> vector<256x4xf32>
    %3 = arith.truncf %2 : vector<256x4xf32> to vector<256x4xbf16>
    %c0_2 = arith.constant 0 : index
    %c0_3 = arith.constant 0 : index
    %4 = vector.load %arg2[%c0_2, %c0_3] : memref<4x16xf32, #tpu.memory_space<vmem>>, vector<4x16xf32>
    %5 = arith.truncf %4 : vector<4x16xf32> to vector<4x16xbf16>
    %cst = arith.constant dense<0.000000e+00> : vector<256x16xf32>
    %6 = tpu.matmul %3, %5, %cst {dimension_numbers = #tpu.dot_dimension_numbers<[1], [0], [0], [1], [0, 0, 1, 1], [], []>} : vector<256x4xbf16>, vector<4x16xbf16>, vector<256x16xf32> -> vector<256x16xf32>
    %c0_4 = arith.constant 0 : index
    %c0_5 = arith.constant 0 : index
    %7 = vector.load %arg3[%c0_4, %c0_5] : memref<1x16xf32, #tpu.memory_space<vmem>>, vector<1x16xf32>
    %8 = vector.broadcast %7 : vector<1x16xf32> to vector<256x16xf32>
    %9 = arith.mulf %6, %8 : vector<256x16xf32>
    %c0_6 = arith.constant 0 : index
    %c0_7 = arith.constant 0 : index
    %10 = vector.load %arg4[%c0_6, %c0_7] : memref<1x16xf32, #tpu.memory_space<vmem>>, vector<1x16xf32>
    %11 = vector.broadcast %10 : vector<1x16xf32> to vector<256x16xf32>
    %12 = arith.addf %9, %11 : vector<256x16xf32>
    %cst_8 = arith.constant 0.000000e+00 : f32
    %cst_9 = arith.constant 6.000000e+00 : f32
    %13 = vector.broadcast %cst_8 : f32 to vector<256x16xf32>
    %14 = arith.maximumf %13, %12 : vector<256x16xf32>
    %15 = vector.broadcast %cst_9 : f32 to vector<256x16xf32>
    %16 = arith.minimumf %15, %14 : vector<256x16xf32>
    %17 = vector.shape_cast %16 : vector<256x16xf32> to vector<16x16x16xf32>
    %cst_10 = arith.constant 0.000000e+00 : f32
    %18 = vector.broadcast %cst_10 : f32 to vector<1x16x16xf32>
    %19 = tpu.concatenate %18, %17, %18 in 0 : vector<1x16x16xf32>, vector<16x16x16xf32>, vector<1x16x16xf32> -> vector<18x16x16xf32>
    %20 = tpu.iota {dimensions = array<i32: 1>} : vector<1x16x1xi32>
    %c0_11 = arith.constant 0 : index
    %c0_12 = arith.constant 0 : index
    %21 = vector.load %arg5[%c0_11, %c0_12] : memref<9x16xf32, #tpu.memory_space<vmem>>, vector<9x16xf32>
    %22 = vector.extract_strided_slice %19 {offsets = [0, 0, 0], sizes = [16, 16, 16], strides = [1, 1, 1]} : vector<18x16x16xf32> to vector<16x16x16xf32>
    %c1_i32 = arith.constant 1 : i32
    %23 = tpu.dynamic_rotate %22 by %c1_i32 dim 1 : vector<16x16x16xf32>, i32 -> vector<16x16x16xf32>
    %c1_i32_13 = arith.constant 1 : i32
    %24 = vector.broadcast %c1_i32_13 : i32 to vector<1x16x1xi32>
    %25 = arith.cmpi sge, %20, %24 : vector<1x16x1xi32>
    %cst_14 = arith.constant 0.000000e+00 : f32
    %26 = vector.shape_cast %25 : vector<1x16x1xi1> to vector<1x16x1xi1>
    %27 = vector.broadcast %26 : vector<1x16x1xi1> to vector<16x16x16xi1>
    %28 = vector.broadcast %cst_14 : f32 to vector<16x16x16xf32>
    %29 = arith.select %27, %23, %28 : vector<16x16x16xi1>, vector<16x16x16xf32>
    %30 = vector.extract_strided_slice %21 {offsets = [0, 0], sizes = [1, 16], strides = [1, 1]} : vector<9x16xf32> to vector<1x16xf32>
    %31 = vector.shape_cast %30 : vector<1x16xf32> to vector<16xf32>
    %32 = vector.shape_cast %31 : vector<16xf32> to vector<1x1x16xf32>
    %33 = vector.broadcast %32 : vector<1x1x16xf32> to vector<16x16x16xf32>
    %34 = arith.mulf %29, %33 : vector<16x16x16xf32>
    %35 = vector.extract_strided_slice %21 {offsets = [1, 0], sizes = [1, 16], strides = [1, 1]} : vector<9x16xf32> to vector<1x16xf32>
    %36 = vector.shape_cast %35 : vector<1x16xf32> to vector<16xf32>
    %37 = vector.shape_cast %36 : vector<16xf32> to vector<1x1x16xf32>
    %38 = vector.broadcast %37 : vector<1x1x16xf32> to vector<16x16x16xf32>
    %39 = arith.mulf %22, %38 : vector<16x16x16xf32>
    %40 = arith.addf %34, %39 : vector<16x16x16xf32>
    %c15_i32 = arith.constant 15 : i32
    %41 = tpu.dynamic_rotate %22 by %c15_i32 dim 1 : vector<16x16x16xf32>, i32 -> vector<16x16x16xf32>
    %c15_i32_15 = arith.constant 15 : i32
    %42 = vector.broadcast %c15_i32_15 : i32 to vector<1x16x1xi32>
    %43 = arith.cmpi slt, %20, %42 : vector<1x16x1xi32>
    %cst_16 = arith.constant 0.000000e+00 : f32
    %44 = vector.shape_cast %43 : vector<1x16x1xi1> to vector<1x16x1xi1>
    %45 = vector.broadcast %44 : vector<1x16x1xi1> to vector<16x16x16xi1>
    %46 = vector.broadcast %cst_16 : f32 to vector<16x16x16xf32>
    %47 = arith.select %45, %41, %46 : vector<16x16x16xi1>, vector<16x16x16xf32>
    %48 = vector.extract_strided_slice %21 {offsets = [2, 0], sizes = [1, 16], strides = [1, 1]} : vector<9x16xf32> to vector<1x16xf32>
    %49 = vector.shape_cast %48 : vector<1x16xf32> to vector<16xf32>
    %50 = vector.shape_cast %49 : vector<16xf32> to vector<1x1x16xf32>
    %51 = vector.broadcast %50 : vector<1x1x16xf32> to vector<16x16x16xf32>
    %52 = arith.mulf %47, %51 : vector<16x16x16xf32>
    %53 = arith.addf %40, %52 : vector<16x16x16xf32>
    %54 = vector.extract_strided_slice %19 {offsets = [1, 0, 0], sizes = [16, 16, 16], strides = [1, 1, 1]} : vector<18x16x16xf32> to vector<16x16x16xf32>
    %c1_i32_17 = arith.constant 1 : i32
    %55 = tpu.dynamic_rotate %54 by %c1_i32_17 dim 1 : vector<16x16x16xf32>, i32 -> vector<16x16x16xf32>
    %c1_i32_18 = arith.constant 1 : i32
    %56 = vector.broadcast %c1_i32_18 : i32 to vector<1x16x1xi32>
    %57 = arith.cmpi sge, %20, %56 : vector<1x16x1xi32>
    %cst_19 = arith.constant 0.000000e+00 : f32
    %58 = vector.shape_cast %57 : vector<1x16x1xi1> to vector<1x16x1xi1>
    %59 = vector.broadcast %58 : vector<1x16x1xi1> to vector<16x16x16xi1>
    %60 = vector.broadcast %cst_19 : f32 to vector<16x16x16xf32>
    %61 = arith.select %59, %55, %60 : vector<16x16x16xi1>, vector<16x16x16xf32>
    %62 = vector.extract_strided_slice %21 {offsets = [3, 0], sizes = [1, 16], strides = [1, 1]} : vector<9x16xf32> to vector<1x16xf32>
    %63 = vector.shape_cast %62 : vector<1x16xf32> to vector<16xf32>
    %64 = vector.shape_cast %63 : vector<16xf32> to vector<1x1x16xf32>
    %65 = vector.broadcast %64 : vector<1x1x16xf32> to vector<16x16x16xf32>
    %66 = arith.mulf %61, %65 : vector<16x16x16xf32>
    %67 = arith.addf %53, %66 : vector<16x16x16xf32>
    %68 = vector.extract_strided_slice %21 {offsets = [4, 0], sizes = [1, 16], strides = [1, 1]} : vector<9x16xf32> to vector<1x16xf32>
    %69 = vector.shape_cast %68 : vector<1x16xf32> to vector<16xf32>
    %70 = vector.shape_cast %69 : vector<16xf32> to vector<1x1x16xf32>
    %71 = vector.broadcast %70 : vector<1x1x16xf32> to vector<16x16x16xf32>
    %72 = arith.mulf %54, %71 : vector<16x16x16xf32>
    %73 = arith.addf %67, %72 : vector<16x16x16xf32>
    %c15_i32_20 = arith.constant 15 : i32
    %74 = tpu.dynamic_rotate %54 by %c15_i32_20 dim 1 : vector<16x16x16xf32>, i32 -> vector<16x16x16xf32>
    %c15_i32_21 = arith.constant 15 : i32
    %75 = vector.broadcast %c15_i32_21 : i32 to vector<1x16x1xi32>
    %76 = arith.cmpi slt, %20, %75 : vector<1x16x1xi32>
    %cst_22 = arith.constant 0.000000e+00 : f32
    %77 = vector.shape_cast %76 : vector<1x16x1xi1> to vector<1x16x1xi1>
    %78 = vector.broadcast %77 : vector<1x16x1xi1> to vector<16x16x16xi1>
    %79 = vector.broadcast %cst_22 : f32 to vector<16x16x16xf32>
    %80 = arith.select %78, %74, %79 : vector<16x16x16xi1>, vector<16x16x16xf32>
    %81 = vector.extract_strided_slice %21 {offsets = [5, 0], sizes = [1, 16], strides = [1, 1]} : vector<9x16xf32> to vector<1x16xf32>
    %82 = vector.shape_cast %81 : vector<1x16xf32> to vector<16xf32>
    %83 = vector.shape_cast %82 : vector<16xf32> to vector<1x1x16xf32>
    %84 = vector.broadcast %83 : vector<1x1x16xf32> to vector<16x16x16xf32>
    %85 = arith.mulf %80, %84 : vector<16x16x16xf32>
    %86 = arith.addf %73, %85 : vector<16x16x16xf32>
    %87 = vector.extract_strided_slice %19 {offsets = [2, 0, 0], sizes = [16, 16, 16], strides = [1, 1, 1]} : vector<18x16x16xf32> to vector<16x16x16xf32>
    %c1_i32_23 = arith.constant 1 : i32
    %88 = tpu.dynamic_rotate %87 by %c1_i32_23 dim 1 : vector<16x16x16xf32>, i32 -> vector<16x16x16xf32>
    %c1_i32_24 = arith.constant 1 : i32
    %89 = vector.broadcast %c1_i32_24 : i32 to vector<1x16x1xi32>
    %90 = arith.cmpi sge, %20, %89 : vector<1x16x1xi32>
    %cst_25 = arith.constant 0.000000e+00 : f32
    %91 = vector.shape_cast %90 : vector<1x16x1xi1> to vector<1x16x1xi1>
    %92 = vector.broadcast %91 : vector<1x16x1xi1> to vector<16x16x16xi1>
    %93 = vector.broadcast %cst_25 : f32 to vector<16x16x16xf32>
    %94 = arith.select %92, %88, %93 : vector<16x16x16xi1>, vector<16x16x16xf32>
    %95 = vector.extract_strided_slice %21 {offsets = [6, 0], sizes = [1, 16], strides = [1, 1]} : vector<9x16xf32> to vector<1x16xf32>
    %96 = vector.shape_cast %95 : vector<1x16xf32> to vector<16xf32>
    %97 = vector.shape_cast %96 : vector<16xf32> to vector<1x1x16xf32>
    %98 = vector.broadcast %97 : vector<1x1x16xf32> to vector<16x16x16xf32>
    %99 = arith.mulf %94, %98 : vector<16x16x16xf32>
    %100 = arith.addf %86, %99 : vector<16x16x16xf32>
    %101 = vector.extract_strided_slice %21 {offsets = [7, 0], sizes = [1, 16], strides = [1, 1]} : vector<9x16xf32> to vector<1x16xf32>
    %102 = vector.shape_cast %101 : vector<1x16xf32> to vector<16xf32>
    %103 = vector.shape_cast %102 : vector<16xf32> to vector<1x1x16xf32>
    %104 = vector.broadcast %103 : vector<1x1x16xf32> to vector<16x16x16xf32>
    %105 = arith.mulf %87, %104 : vector<16x16x16xf32>
    %106 = arith.addf %100, %105 : vector<16x16x16xf32>
    %c15_i32_26 = arith.constant 15 : i32
    %107 = tpu.dynamic_rotate %87 by %c15_i32_26 dim 1 : vector<16x16x16xf32>, i32 -> vector<16x16x16xf32>
    %c15_i32_27 = arith.constant 15 : i32
    %108 = vector.broadcast %c15_i32_27 : i32 to vector<1x16x1xi32>
    %109 = arith.cmpi slt, %20, %108 : vector<1x16x1xi32>
    %cst_28 = arith.constant 0.000000e+00 : f32
    %110 = vector.shape_cast %109 : vector<1x16x1xi1> to vector<1x16x1xi1>
    %111 = vector.broadcast %110 : vector<1x16x1xi1> to vector<16x16x16xi1>
    %112 = vector.broadcast %cst_28 : f32 to vector<16x16x16xf32>
    %113 = arith.select %111, %107, %112 : vector<16x16x16xi1>, vector<16x16x16xf32>
    %114 = vector.extract_strided_slice %21 {offsets = [8, 0], sizes = [1, 16], strides = [1, 1]} : vector<9x16xf32> to vector<1x16xf32>
    %115 = vector.shape_cast %114 : vector<1x16xf32> to vector<16xf32>
    %116 = vector.shape_cast %115 : vector<16xf32> to vector<1x1x16xf32>
    %117 = vector.broadcast %116 : vector<1x1x16xf32> to vector<16x16x16xf32>
    %118 = arith.mulf %113, %117 : vector<16x16x16xf32>
    %119 = arith.addf %106, %118 : vector<16x16x16xf32>
    %120 = arith.truncf %119 : vector<16x16x16xf32> to vector<16x16x16xbf16>
    %c0_29 = arith.constant 0 : index
    %c0_30 = arith.constant 0 : index
    %c0_31 = arith.constant 0 : index
    %c0_32 = arith.constant 0 : index
    %121 = vector.load %arg6[%c0_29, %c0_30, %c0_31, %c0_32] : memref<1x16x16x16xbf16, #tpu.memory_space<vmem>>, vector<1x16x16x16xbf16>
    %122 = vector.shape_cast %121 : vector<1x16x16x16xbf16> to vector<16x16x16xbf16>
    %123 = vector.shape_cast %120 : vector<16x16x16xbf16> to vector<1x16x16x16xbf16>
    tpu.vector_store %arg6[%c0_29, %c0_30, %c0_31, %c0_32], %123 {strides = array<i32>} : memref<1x16x16x16xbf16, #tpu.memory_space<vmem>>, vector<1x16x16x16xbf16>,
    %cst_33 = arith.constant dense<0.000000e+00> : vector<16xf32>
    %124 = vector.multi_reduction <add>, %119, %cst_33 [0, 1] : vector<16x16x16xf32> to vector<16xf32>
    %125 = vector.shape_cast %124 : vector<16xf32> to vector<1x16xf32>
    %c0_34 = arith.constant 0 : index
    %c0_35 = arith.constant 0 : index
    %c0_36 = arith.constant 0 : index
    %126 = vector.load %arg7[%c0_34, %c0_35, %c0_36] : memref<1x1x16xf32, #tpu.memory_space<vmem>>, vector<1x1x16xf32>
    %127 = vector.shape_cast %126 : vector<1x1x16xf32> to vector<1x16xf32>
    %128 = vector.shape_cast %125 : vector<1x16xf32> to vector<1x1x16xf32>
    tpu.vector_store %arg7[%c0_34, %c0_35, %c0_36], %128 {strides = array<i32>} : memref<1x1x16xf32, #tpu.memory_space<vmem>>, vector<1x1x16xf32>,
    %129 = arith.mulf %119, %119 : vector<16x16x16xf32>
    %cst_37 = arith.constant dense<0.000000e+00> : vector<16xf32>
    %130 = vector.multi_reduction <add>, %129, %cst_37 [0, 1] : vector<16x16x16xf32> to vector<16xf32>
    %131 = vector.shape_cast %130 : vector<16xf32> to vector<1x16xf32>
    %c0_38 = arith.constant 0 : index
    %c0_39 = arith.constant 0 : index
    %c0_40 = arith.constant 0 : index
    %132 = vector.load %arg8[%c0_38, %c0_39, %c0_40] : memref<1x1x16xf32, #tpu.memory_space<vmem>>, vector<1x1x16xf32>
    %133 = vector.shape_cast %132 : vector<1x1x16xf32> to vector<1x16xf32>
    %134 = vector.shape_cast %131 : vector<1x16xf32> to vector<1x1x16xf32>
    tpu.vector_store %arg8[%c0_38, %c0_39, %c0_40], %134 {strides = array<i32>} : memref<1x1x16xf32, #tpu.memory_space<vmem>>, vector<1x1x16xf32>,
    return
  }
  func.func @transform_0(%arg0: i32) -> (i32, i32, i32) {
    %c0_i32 = arith.constant 0 : i32
    %c0_i32_0 = arith.constant 0 : i32
    %c0_i32_1 = arith.constant 0 : i32
    return %arg0, %c0_i32, %c0_i32_0 : i32, i32, i32
  }
  func.func @transform_1(%arg0: i32) -> (i32, i32) {
    %c0_i32 = arith.constant 0 : i32
    %c0_i32_0 = arith.constant 0 : i32
    %c0_i32_1 = arith.constant 0 : i32
    return %c0_i32, %c0_i32_0 : i32, i32
  }
  func.func @transform_2(%arg0: i32) -> (i32, i32) {
    %c0_i32 = arith.constant 0 : i32
    %c0_i32_0 = arith.constant 0 : i32
    %c0_i32_1 = arith.constant 0 : i32
    return %c0_i32, %c0_i32_0 : i32, i32
  }
  func.func @transform_3(%arg0: i32) -> (i32, i32) {
    %c0_i32 = arith.constant 0 : i32
    %c0_i32_0 = arith.constant 0 : i32
    %c0_i32_1 = arith.constant 0 : i32
    return %c0_i32, %c0_i32_0 : i32, i32
  }
  func.func @transform_4(%arg0: i32) -> (i32, i32) {
    %c0_i32 = arith.constant 0 : i32
    %c0_i32_0 = arith.constant 0 : i32
    %c0_i32_1 = arith.constant 0 : i32
    return %c0_i32, %c0_i32_0 : i32, i32
  }
  func.func @transform_5(%arg0: i32) -> (i32, i32, i32, i32) {
    %c0_i32 = arith.constant 0 : i32
    %c0_i32_0 = arith.constant 0 : i32
    %c0_i32_1 = arith.constant 0 : i32
    %c0_i32_2 = arith.constant 0 : i32
    return %arg0, %c0_i32, %c0_i32_0, %c0_i32_1 : i32, i32, i32, i32
  }
  func.func @transform_6(%arg0: i32) -> (i32, i32, i32) {
    %c0_i32 = arith.constant 0 : i32
    %c0_i32_0 = arith.constant 0 : i32
    %c0_i32_1 = arith.constant 0 : i32
    return %arg0, %c0_i32, %c0_i32_0 : i32, i32, i32
  }
  func.func @transform_7(%arg0: i32) -> (i32, i32, i32) {
    %c0_i32 = arith.constant 0 : i32
    %c0_i32_0 = arith.constant 0 : i32
    %c0_i32_1 = arith.constant 0 : i32
    return %arg0, %c0_i32, %c0_i32_0 : i32, i32, i32
  }
}

module attributes {stable_mosaic.version = 11 : i64} {
  func.func @_project_kernel(%arg0: i32, %arg1: memref<512x16xbf16, #tpu.memory_space<vmem>>, %arg2: memref<1x16xf32, #tpu.memory_space<vmem>>, %arg3: memref<1x16xf32, #tpu.memory_space<vmem>>, %arg4: memref<4x16xf32, #tpu.memory_space<vmem>>, %arg5: memref<4x512xf32, #tpu.memory_space<vmem>>, %arg6: memref<1x4x1xf32, #tpu.memory_space<vmem>>, %arg7: memref<1x4x1xf32, #tpu.memory_space<vmem>>) attributes {dimension_semantics = [#tpu.dimension_semantics<parallel>], iteration_bounds = array<i64: 1>, scalar_prefetch = 0 : i64, scratch_operands = 0 : i64, tpu.core_type = #tpu.core_type<tc>, window_params = [{transform_indices = @transform_0, window_bounds = array<i64: 512, 16>}, {pipeline_mode = #tpu.pipeline_mode<synchronous>, transform_indices = @transform_1, window_bounds = array<i64: 1, 16>}, {pipeline_mode = #tpu.pipeline_mode<synchronous>, transform_indices = @transform_2, window_bounds = array<i64: 1, 16>}, {pipeline_mode = #tpu.pipeline_mode<synchronous>, transform_indices = @transform_3, window_bounds = array<i64: 4, 16>}, {transform_indices = @transform_4, window_bounds = array<i64: 4, 512>}, {transform_indices = @transform_5, window_bounds = array<i64: 1, 4, 1>}, {transform_indices = @transform_6, window_bounds = array<i64: 1, 4, 1>}]} {
    %c0 = arith.constant 0 : index
    %c0_0 = arith.constant 0 : index
    %0 = vector.load %arg1[%c0, %c0_0] : memref<512x16xbf16, #tpu.memory_space<vmem>>, vector<512x16xbf16>
    %1 = arith.extf %0 : vector<512x16xbf16> to vector<512x16xf32>
    %c0_1 = arith.constant 0 : index
    %c0_2 = arith.constant 0 : index
    %2 = vector.load %arg2[%c0_1, %c0_2] : memref<1x16xf32, #tpu.memory_space<vmem>>, vector<1x16xf32>
    %3 = vector.broadcast %2 : vector<1x16xf32> to vector<512x16xf32>
    %4 = arith.mulf %1, %3 : vector<512x16xf32>
    %c0_3 = arith.constant 0 : index
    %c0_4 = arith.constant 0 : index
    %5 = vector.load %arg3[%c0_3, %c0_4] : memref<1x16xf32, #tpu.memory_space<vmem>>, vector<1x16xf32>
    %6 = vector.broadcast %5 : vector<1x16xf32> to vector<512x16xf32>
    %7 = arith.addf %4, %6 : vector<512x16xf32>
    %cst = arith.constant 0.000000e+00 : f32
    %cst_5 = arith.constant 6.000000e+00 : f32
    %8 = vector.broadcast %cst : f32 to vector<512x16xf32>
    %9 = arith.maximumf %8, %7 : vector<512x16xf32>
    %10 = vector.broadcast %cst_5 : f32 to vector<512x16xf32>
    %11 = arith.minimumf %10, %9 : vector<512x16xf32>
    %c0_6 = arith.constant 0 : index
    %c0_7 = arith.constant 0 : index
    %12 = vector.load %arg4[%c0_6, %c0_7] : memref<4x16xf32, #tpu.memory_space<vmem>>, vector<4x16xf32>
    %13 = arith.truncf %12 : vector<4x16xf32> to vector<4x16xbf16>
    %14 = arith.truncf %11 : vector<512x16xf32> to vector<512x16xbf16>
    %cst_8 = arith.constant dense<0.000000e+00> : vector<4x512xf32>
    %15 = tpu.matmul %13, %14, %cst_8 {dimension_numbers = #tpu.dot_dimension_numbers<[1], [1], [0], [0], [0, 0, 1, 0], [], []>} : vector<4x16xbf16>, vector<512x16xbf16>, vector<4x512xf32> -> vector<4x512xf32>
    %c0_9 = arith.constant 0 : index
    %c0_10 = arith.constant 0 : index
    %16 = vector.load %arg5[%c0_9, %c0_10] : memref<4x512xf32, #tpu.memory_space<vmem>>, vector<4x512xf32>
    tpu.vector_store %arg5[%c0_9, %c0_10], %15 {strides = array<i32>} : memref<4x512xf32, #tpu.memory_space<vmem>>, vector<4x512xf32>,
    %cst_11 = arith.constant dense<0.000000e+00> : vector<4xf32>
    %17 = vector.multi_reduction <add>, %15, %cst_11 [1] : vector<4x512xf32> to vector<4xf32>
    %18 = vector.shape_cast %17 : vector<4xf32> to vector<4x1xf32>
    %c0_12 = arith.constant 0 : index
    %c0_13 = arith.constant 0 : index
    %c0_14 = arith.constant 0 : index
    %19 = vector.load %arg6[%c0_12, %c0_13, %c0_14] : memref<1x4x1xf32, #tpu.memory_space<vmem>>, vector<1x4x1xf32>
    %20 = vector.shape_cast %19 : vector<1x4x1xf32> to vector<4x1xf32>
    %21 = vector.shape_cast %18 : vector<4x1xf32> to vector<1x4x1xf32>
    tpu.vector_store %arg6[%c0_12, %c0_13, %c0_14], %21 {strides = array<i32>} : memref<1x4x1xf32, #tpu.memory_space<vmem>>, vector<1x4x1xf32>,
    %22 = arith.mulf %15, %15 : vector<4x512xf32>
    %cst_15 = arith.constant dense<0.000000e+00> : vector<4xf32>
    %23 = vector.multi_reduction <add>, %22, %cst_15 [1] : vector<4x512xf32> to vector<4xf32>
    %24 = vector.shape_cast %23 : vector<4xf32> to vector<4x1xf32>
    %c0_16 = arith.constant 0 : index
    %c0_17 = arith.constant 0 : index
    %c0_18 = arith.constant 0 : index
    %25 = vector.load %arg7[%c0_16, %c0_17, %c0_18] : memref<1x4x1xf32, #tpu.memory_space<vmem>>, vector<1x4x1xf32>
    %26 = vector.shape_cast %25 : vector<1x4x1xf32> to vector<4x1xf32>
    %27 = vector.shape_cast %24 : vector<4x1xf32> to vector<1x4x1xf32>
    tpu.vector_store %arg7[%c0_16, %c0_17, %c0_18], %27 {strides = array<i32>} : memref<1x4x1xf32, #tpu.memory_space<vmem>>, vector<1x4x1xf32>,
    return
  }
  func.func @transform_0(%arg0: i32) -> (i32, i32) {
    %c0_i32 = arith.constant 0 : i32
    %c0_i32_0 = arith.constant 0 : i32
    return %arg0, %c0_i32 : i32, i32
  }
  func.func @transform_1(%arg0: i32) -> (i32, i32) {
    %c0_i32 = arith.constant 0 : i32
    %c0_i32_0 = arith.constant 0 : i32
    %c0_i32_1 = arith.constant 0 : i32
    return %c0_i32, %c0_i32_0 : i32, i32
  }
  func.func @transform_2(%arg0: i32) -> (i32, i32) {
    %c0_i32 = arith.constant 0 : i32
    %c0_i32_0 = arith.constant 0 : i32
    %c0_i32_1 = arith.constant 0 : i32
    return %c0_i32, %c0_i32_0 : i32, i32
  }
  func.func @transform_3(%arg0: i32) -> (i32, i32) {
    %c0_i32 = arith.constant 0 : i32
    %c0_i32_0 = arith.constant 0 : i32
    %c0_i32_1 = arith.constant 0 : i32
    return %c0_i32, %c0_i32_0 : i32, i32
  }
  func.func @transform_4(%arg0: i32) -> (i32, i32) {
    %c0_i32 = arith.constant 0 : i32
    %c0_i32_0 = arith.constant 0 : i32
    return %c0_i32, %arg0 : i32, i32
  }
  func.func @transform_5(%arg0: i32) -> (i32, i32, i32) {
    %c0_i32 = arith.constant 0 : i32
    %c0_i32_0 = arith.constant 0 : i32
    %c0_i32_1 = arith.constant 0 : i32
    return %arg0, %c0_i32, %c0_i32_0 : i32, i32, i32
  }
  func.func @transform_6(%arg0: i32) -> (i32, i32, i32) {
    %c0_i32 = arith.constant 0 : i32
    %c0_i32_0 = arith.constant 0 : i32
    %c0_i32_1 = arith.constant 0 : i32
    return %arg0, %c0_i32, %c0_i32_0 : i32, i32, i32
  }
}

module attributes {stable_mosaic.version = 11 : i64} {
  func.func @_finalize_kernel(%arg0: i32, %arg1: i32, %arg2: memref<4x256xf32, #tpu.memory_space<vmem>>, %arg3: memref<4x1xf32, #tpu.memory_space<vmem>>, %arg4: memref<4x1xf32, #tpu.memory_space<vmem>>, %arg5: memref<1x4x256xf32, #tpu.memory_space<vmem>>, %arg6: memref<1x4x256xf32, #tpu.memory_space<vmem>>) attributes {dimension_semantics = [#tpu.dimension_semantics<parallel>, #tpu.dimension_semantics<parallel>], iteration_bounds = array<i64: 2, 1>, scalar_prefetch = 0 : i64, scratch_operands = 0 : i64, tpu.core_type = #tpu.core_type<tc>, window_params = [{transform_indices = @transform_0, window_bounds = array<i64: 4, 256>}, {pipeline_mode = #tpu.pipeline_mode<synchronous>, transform_indices = @transform_1, window_bounds = array<i64: 4, 1>}, {pipeline_mode = #tpu.pipeline_mode<synchronous>, transform_indices = @transform_2, window_bounds = array<i64: 4, 1>}, {transform_indices = @transform_3, window_bounds = array<i64: 1, 4, 256>}, {transform_indices = @transform_4, window_bounds = array<i64: 1, 4, 256>}]} {
    %c0 = arith.constant 0 : index
    %c0_0 = arith.constant 0 : index
    %0 = vector.load %arg2[%c0, %c0_0] : memref<4x256xf32, #tpu.memory_space<vmem>>, vector<4x256xf32>
    %c0_1 = arith.constant 0 : index
    %c0_2 = arith.constant 0 : index
    %1 = vector.load %arg3[%c0_1, %c0_2] : memref<4x1xf32, #tpu.memory_space<vmem>>, vector<4x1xf32>
    %2 = vector.broadcast %1 : vector<4x1xf32> to vector<4x256xf32>
    %3 = arith.mulf %0, %2 : vector<4x256xf32>
    %c0_3 = arith.constant 0 : index
    %c0_4 = arith.constant 0 : index
    %4 = vector.load %arg4[%c0_3, %c0_4] : memref<4x1xf32, #tpu.memory_space<vmem>>, vector<4x1xf32>
    %5 = vector.broadcast %4 : vector<4x1xf32> to vector<4x256xf32>
    %6 = arith.addf %3, %5 : vector<4x256xf32>
    %c0_5 = arith.constant 0 : index
    %c0_6 = arith.constant 0 : index
    %c0_7 = arith.constant 0 : index
    %7 = vector.load %arg5[%c0_5, %c0_6, %c0_7] : memref<1x4x256xf32, #tpu.memory_space<vmem>>, vector<1x4x256xf32>
    %8 = vector.shape_cast %7 : vector<1x4x256xf32> to vector<4x256xf32>
    %9 = arith.addf %6, %8 : vector<4x256xf32>
    %c0_8 = arith.constant 0 : index
    %c0_9 = arith.constant 0 : index
    %c0_10 = arith.constant 0 : index
    %10 = vector.load %arg6[%c0_8, %c0_9, %c0_10] : memref<1x4x256xf32, #tpu.memory_space<vmem>>, vector<1x4x256xf32>
    %11 = vector.shape_cast %10 : vector<1x4x256xf32> to vector<4x256xf32>
    %12 = vector.shape_cast %9 : vector<4x256xf32> to vector<1x4x256xf32>
    tpu.vector_store %arg6[%c0_8, %c0_9, %c0_10], %12 {strides = array<i32>} : memref<1x4x256xf32, #tpu.memory_space<vmem>>, vector<1x4x256xf32>,
    return
  }
  func.func @transform_0(%arg0: i32, %arg1: i32) -> (i32, i32) {
    %c1_i32 = arith.constant 1 : i32
    %0 = arith.muli %arg0, %c1_i32 : i32
    %1 = arith.addi %0, %arg1 : i32
    %c0_i32 = arith.constant 0 : i32
    %c0_i32_0 = arith.constant 0 : i32
    return %c0_i32, %1 : i32, i32
  }
  func.func @transform_1(%arg0: i32, %arg1: i32) -> (i32, i32) {
    %c0_i32 = arith.constant 0 : i32
    %c0_i32_0 = arith.constant 0 : i32
    %c0_i32_1 = arith.constant 0 : i32
    return %c0_i32, %c0_i32_0 : i32, i32
  }
  func.func @transform_2(%arg0: i32, %arg1: i32) -> (i32, i32) {
    %c0_i32 = arith.constant 0 : i32
    %c0_i32_0 = arith.constant 0 : i32
    %c0_i32_1 = arith.constant 0 : i32
    return %c0_i32, %c0_i32_0 : i32, i32
  }
  func.func @transform_3(%arg0: i32, %arg1: i32) -> (i32, i32, i32) {
    %c0_i32 = arith.constant 0 : i32
    %c0_i32_0 = arith.constant 0 : i32
    return %arg0, %c0_i32, %arg1 : i32, i32, i32
  }
  func.func @transform_4(%arg0: i32, %arg1: i32) -> (i32, i32, i32) {
    %c0_i32 = arith.constant 0 : i32
    %c0_i32_0 = arith.constant 0 : i32
    return %arg0, %c0_i32, %arg1 : i32, i32, i32
  }
}

</mosaic_0001>

<bundles_post_ra>
// kernel: inverted_bottleneck.4
= control target key start
LH: loop header
LB: loop body
LE: loop exit
PB: predicated region body
PF: predicated region fallthrough
CT: control target
= control target key end

     0   :  { %s475_s9 = smov 0   ;;  %s477_s10 = smov 0   ;;  %s511_s0 = inlined_call_operand.vmem [shape: f32[2,4,256], index: 0, kind: input, shape index: {}]   ;;  %s512_s1 = inlined_call_operand.vmem [shape: f32[2,1,4,4], index: 1, kind: output, shape index: {0}]   ;;  %s513_s2 = inlined_call_operand.vmem [shape: f32[2,1,4,1], index: 2, kind: output, shape index: {1}]  }
   0x1   :  { %s479_s11 = smov 0  }
   0x2 LB: > { %s25_s12 = sadd.s32 1, %s454_s10  ;;  %p403_p0 = scmp.ge.s32.totalorder %s458_s11, 1  ;;  %s458_s11 = sphi %s479_s11, %s13_s11   ;;  %s454_s10 = sphi %s477_s10, %s515_s10   ;;  %s450_s9 = sphi %s475_s9, %s514_s9  }
   0x3   : > { %p27_p1 = scmp.ge.s32.totalorder %s25_s12, 2  ;;  %p138_p2 = scmp.lt.s32.totalorder %s458_s11, 3 }
   0x5   : > { %s517_s12 = smov (%p27_p1, %s25_s12), 0  ;;  %p139_p3 = pnand %p403_p0, %p138_p2 }
   0x6   : > { %p174_p4 = scmp.lt.s32.totalorder (!%p139_p3), %s450_s9, 1  ;;  %vm273_vm0 = vcmask (!%p139_p3), 1043456   ;;  %vm279_vm1 = vcmask (!%p139_p3), 3072   ;;  %vm271_vm2 = vcmask (!%p139_p3), 27648  }
   0x7   : > { %142 = sbr.rel (%p139_p3) target bundleno = 237 (0xed), region = 24 }
   0xe   : > { %s519_s9 = smov (!%p174_p4, %s450_s9), 1 }
   0xf   : > { %s410_s13 = sshll.u32 %s519_s9, 3  ;;  %s406_s17 = sshll.u32 %s519_s9, 2 }
  0x10   : > { %s181_s16 = scalar_lea.vmem %s511_s0, %s410_s13  ;;  %s196_s20 = scalar_lea.vmem %s513_s2, %s406_s17 }
  0x11   : > { %v197_v0 = vld [vmem:[%s181_s16] sm:$0xff]  ;;  %s189_s23 = scalar_lea.vmem %s512_s1, %s406_s17 }
  0x12   : > { %v199_v1 = vcombine.high %v197_v0, %v197_v0  ;;  %v274_v2 = vsel %vm273_vm0, %v197_v0, 0.0 }
  0x14   : > { %201 = vmatprep.subr.mxu0 %v199_v1  ;;  %265 = vmatprep.mubr.f32.mxu0 %v199_v1  ;;  %v275_v3 = vsel %vm273_vm0, %v199_v1, 0.0 }
  0x15   : > { %202 = vmatpush1.xpose.msra.mxu0 %v197_v0  ;;  %v276_v4 = vadd.f32 %v275_v3, %v274_v2 }
  0x17   : > { %277 = vadd.xlane.f32.xlu0 %v276_v4 }
  0x18   : > { %266 = vmatmul.mubr.f32.vlgmr.msra.gmra.mrb[0].mxu0 %v197_v0 }
  0xa4   : > { %v278_v5 = vpop.xlane.xlu0 %277 }
  0xa5   : > { %280 = vst.msk [vmem:[%s196_s20] sm:$0xf] %vm279_vm1, %v278_v5 }
  0xeb   : > { %v267_v6 = vpop.f32.mrb[0].mxu0 }
  0xec   : > { %272 = vst.msk [vmem:[%s189_s23] sm:$0xf] %vm271_vm2, %v267_v6  ;;  %v269_v7 = vpop.f32.mrb[1].mxu0 }
  0xed PF: > { %s13_s11 = sadd.s32 1, %s458_s11   ;;  %s514_s9 = smov %s454_s10 }
  0xee   : > { %p10_p5 = scmp.ge.s32.totalorder %s13_s11, 4   ;;  %s515_s10 = smov %s517_s12 }
  0xf0   :  { %12 = sbr.rel (!%p10_p5) target bundleno = 2 (0x2), region = 66 }

// kernel: inverted_bottleneck.7
= control target key start
LH: loop header
LB: loop body
LE: loop exit
PB: predicated region body
PF: predicated region fallthrough
CT: control target
= control target key end

     0   :  { %s490_s15 = smov 0   ;;  %s492_s16 = smov 0   ;;  %s532_s0 = inlined_call_operand.vmem [shape: f32[4,512], index: 0, kind: input, shape index: {}]   ;;  %s533_s1 = inlined_call_operand.vmem [shape: f32[4,1], index: 1, kind: input, shape index: {}]   ;;  %s534_s2 = inlined_call_operand.vmem [shape: f32[4,1], index: 2, kind: input, shape index: {}]   ;;  %s535_s3 = inlined_call_operand.vmem [shape: f32[2,4,256], index: 3, kind: input, shape index: {}]   ;;  %s536_s4 = inlined_call_operand.vmem [shape: f32[2,4,256], index: 4, kind: output, shape index: {}]  }
   0x1   :  { %s494_s17 = smov 0  }
   0x2 LB: > { %s26_s18 = sadd.s32 1, %s457_s16  ;;  %p401_p0 = scmp.ge.s32.totalorder %s461_s17, 1  ;;  %s461_s17 = sphi %s494_s17, %s14_s17   ;;  %s457_s16 = sphi %s492_s16, %s538_s16   ;;  %s453_s15 = sphi %s490_s15, %s537_s15  }
   0x3   : > { %p28_p1 = scmp.ge.s32.totalorder %s26_s18, 2  ;;  %p198_p2 = scmp.lt.s32.totalorder %s461_s17, 3 }
   0x5   : > { %s540_s18 = smov (%p28_p1, %s26_s18), 0  ;;  %p199_p3 = pnand %p401_p0, %p198_p2 }
   0x6   : > { %v267_v0 = vld [vmem:[%s533_s1] sm:$0xf] (!%p199_p3)  ;;  %v463_v1 = vmov (!%p199_p3), 0   ;;  %s402_s23 = sshll.u32 (!%p199_p3), %s453_s15, 1  ;;  %v464_v3 = vmov (!%p199_p3), 839922192   ;;  %v275_v5 = vlaneseq (!%p199_p3) }
   0x7   : > { %202 = sbr.rel (%p199_p3) target bundleno = 147 (0x93), region = 36  ;;  %438 = vset.pattern.permute.xlu0 (!%p199_p3), %v463_v1  ;;  %v281_v2 = vld [vmem:[%s534_s2] sm:$0xf] (!%p199_p3)  ;;  %p240_p4 = scmp.lt.s32.totalorder (!%p199_p3), %s402_s23, 3  ;;  %v273_v4 = vunpack.c.l.s4 (!%p199_p3), %v464_v3 }
   0x8   : > { %270 = vperm.xlu0 (!%p199_p3), %438, %v267_v0   ;;  %p247_p5 = scmp.lt.s32.totalorder (!%p199_p3), %s453_s15, 1  ;;  %v276_v7 = vshrl.u32 (!%p199_p3), %v275_v5, 7 }
   0x9   : > { %v274_v6 = vunpack.c.0.s8 (!%p199_p3), %v273_v4 }
   0xb   : > { %v277_v8 = vsub.s32 (!%p199_p3), %v274_v6, %v276_v7 }
   0xc   : > { %284 = vperm.xlu0 (!%p199_p3), %438, %v281_v2  }
   0xe   : > { %s542_s23 = smov (!%p240_p4, %s402_s23), 3  ;;  %s544_s15 = smov (!%p247_p5, %s453_s15), 1 }
   0xf   : > { %s403_s24 = sshll.u32 %s542_s23, 2  ;;  %s410_s28 = sshll.u32 %s544_s15, 3 }
  0x10   : > { %s243_s27 = scalar_lea.vmem %s532_s0, %s403_s24  ;;  %s254_s5 = scalar_lea.vmem %s535_s3, %s410_s28 }
  0x11   : > { %v266_v11 = vld [vmem:[%s243_s27] sm:$0xff]  ;;  %s264_s8 = scalar_lea.vmem %s536_s4, %s410_s28 }
  0x12   : > { %v295_v15 = vld [vmem:[%s254_s5] sm:$0xff] }
  0x87   : > { %v271_v9 = vpop.permute.xlu0 %270 }
  0x88   : > { %v278_v10 = vrot.slane %v271_v9, %v277_v8 }
  0x8a   : > { %v280_v13 = vmul.f32 %v278_v10, %v266_v11 }
  0x8b   : > { %v285_v12 = vpop.permute.xlu0 %284 }
  0x8c   : > { %v292_v14 = vrot.slane %v285_v12, %v277_v8 }
  0x8e   : > { %v294_v16 = vadd.f32 %v292_v14, %v280_v13 }
  0x90   : > { %v296_v17 = vadd.f32 %v295_v15, %v294_v16 }
  0x92   : > { %297 = vst [vmem:[%s264_s8] sm:$0xff] %v296_v17 }
  0x93 PF: > { %s14_s17 = sadd.s32 1, %s461_s17   ;;  %s537_s15 = smov %s457_s16 }
  0x94   : > { %p11_p6 = scmp.ge.s32.totalorder %s14_s17, 4   ;;  %s538_s16 = smov %s540_s18 }
  0x96   :  { %13 = sbr.rel (!%p11_p6) target bundleno = 2 (0x2), region = 69 }

// kernel: inverted_bottleneck.6
= control target key start
LH: loop header
LB: loop body
LE: loop exit
PB: predicated region body
PF: predicated region fallthrough
CT: control target
= control target key end

     0   :  { %vm453_vm0 = vcmask 130048   ;;  %vm645_vm1 = vcmask 1043456   ;;  %vm655_vm2 = vcmask 3072   ;;  %s1226_s0 = inlined_call_operand.vmem [shape: bf16[512,16], index: 0, kind: input, shape index: {}]   ;;  %s1227_s1 = inlined_call_operand.vmem [shape: f32[1,16], index: 1, kind: input, shape index: {}]   ;;  %s1228_s2 = inlined_call_operand.vmem [shape: f32[1,16], index: 2, kind: input, shape index: {}]   ;;  %s1229_s3 = inlined_call_operand.vmem [shape: f32[4,16], index: 3, kind: input, shape index: {}]   ;;  %s1230_s4 = inlined_call_operand.vmem [shape: f32[4,512], index: 4, kind: output, shape index: {0}]   ;;  %s1231_s5 = inlined_call_operand.vmem [shape: f32[1,4,1], index: 5, kind: output, shape index: {1}]   ;;  %s1232_s6 = inlined_call_operand.vmem [shape: f32[1,4,1], index: 6, kind: output, shape index: {2}]  }
   0x1   :  { %v822_v0 = vld [vmem:[%s1226_s0 + $0x40] sm:$0xff]   ;;  %v823_v36 = vld [vmem:[%s1226_s0 + $0x48] sm:$0xff]  }
   0x2   :  { %v939_v1 = vld [vmem:[%s1227_s1] ss:$0 sm:$0xff]  ;;  %v721_v2 = vunpack.c.l.bf16 %v822_v0  ;;  %v722_v3 = vunpack.c.h.bf16 %v822_v0  ;;  %v839_v41 = vld [vmem:[%s1226_s0 + $0xc8] sm:$0xff]   ;;  %v725_v50 = vunpack.c.l.bf16 %v823_v36  ;;  %v726_v53 = vunpack.c.h.bf16 %v823_v36  ;;  %v816_v36 = vld [vmem:[%s1226_s0 + $0x10] sm:$0xff]  }
   0x3   :  { %v838_v4 = vld [vmem:[%s1226_s0 + $0xc0] sm:$0xff]   ;;  %v815_v46 = vld [vmem:[%s1226_s0 + $0x8] sm:$0xff]   ;;  %v789_v54 = vunpack.c.l.bf16 %v839_v41  ;;  %v790_v57 = vunpack.c.h.bf16 %v839_v41 }
   0x4   :  { %v688_v5 = vld [vmem:[%s1226_s0] sm:$0xff]   ;;  %v785_v8 = vunpack.c.l.bf16 %v838_v4  ;;  %v786_v9 = vunpack.c.h.bf16 %v838_v4  ;;  %v172_v12 = vmul.f32 %v721_v2, %v939_v1  ;;  %v173_v13 = vmul.f32 %v722_v3, %v939_v1  ;;  %v831_v59 = vld [vmem:[%s1226_s0 + $0x88] sm:$0xff]  }
   0x5   :  { %v830_v6 = vld [vmem:[%s1226_s0 + $0x80] sm:$0xff]   ;;  %v689_v10 = vunpack.c.l.bf16 %v688_v5  ;;  %v690_v11 = vunpack.c.h.bf16 %v688_v5  ;;  %v174_v56 = vmul.f32 %v725_v50, %v939_v1  ;;  %v693_v58 = vunpack.c.l.bf16 %v815_v46 }
   0x6   :  { %v953_v7 = vld [vmem:[%s1228_s2] ss:$0 sm:$0xff]  ;;  %v753_v14 = vunpack.c.l.bf16 %v830_v6  ;;  %v754_v15 = vunpack.c.h.bf16 %v830_v6  ;;  %v204_v16 = vmul.f32 %v785_v8, %v939_v1  ;;  %v205_v17 = vmul.f32 %v786_v9, %v939_v1 }
   0x7   :  { %v156_v18 = vmul.f32 %v689_v10, %v939_v1  ;;  %v157_v19 = vmul.f32 %v690_v11, %v939_v1  ;;  %v243_v20 = vadd.f32 %v953_v7, %v172_v12  ;;  %v244_v21 = vadd.f32 %v953_v7, %v173_v13 }
   0x8   :  { %v188_v22 = vmul.f32 %v753_v14, %v939_v1  ;;  %v189_v23 = vmul.f32 %v754_v15, %v939_v1  ;;  %v275_v24 = vadd.f32 %v953_v7, %v204_v16  ;;  %v276_v25 = vadd.f32 %v953_v7, %v205_v17 }
   0x9   :  { %v227_v26 = vadd.f32 %v953_v7, %v156_v18  ;;  %v228_v27 = vadd.f32 %v953_v7, %v157_v19  ;;  %v307_v28 = vmax.f32 %v243_v20, 0.0  ;;  %v308_v29 = vmax.f32 %v244_v21, 0.0  ;;  %v824_v18 = vld [vmem:[%s1226_s0 + $0x50] sm:$0xff]  }
   0xa   :  { %v259_v30 = vadd.f32 %v953_v7, %v188_v22  ;;  %v260_v31 = vadd.f32 %v953_v7, %v189_v23  ;;  %v339_v32 = vmax.f32 %v275_v24, 0.0  ;;  %v340_v33 = vmax.f32 %v276_v25, 0.0 }
   0xb   :  { %v291_v34 = vmax.f32 %v227_v26, 0.0  ;;  %v292_v35 = vmax.f32 %v228_v27, 0.0  ;;  %v371_v37 = vmin.f32 %v307_v28, 6.0  ;;  %v372_v38 = vmin.f32 %v308_v29, 6.0  ;;  %v840_v27 = vld [vmem:[%s1226_s0 + $0xd0] sm:$0xff]  }
   0xc   :  { %v323_v39 = vmax.f32 %v259_v30, 0.0  ;;  %v324_v40 = vmax.f32 %v260_v31, 0.0  ;;  %v403_v42 = vmin.f32 %v339_v32, 6.0  ;;  %v404_v43 = vmin.f32 %v340_v33, 6.0 }
   0xd   :  { %v355_v44 = vmin.f32 %v291_v34, 6.0  ;;  %v356_v45 = vmin.f32 %v292_v35, 6.0  ;;  %v429_v47 = vpack.c.bf16 %v372_v38, %v371_v37  ;;  %v175_v61 = vmul.f32 %v726_v53, %v939_v1 }
   0xe   :  { %v387_v48 = vmin.f32 %v323_v39, 6.0  ;;  %v388_v49 = vmin.f32 %v324_v40, 6.0  ;;  %v445_v51 = vpack.c.bf16 %v404_v43, %v403_v42  ;;  %v206_v62 = vmul.f32 %v789_v54, %v939_v1 }
   0xf   :  { %v421_v52 = vpack.c.bf16 %v356_v45, %v355_v44  ;;  %882 = vmatprep.subr.msk.bf16.mxu0 %vm453_vm0, %v429_v47  ;;  %v694_v63 = vunpack.c.h.bf16 %v815_v46  ;;  %v245_v2 = vadd.f32 %v953_v7, %v174_v56  ;;  %v207_v3 = vmul.f32 %v790_v57, %v939_v1 }
  0x10   :  { %v437_v55 = vpack.c.bf16 %v388_v49, %v387_v48  ;;  %890 = vmatprep.subr.msk.bf16.mxu1 %vm453_vm0, %v445_v51  ;;  %v158_v4 = vmul.f32 %v693_v58, %v939_v1  ;;  %v246_v5 = vadd.f32 %v953_v7, %v175_v61  ;;  %v277_v6 = vadd.f32 %v953_v7, %v206_v62  ;;  %v832_v49 = vld [vmem:[%s1226_s0 + $0x90] sm:$0xff]   ;;  %v825_v62 = vld [vmem:[%s1226_s0 + $0x58] sm:$0xff]  }
  0x11   :  { %v458_v60 = vsel %vm453_vm0, %v421_v52, 0  ;;  %v159_v8 = vmul.f32 %v694_v63, %v939_v1  ;;  %v757_v9 = vunpack.c.l.bf16 %v831_v59  ;;  %v309_v10 = vmax.f32 %v245_v2, 0.0 }
  0x12   :  { %847 = vmatpush3.bf16.xpose.msra.mxu0 %v458_v60  ;;  %v506_v0 = vsel %vm453_vm0, %v437_v55, 0  ;;  %v278_v11 = vadd.f32 %v953_v7, %v207_v3  ;;  %v229_v12 = vadd.f32 %v953_v7, %v158_v4  ;;  %v758_v13 = vunpack.c.h.bf16 %v831_v59 }
  0x13   :  { %865 = vmatpush3.bf16.xpose.msra.mxu1 %v506_v0  ;;  %v310_v14 = vmax.f32 %v246_v5, 0.0  ;;  %v341_v15 = vmax.f32 %v277_v6, 0.0  ;;  %v230_v16 = vadd.f32 %v953_v7, %v159_v8  ;;  %v190_v17 = vmul.f32 %v757_v9, %v939_v1 }
  0x14   :  { %v373_v19 = vmin.f32 %v309_v10, 6.0  ;;  %v342_v20 = vmax.f32 %v278_v11, 0.0  ;;  %v293_v21 = vmax.f32 %v229_v12, 0.0  ;;  %v191_v22 = vmul.f32 %v758_v13, %v939_v1  ;;  %v841_v13 = vld [vmem:[%s1226_s0 + $0xd8] sm:$0xff]  }
  0x15   :  { %v374_v23 = vmin.f32 %v310_v14, 6.0  ;;  %v405_v24 = vmin.f32 %v341_v15, 6.0  ;;  %v294_v25 = vmax.f32 %v230_v16, 0.0  ;;  %v261_v26 = vadd.f32 %v953_v7, %v190_v17 }
  0x16   :  { %v406_v28 = vmin.f32 %v342_v20, 6.0  ;;  %v357_v29 = vmin.f32 %v293_v21, 6.0  ;;  %v262_v30 = vadd.f32 %v953_v7, %v191_v22  ;;  %v729_v31 = vunpack.c.l.bf16 %v824_v18  ;;  %v817_v22 = vld [vmem:[%s1226_s0 + $0x18] sm:$0xff]  }
  0x17   :  { %v430_v32 = vpack.c.bf16 %v374_v23, %v373_v19  ;;  %v358_v33 = vmin.f32 %v294_v25, 6.0  ;;  %v325_v34 = vmax.f32 %v261_v26, 0.0  ;;  %v730_v35 = vunpack.c.h.bf16 %v824_v18 }
  0x18   :  { %v446_v37 = vpack.c.bf16 %v406_v28, %v405_v24  ;;  %v326_v38 = vmax.f32 %v262_v30, 0.0  ;;  %v176_v39 = vmul.f32 %v729_v31, %v939_v1  ;;  %v793_v40 = vunpack.c.l.bf16 %v840_v27 }
  0x19   :  { %883 = vmatprep.subr.msk.bf16.mxu0 %vm453_vm0, %v430_v32  ;;  %v422_v41 = vpack.c.bf16 %v358_v33, %v357_v29  ;;  %v389_v42 = vmin.f32 %v325_v34, 6.0  ;;  %v177_v43 = vmul.f32 %v730_v35, %v939_v1  ;;  %v794_v44 = vunpack.c.h.bf16 %v840_v27 }
  0x1a   :  { %891 = vmatprep.subr.msk.bf16.mxu1 %vm453_vm0, %v446_v37  ;;  %v390_v45 = vmin.f32 %v326_v38, 6.0  ;;  %v247_v46 = vadd.f32 %v953_v7, %v176_v39  ;;  %v208_v47 = vmul.f32 %v793_v40, %v939_v1  ;;  %v697_v48 = vunpack.c.l.bf16 %v816_v36  ;;  %v833_v39 = vld [vmem:[%s1226_s0 + $0x98] sm:$0xff]  }
  0x1b   :  { %v461_v50 = vsel %vm453_vm0, %v422_v41, 0  ;;  %v248_v51 = vadd.f32 %v953_v7, %v177_v43  ;;  %v209_v52 = vmul.f32 %v794_v44, %v939_v1  ;;  %v698_v53 = vunpack.c.h.bf16 %v816_v36 }
  0x1c   :  { %849 = vmatpush3.bf16.xpose.msra.mxu0 %v461_v50  ;;  %v438_v54 = vpack.c.bf16 %v390_v45, %v389_v42  ;;  %v311_v55 = vmax.f32 %v247_v46, 0.0  ;;  %v279_v56 = vadd.f32 %v953_v7, %v208_v47  ;;  %v160_v57 = vmul.f32 %v697_v48, %v939_v1 }
  0x1d   :  { %v312_v58 = vmax.f32 %v248_v51, 0.0  ;;  %v280_v59 = vadd.f32 %v953_v7, %v209_v52  ;;  %v161_v60 = vmul.f32 %v698_v53, %v939_v1  ;;  %v761_v61 = vunpack.c.l.bf16 %v832_v49 }
  0x1e   :  { %v509_v63 = vsel %vm453_vm0, %v438_v54, 0  ;;  %v375_v0 = vmin.f32 %v311_v55, 6.0  ;;  %v343_v2 = vmax.f32 %v279_v56, 0.0  ;;  %v231_v3 = vadd.f32 %v953_v7, %v160_v57  ;;  %v826_v56 = vld [vmem:[%s1226_s0 + $0x60] sm:$0xff]  }
  0x1f   :  { %867 = vmatpush3.bf16.xpose.msra.mxu1 %v509_v63  ;;  %v376_v4 = vmin.f32 %v312_v58, 6.0  ;;  %v344_v5 = vmax.f32 %v280_v59, 0.0  ;;  %v232_v6 = vadd.f32 %v953_v7, %v161_v60  ;;  %v762_v8 = vunpack.c.h.bf16 %v832_v49 }
  0x20   :  { %v407_v9 = vmin.f32 %v343_v2, 6.0  ;;  %v295_v10 = vmax.f32 %v231_v3, 0.0  ;;  %v192_v11 = vmul.f32 %v761_v61, %v939_v1  ;;  %v733_v12 = vunpack.c.l.bf16 %v825_v62  ;;  %v842_v61 = vld [vmem:[%s1226_s0 + $0xe0] sm:$0xff]  }
  0x21   :  { %v431_v14 = vpack.c.bf16 %v376_v4, %v375_v0  ;;  %v408_v15 = vmin.f32 %v344_v5, 6.0  ;;  %v296_v16 = vmax.f32 %v232_v6, 0.0  ;;  %v193_v17 = vmul.f32 %v762_v8, %v939_v1  ;;  %v818_v8 = vld [vmem:[%s1226_s0 + $0x20] sm:$0xff]  }
  0x22   :  { %v359_v18 = vmin.f32 %v295_v10, 6.0  ;;  %v263_v19 = vadd.f32 %v953_v7, %v192_v11  ;;  %v734_v20 = vunpack.c.h.bf16 %v825_v62  ;;  %v178_v21 = vmul.f32 %v733_v12, %v939_v1 }
  0x23   :  { %884 = vmatprep.subr.msk.bf16.mxu0 %vm453_vm0, %v431_v14  ;;  %v447_v23 = vpack.c.bf16 %v408_v15, %v407_v9  ;;  %v360_v24 = vmin.f32 %v296_v16, 6.0  ;;  %v264_v25 = vadd.f32 %v953_v7, %v193_v17  ;;  %v797_v26 = vunpack.c.l.bf16 %v841_v13 }
  0x24   :  { %v327_v27 = vmax.f32 %v263_v19, 0.0  ;;  %v179_v28 = vmul.f32 %v734_v20, %v939_v1  ;;  %v249_v29 = vadd.f32 %v953_v7, %v178_v21  ;;  %v798_v30 = vunpack.c.h.bf16 %v841_v13 }
  0x25   :  { %892 = vmatprep.subr.msk.bf16.mxu1 %vm453_vm0, %v447_v23  ;;  %v423_v31 = vpack.c.bf16 %v360_v24, %v359_v18  ;;  %v328_v32 = vmax.f32 %v264_v25, 0.0  ;;  %v210_v33 = vmul.f32 %v797_v26, %v939_v1  ;;  %v701_v34 = vunpack.c.l.bf16 %v817_v22 }
  0x26   :  { %v391_v35 = vmin.f32 %v327_v27, 6.0  ;;  %v250_v36 = vadd.f32 %v953_v7, %v179_v28  ;;  %v313_v37 = vmax.f32 %v249_v29, 0.0  ;;  %v211_v38 = vmul.f32 %v798_v30, %v939_v1  ;;  %v834_v29 = vld [vmem:[%s1226_s0 + $0xa0] sm:$0xff]  }
  0x27   :  { %v464_v40 = vsel %vm453_vm0, %v423_v31, 0  ;;  %v392_v41 = vmin.f32 %v328_v32, 6.0  ;;  %v281_v42 = vadd.f32 %v953_v7, %v210_v33  ;;  %v702_v43 = vunpack.c.h.bf16 %v817_v22 }
  0x28   :  { %851 = vmatpush3.bf16.xpose.msra.mxu0 %v464_v40  ;;  %v314_v44 = vmax.f32 %v250_v36, 0.0  ;;  %v377_v45 = vmin.f32 %v313_v37, 6.0  ;;  %v282_v46 = vadd.f32 %v953_v7, %v211_v38  ;;  %v162_v47 = vmul.f32 %v701_v34, %v939_v1 }
  0x29   :  { %v439_v48 = vpack.c.bf16 %v392_v41, %v391_v35  ;;  %v345_v49 = vmax.f32 %v281_v42, 0.0  ;;  %v163_v50 = vmul.f32 %v702_v43, %v939_v1  ;;  %v765_v51 = vunpack.c.l.bf16 %v833_v39  ;;  %v827_v42 = vld [vmem:[%s1226_s0 + $0x68] sm:$0xff]  }
  0x2a   :  { %v378_v52 = vmin.f32 %v314_v44, 6.0  ;;  %v346_v53 = vmax.f32 %v282_v46, 0.0  ;;  %v233_v54 = vadd.f32 %v953_v7, %v162_v47  ;;  %v766_v55 = vunpack.c.h.bf16 %v833_v39  ;;  %v843_v47 = vld [vmem:[%s1226_s0 + $0xe8] sm:$0xff]  }
  0x2b   :  { %v512_v57 = vsel %vm453_vm0, %v439_v48, 0  ;;  %v409_v58 = vmin.f32 %v345_v49, 6.0  ;;  %v234_v59 = vadd.f32 %v953_v7, %v163_v50  ;;  %v194_v60 = vmul.f32 %v765_v51, %v939_v1 }
  0x2c   :  { %869 = vmatpush3.bf16.xpose.msra.mxu1 %v512_v57  ;;  %v432_v62 = vpack.c.bf16 %v378_v52, %v377_v45  ;;  %v410_v63 = vmin.f32 %v346_v53, 6.0  ;;  %v297_v0 = vmax.f32 %v233_v54, 0.0  ;;  %v195_v2 = vmul.f32 %v766_v55, %v939_v1 }
  0x2d   :  { %v298_v3 = vmax.f32 %v234_v59, 0.0  ;;  %v265_v4 = vadd.f32 %v953_v7, %v194_v60  ;;  %v737_v5 = vunpack.c.l.bf16 %v826_v56  ;;  %v738_v6 = vunpack.c.h.bf16 %v826_v56  ;;  %v819_v60 = vld [vmem:[%s1226_s0 + $0x28] sm:$0xff]  }
  0x2e   :  { %885 = vmatprep.subr.msk.bf16.mxu0 %vm453_vm0, %v432_v62  ;;  %v448_v9 = vpack.c.bf16 %v410_v63, %v409_v58  ;;  %v361_v10 = vmin.f32 %v297_v0, 6.0  ;;  %v266_v11 = vadd.f32 %v953_v7, %v195_v2  ;;  %v801_v12 = vunpack.c.l.bf16 %v842_v61 }
  0x2f   :  { %v362_v13 = vmin.f32 %v298_v3, 6.0  ;;  %v329_v14 = vmax.f32 %v265_v4, 0.0  ;;  %v180_v15 = vmul.f32 %v737_v5, %v939_v1  ;;  %v181_v16 = vmul.f32 %v738_v6, %v939_v1 }
  0x30   :  { %893 = vmatprep.subr.msk.bf16.mxu1 %vm453_vm0, %v448_v9  ;;  %v330_v17 = vmax.f32 %v266_v11, 0.0  ;;  %v802_v18 = vunpack.c.h.bf16 %v842_v61  ;;  %v212_v19 = vmul.f32 %v801_v12, %v939_v1  ;;  %v705_v20 = vunpack.c.l.bf16 %v818_v8 }
  0x31   :  { %v424_v21 = vpack.c.bf16 %v362_v13, %v361_v10  ;;  %v393_v22 = vmin.f32 %v329_v14, 6.0  ;;  %v251_v23 = vadd.f32 %v953_v7, %v180_v15  ;;  %v252_v24 = vadd.f32 %v953_v7, %v181_v16  ;;  %v835_v15 = vld [vmem:[%s1226_s0 + $0xa8] sm:$0xff]  }
  0x32   :  { %v394_v25 = vmin.f32 %v330_v17, 6.0  ;;  %v213_v26 = vmul.f32 %v802_v18, %v939_v1  ;;  %v283_v27 = vadd.f32 %v953_v7, %v212_v19  ;;  %v706_v28 = vunpack.c.h.bf16 %v818_v8 }
  0x33   :  { %v467_v30 = vsel %vm453_vm0, %v424_v21, 0  ;;  %v315_v31 = vmax.f32 %v251_v23, 0.0  ;;  %v316_v32 = vmax.f32 %v252_v24, 0.0  ;;  %v164_v33 = vmul.f32 %v705_v20, %v939_v1 }
  0x34   :  { %853 = vmatpush3.bf16.xpose.msra.mxu0 %v467_v30  ;;  %v440_v34 = vpack.c.bf16 %v394_v25, %v393_v22  ;;  %v284_v35 = vadd.f32 %v953_v7, %v213_v26  ;;  %v347_v36 = vmax.f32 %v283_v27, 0.0  ;;  %v165_v37 = vmul.f32 %v706_v28, %v939_v1  ;;  %v828_v28 = vld [vmem:[%s1226_s0 + $0x70] sm:$0xff]  }
  0x35   :  { %v379_v38 = vmin.f32 %v315_v31, 6.0  ;;  %v380_v39 = vmin.f32 %v316_v32, 6.0  ;;  %v235_v40 = vadd.f32 %v953_v7, %v164_v33  ;;  %v769_v41 = vunpack.c.l.bf16 %v834_v29 }
  0x36   :  { %v515_v43 = vsel %vm453_vm0, %v440_v34, 0  ;;  %v348_v44 = vmax.f32 %v284_v35, 0.0  ;;  %v411_v45 = vmin.f32 %v347_v36, 6.0  ;;  %v236_v46 = vadd.f32 %v953_v7, %v165_v37  ;;  %v844_v37 = vld [vmem:[%s1226_s0 + $0xf0] sm:$0xff]  }
  0x37   :  { %871 = vmatpush3.bf16.xpose.msra.mxu1 %v515_v43  ;;  %v433_v48 = vpack.c.bf16 %v380_v39, %v379_v38  ;;  %v299_v49 = vmax.f32 %v235_v40, 0.0  ;;  %v770_v50 = vunpack.c.h.bf16 %v834_v29  ;;  %v196_v51 = vmul.f32 %v769_v41, %v939_v1 }
  0x38   :  { %v412_v52 = vmin.f32 %v348_v44, 6.0  ;;  %v300_v53 = vmax.f32 %v236_v46, 0.0  ;;  %v741_v54 = vunpack.c.l.bf16 %v827_v42  ;;  %v742_v55 = vunpack.c.h.bf16 %v827_v42  ;;  %v820_v46 = vld [vmem:[%s1226_s0 + $0x30] sm:$0xff]  }
  0x39   :  { %886 = vmatprep.subr.msk.bf16.mxu0 %vm453_vm0, %v433_v48  ;;  %v363_v56 = vmin.f32 %v299_v49, 6.0  ;;  %v197_v57 = vmul.f32 %v770_v50, %v939_v1  ;;  %v267_v58 = vadd.f32 %v953_v7, %v196_v51  ;;  %v805_v59 = vunpack.c.l.bf16 %v843_v47 }
  0x3a   :  { %v449_v61 = vpack.c.bf16 %v412_v52, %v411_v45  ;;  %v364_v62 = vmin.f32 %v300_v53, 6.0  ;;  %v182_v63 = vmul.f32 %v741_v54, %v939_v1  ;;  %v183_v0 = vmul.f32 %v742_v55, %v939_v1 }
  0x3b   :  { %v268_v2 = vadd.f32 %v953_v7, %v197_v57  ;;  %v331_v3 = vmax.f32 %v267_v58, 0.0  ;;  %v806_v4 = vunpack.c.h.bf16 %v843_v47  ;;  %v214_v5 = vmul.f32 %v805_v59, %v939_v1 }
  0x3c   :  { %894 = vmatprep.subr.msk.bf16.mxu1 %vm453_vm0, %v449_v61  ;;  %v425_v6 = vpack.c.bf16 %v364_v62, %v363_v56  ;;  %v253_v8 = vadd.f32 %v953_v7, %v182_v63  ;;  %v254_v9 = vadd.f32 %v953_v7, %v183_v0  ;;  %v709_v10 = vunpack.c.l.bf16 %v819_v60 }
  0x3d   :  { %v332_v11 = vmax.f32 %v268_v2, 0.0  ;;  %v395_v12 = vmin.f32 %v331_v3, 6.0  ;;  %v215_v13 = vmul.f32 %v806_v4, %v939_v1  ;;  %v285_v14 = vadd.f32 %v953_v7, %v214_v5  ;;  %v836_v4 = vld [vmem:[%s1226_s0 + $0xb0] sm:$0xff]  }
  0x3e   :  { %v470_v16 = vsel %vm453_vm0, %v425_v6, 0  ;;  %v317_v17 = vmax.f32 %v253_v8, 0.0  ;;  %v318_v18 = vmax.f32 %v254_v9, 0.0  ;;  %v710_v19 = vunpack.c.h.bf16 %v819_v60 }
  0x3f   :  { %855 = vmatpush3.bf16.xpose.msra.mxu0 %v470_v16  ;;  %v396_v20 = vmin.f32 %v332_v11, 6.0  ;;  %v286_v21 = vadd.f32 %v953_v7, %v215_v13  ;;  %v349_v22 = vmax.f32 %v285_v14, 0.0  ;;  %v166_v23 = vmul.f32 %v709_v10, %v939_v1 }
  0x40   :  { %v381_v24 = vmin.f32 %v317_v17, 6.0  ;;  %v382_v25 = vmin.f32 %v318_v18, 6.0  ;;  %v167_v26 = vmul.f32 %v710_v19, %v939_v1  ;;  %v773_v27 = vunpack.c.l.bf16 %v835_v15  ;;  %v829_v18 = vld [vmem:[%s1226_s0 + $0x78] sm:$0xff]  }
  0x41   :  { %v441_v29 = vpack.c.bf16 %v396_v20, %v395_v12  ;;  %v350_v30 = vmax.f32 %v286_v21, 0.0  ;;  %v413_v31 = vmin.f32 %v349_v22, 6.0  ;;  %v237_v32 = vadd.f32 %v953_v7, %v166_v23  ;;  %v845_v23 = vld [vmem:[%s1226_s0 + $0xf8] sm:$0xff]  }
  0x42   :  { %v434_v33 = vpack.c.bf16 %v382_v25, %v381_v24  ;;  %v238_v34 = vadd.f32 %v953_v7, %v167_v26  ;;  %v774_v35 = vunpack.c.h.bf16 %v835_v15  ;;  %v198_v36 = vmul.f32 %v773_v27, %v939_v1 }
  0x43   :  { %v518_v38 = vsel %vm453_vm0, %v441_v29, 0  ;;  %v414_v39 = vmin.f32 %v350_v30, 6.0  ;;  %v301_v40 = vmax.f32 %v237_v32, 0.0  ;;  %v745_v41 = vunpack.c.l.bf16 %v828_v28 }
  0x44   :  { %873 = vmatpush3.bf16.xpose.msra.mxu1 %v518_v38  ;;  %887 = vmatprep.subr.msk.bf16.mxu0 %vm453_vm0, %v434_v33  ;;  %v302_v42 = vmax.f32 %v238_v34, 0.0  ;;  %v199_v43 = vmul.f32 %v774_v35, %v939_v1  ;;  %v269_v44 = vadd.f32 %v953_v7, %v198_v36  ;;  %v746_v45 = vunpack.c.h.bf16 %v828_v28  ;;  %v821_v36 = vld [vmem:[%s1226_s0 + $0x38] sm:$0xff]  }
  0x45   :  { %v450_v47 = vpack.c.bf16 %v414_v39, %v413_v31  ;;  %v365_v48 = vmin.f32 %v301_v40, 6.0  ;;  %v184_v49 = vmul.f32 %v745_v41, %v939_v1  ;;  %v809_v50 = vunpack.c.l.bf16 %v844_v37 }
  0x46   :  { %v366_v51 = vmin.f32 %v302_v42, 6.0  ;;  %v270_v52 = vadd.f32 %v953_v7, %v199_v43  ;;  %v333_v53 = vmax.f32 %v269_v44, 0.0  ;;  %v185_v54 = vmul.f32 %v746_v45, %v939_v1 }
  0x47   :  { %895 = vmatprep.subr.msk.bf16.mxu1 %vm453_vm0, %v450_v47  ;;  %v255_v55 = vadd.f32 %v953_v7, %v184_v49  ;;  %v810_v56 = vunpack.c.h.bf16 %v844_v37  ;;  %v216_v57 = vmul.f32 %v809_v50, %v939_v1  ;;  %v713_v58 = vunpack.c.l.bf16 %v820_v46 }
  0x48   :  { %v426_v59 = vpack.c.bf16 %v366_v51, %v365_v48  ;;  %v334_v60 = vmax.f32 %v270_v52, 0.0  ;;  %v397_v61 = vmin.f32 %v333_v53, 6.0  ;;  %v256_v62 = vadd.f32 %v953_v7, %v185_v54  ;;  %v837_v53 = vld [vmem:[%s1226_s0 + $0xb8] sm:$0xff]  }
  0x49   :  { %v319_v63 = vmax.f32 %v255_v55, 0.0  ;;  %v217_v0 = vmul.f32 %v810_v56, %v939_v1  ;;  %v287_v2 = vadd.f32 %v953_v7, %v216_v57  ;;  %v714_v3 = vunpack.c.h.bf16 %v820_v46 }
  0x4a   :  { %v473_v5 = vsel %vm453_vm0, %v426_v59, 0  ;;  %v398_v6 = vmin.f32 %v334_v60, 6.0  ;;  %v320_v8 = vmax.f32 %v256_v62, 0.0  ;;  %v168_v9 = vmul.f32 %v713_v58, %v939_v1 }
  0x4b   :  { %857 = vmatpush3.bf16.xpose.msra.mxu0 %v473_v5  ;;  %v383_v10 = vmin.f32 %v319_v63, 6.0  ;;  %v288_v11 = vadd.f32 %v953_v7, %v217_v0  ;;  %v351_v12 = vmax.f32 %v287_v2, 0.0  ;;  %v169_v13 = vmul.f32 %v714_v3, %v939_v1  ;;  %v419_v3 = vld [vmem:[%s1229_s3] sm:$0xf] }
  0x4c   :  { %v442_v14 = vpack.c.bf16 %v398_v6, %v397_v61  ;;  %v384_v15 = vmin.f32 %v320_v8, 6.0  ;;  %v239_v16 = vadd.f32 %v953_v7, %v168_v9  ;;  %v777_v17 = vunpack.c.l.bf16 %v836_v4 }
  0x4d   :  { %v352_v19 = vmax.f32 %v288_v11, 0.0  ;;  %v415_v20 = vmin.f32 %v351_v12, 6.0  ;;  %v240_v21 = vadd.f32 %v953_v7, %v169_v13  ;;  %v778_v22 = vunpack.c.h.bf16 %v836_v4 }
  0x4e   :  { %v521_v24 = vsel %vm453_vm0, %v442_v14, 0  ;;  %v435_v25 = vpack.c.bf16 %v384_v15, %v383_v10  ;;  %v303_v26 = vmax.f32 %v239_v16, 0.0  ;;  %v200_v27 = vmul.f32 %v777_v17, %v939_v1 }
  0x4f   :  { %875 = vmatpush3.bf16.xpose.msra.mxu1 %v521_v24  ;;  %v416_v28 = vmin.f32 %v352_v19, 6.0  ;;  %v304_v29 = vmax.f32 %v240_v21, 0.0  ;;  %v201_v30 = vmul.f32 %v778_v22, %v939_v1  ;;  %v749_v31 = vunpack.c.l.bf16 %v829_v18 }
  0x50   :  { %888 = vmatprep.subr.msk.bf16.mxu0 %vm453_vm0, %v435_v25  ;;  %v367_v32 = vmin.f32 %v303_v26, 6.0  ;;  %v271_v33 = vadd.f32 %v953_v7, %v200_v27  ;;  %v750_v34 = vunpack.c.h.bf16 %v829_v18  ;;  %v813_v35 = vunpack.c.l.bf16 %v845_v23 }
  0x51   :  { %v451_v37 = vpack.c.bf16 %v416_v28, %v415_v20  ;;  %v368_v38 = vmin.f32 %v304_v29, 6.0  ;;  %v272_v39 = vadd.f32 %v953_v7, %v201_v30  ;;  %v186_v40 = vmul.f32 %v749_v31, %v939_v1 }
  0x52   :  { %v335_v41 = vmax.f32 %v271_v33, 0.0  ;;  %v187_v42 = vmul.f32 %v750_v34, %v939_v1  ;;  %v814_v43 = vunpack.c.h.bf16 %v845_v23  ;;  %v218_v44 = vmul.f32 %v813_v35, %v939_v1 }
  0x53   :  { %896 = vmatprep.subr.msk.bf16.mxu1 %vm453_vm0, %v451_v37  ;;  %v427_v45 = vpack.c.bf16 %v368_v38, %v367_v32  ;;  %v336_v46 = vmax.f32 %v272_v39, 0.0  ;;  %v257_v47 = vadd.f32 %v953_v7, %v186_v40  ;;  %v717_v48 = vunpack.c.l.bf16 %v821_v36 }
  0x54   :  { %v399_v49 = vmin.f32 %v335_v41, 6.0  ;;  %v258_v50 = vadd.f32 %v953_v7, %v187_v42  ;;  %v219_v51 = vmul.f32 %v814_v43, %v939_v1  ;;  %v289_v52 = vadd.f32 %v953_v7, %v218_v44 }
  0x55   :  { %v476_v54 = vsel %vm453_vm0, %v427_v45, 0  ;;  %v400_v55 = vmin.f32 %v336_v46, 6.0  ;;  %v321_v56 = vmax.f32 %v257_v47, 0.0  ;;  %v718_v57 = vunpack.c.h.bf16 %v821_v36 }
  0x56   :  { %859 = vmatpush3.bf16.xpose.msra.mxu0 %v476_v54  ;;  %v322_v58 = vmax.f32 %v258_v50, 0.0  ;;  %v290_v59 = vadd.f32 %v953_v7, %v219_v51  ;;  %v353_v60 = vmax.f32 %v289_v52, 0.0  ;;  %v170_v61 = vmul.f32 %v717_v48, %v939_v1 }
  0x57   :  { %v443_v62 = vpack.c.bf16 %v400_v55, %v399_v49  ;;  %v385_v63 = vmin.f32 %v321_v56, 6.0  ;;  %v171_v0 = vmul.f32 %v718_v57, %v939_v1  ;;  %v781_v2 = vunpack.c.l.bf16 %v837_v53 }
  0x58   :  { %v386_v4 = vmin.f32 %v322_v58, 6.0  ;;  %v354_v5 = vmax.f32 %v290_v59, 0.0  ;;  %v417_v6 = vmin.f32 %v353_v60, 6.0  ;;  %v241_v8 = vadd.f32 %v953_v7, %v170_v61 }
  0x59   :  { %v524_v9 = vsel %vm453_vm0, %v443_v62, 0  ;;  %v242_v10 = vadd.f32 %v953_v7, %v171_v0  ;;  %v782_v11 = vunpack.c.h.bf16 %v837_v53  ;;  %v202_v12 = vmul.f32 %v781_v2, %v939_v1 }
  0x5a   :  { %877 = vmatpush3.bf16.xpose.msra.mxu1 %v524_v9  ;;  %v436_v13 = vpack.c.bf16 %v386_v4, %v385_v63  ;;  %v418_v14 = vmin.f32 %v354_v5, 6.0  ;;  %v305_v15 = vmax.f32 %v241_v8, 0.0  ;;  %v420_v16 = vpack.c.bf16 %v419_v3, %v419_v3 }
  0x5b   :  { %v306_v17 = vmax.f32 %v242_v10, 0.0  ;;  %v203_v18 = vmul.f32 %v782_v11, %v939_v1  ;;  %v273_v19 = vadd.f32 %v953_v7, %v202_v12 }
  0x5c   :  { %889 = vmatprep.subr.msk.bf16.mxu0 %vm453_vm0, %v436_v13  ;;  %v452_v20 = vpack.c.bf16 %v418_v14, %v417_v6  ;;  %v369_v21 = vmin.f32 %v305_v15, 6.0  ;;  %862 = vmatprep.mubr.msk.bf16.mxu0 %vm453_vm0, %v420_v16 }
  0x5d   :  { %v370_v22 = vmin.f32 %v306_v17, 6.0  ;;  %v274_v23 = vadd.f32 %v953_v7, %v203_v18  ;;  %v337_v24 = vmax.f32 %v273_v19, 0.0  ;;  %880 = vmatprep.mubr.msk.bf16.mxu1 %vm453_vm0, %v420_v16 }
  0x5e   :  { %897 = vmatprep.subr.msk.bf16.mxu1 %vm453_vm0, %v452_v20 }
  0x5f   :  { %v428_v25 = vpack.c.bf16 %v370_v22, %v369_v21  ;;  %v338_v26 = vmax.f32 %v274_v23, 0.0  ;;  %v401_v27 = vmin.f32 %v337_v24, 6.0 }
  0x61   :  { %v479_v1 = vsel %vm453_vm0, %v428_v25, 0  ;;  %v402_v28 = vmin.f32 %v338_v26, 6.0 }
  0x62   :  { %861 = vmatpush3.bf16.xpose.msra.mxu0 %v479_v1 }
  0x63   :  { %v444_v29 = vpack.c.bf16 %v402_v28, %v401_v27 }
  0x65   :  { %v527_v30 = vsel %vm453_vm0, %v444_v29, 0 }
  0x66   :  { %879 = vmatpush3.bf16.xpose.msra.mxu1 %v527_v30 }
  0x69   :  { %863 = vmatmul.mubr.msk.bf16.vlgmr.msra.gmra.mrb[0].mxu0 %vm453_vm0, %v420_v16 }
  0x6d   :  { %881 = vmatmul.mubr.msk.bf16.vlgmr.msra.gmra.mrb[0].mxu1 %vm453_vm0, %v420_v16 }
 0x13c   :  { %v587_v7 = vpop.f32.mrb[0].mxu0 }
 0x13d   :  { %v646_v31 = vsel %vm645_vm1, %v587_v7, 0.0  ;;  %v657_v32 = vmul.f32 %v587_v7, %v587_v7  ;;  %v589_v33 = vpop.f32.mrb[1].mxu0 }
 0x13e   :  { %v639_v34 = vcombine.low %v587_v7, %v589_v33  ;;  %v647_v35 = vsel %vm645_vm1, %v589_v33, 0.0  ;;  %v658_v36 = vmul.f32 %v589_v33, %v589_v33  ;;  %v591_v37 = vpop.f32.mrb[2].mxu0 }
 0x13f   :  { %v661_v38 = vsel %vm645_vm1, %v657_v32, 0.0  ;;  %v592_v39 = vpop.f32.mrb[3].mxu0  ;;  %v648_v40 = vadd.f32 %v647_v35, %v646_v31 }
 0x140   :  { %v628_v41 = vpop.f32.mrb[0].mxu1  ;;  %643 = vst [vmem:[%s1230_s4] sm:$0xff] %v639_v34  ;;  %v662_v42 = vsel %vm645_vm1, %v658_v36, 0.0 }
 0x141   :  { %v659_v43 = vmul.f32 %v628_v41, %v628_v41  ;;  %v630_v44 = vpop.f32.mrb[1].mxu1  ;;  %v649_v45 = vsel %vm645_vm1, %v628_v41, 0.0  ;;  %v663_v46 = vadd.f32 %v662_v42, %v661_v38 }
 0x142   :  { %v640_v47 = vcombine.low %v628_v41, %v630_v44  ;;  %v660_v48 = vmul.f32 %v630_v44, %v630_v44  ;;  %v632_v49 = vpop.f32.mrb[2].mxu1  ;;  %v650_v50 = vadd.f32 %v649_v45, %v648_v40  ;;  %v651_v52 = vsel %vm645_vm1, %v630_v44, 0.0 }
 0x143   :  { %v633_v51 = vpop.f32.mrb[3].mxu1  ;;  %v664_v53 = vsel %vm645_vm1, %v659_v43, 0.0 }
 0x144   :  { %644 = vst [vmem:[%s1230_s4 + $0x8] sm:$0xff] %v640_v47  ;;  %v652_v54 = vadd.f32 %v651_v52, %v650_v50  ;;  %v665_v55 = vadd.f32 %v664_v53, %v663_v46  ;;  %v666_v56 = vsel %vm645_vm1, %v660_v48, 0.0 }
 0x146   :  { %653 = vadd.xlane.f32.xlu0 %v652_v54  ;;  %v667_v57 = vadd.f32 %v666_v56, %v665_v55 }
 0x14a   :  { %668 = vadd.xlane.f32.xlu0 %v667_v57 }
 0x1d3   :  { %v654_v58 = vpop.xlane.xlu0 %653 }
 0x1d4   :  { %656 = vst.msk [vmem:[%s1231_s5] sm:$0xf] %vm655_vm2, %v654_v58 }
 0x1d7   :  { %v669_v59 = vpop.xlane.xlu0 %668 }
 0x1d8   :  { %670 = vst.msk [vmem:[%s1232_s6] sm:$0xf] %vm655_vm2, %v669_v59 }

// kernel: inverted_bottleneck.5
= control target key start
LH: loop header
LB: loop body
LE: loop exit
PB: predicated region body
PF: predicated region fallthrough
CT: control target
= control target key end

     0   :  { %s2184_s24 = smov 0   ;;  %s3366_s0 = inlined_call_operand.vmem [shape: f32[2,4,256], index: 0, kind: input, shape index: {}]   ;;  %s3367_s1 = inlined_call_operand.vmem [shape: f32[4,16], index: 1, kind: input, shape index: {}]   ;;  %s3368_s2 = inlined_call_operand.vmem [shape: f32[1,16], index: 2, kind: input, shape index: {}]   ;;  %s3369_s3 = inlined_call_operand.vmem [shape: f32[1,16], index: 3, kind: input, shape index: {}]   ;;  %s3370_s4 = inlined_call_operand.vmem [shape: f32[9,16], index: 4, kind: input, shape index: {}]   ;;  %s3371_s5 = inlined_call_operand.vmem [shape: bf16[2,16,16,16], index: 5, kind: output, shape index: {0}]   ;;  %s3372_s6 = inlined_call_operand.vmem [shape: f32[2,1,16], index: 6, kind: output, shape index: {1}]   ;;  %s3373_s7 = inlined_call_operand.vmem [shape: f32[2,1,16], index: 7, kind: output, shape index: {2}]  }
   0x1 LB: > { %s1972_s25 = sadd.s32 4294967295, %s2142_s24   ;;  %p1976_p0 = scmp.ge.s32.totalorder %s2142_s24, 1  ;;  %s2142_s24 = sphi %s2184_s24, %s18_s24  }
   0x2   : > { %p242_p1 = scmp.lt.s32.totalorder %s2142_s24, 3 }
   0x4   : > { %p243_p2 = pnand %p1976_p0, %p242_p1 }
   0x6   : > { %246 = sbr.rel (%p243_p2) target bundleno = 651 (0x28b), region = 40 }
   0xd   : > { %p280_p3 = scmp.lt.s32.totalorder %s1972_s25, 1  ;;  %v381_v1 = vld [vmem:[%s3367_s1] sm:$0xf]  ;;  %vm432_vm0 = vcmask 1041408   ;;  %vm383_vm1 = vcmask 31744   ;;  %v739_v53 = vlaneseq  ;;  %vm1693_vm6 = vcmask 130048  }
   0xe   : > { %v382_v2 = vpack.c.bf16 %v381_v1, %v381_v1  ;;  %v742_v57 = vld [vmem:[%s3370_s4] sm:$0xff]  ;;  %vm1660_vm7 = vcmask 125952   ;;  %vm1763_vm8 = vcmask 122880  }
   0xf   : > { %s3407_s25 = smov (!%p280_p3, %s1972_s25), 1  ;;  %v2217_v54 = vshrl.u32 %v739_v53, 7  ;;  %v2229_v59 = vld [vmem:[%s3368_s2] ss:$0 sm:$0xff] }
  0x10   : > { %s2034_s26 = sshll.u32 %s3407_s25, 3  ;;  %2121 = vmatprep.subr.msk.bf16.mxu0 %vm432_vm0, %v382_v2  ;;  %v434_v3 = vsel %vm432_vm0, %v382_v2, 0  ;;  %2122 = vmatprep.subr.msk.bf16.mxu1 %vm432_vm0, %v382_v2  ;;  %v2237_v63 = vld [vmem:[%s3369_s3] ss:$0 sm:$0xff]  ;;  %s2035_s17 = sshll.u32 %s3407_s25, 7 }
  0x11   : > { %s284_s29 = scalar_lea.vmem %s3366_s0, %s2034_s26  ;;  %2086 = vmatpush3.bf16.msra.mxu0 %v434_v3  ;;  %2120 = vmatpush3.bf16.msra.mxu1 %v434_v3  ;;  %v845_v55 = vsub.s32 0, %v2217_v54  ;;  %v881_v56 = vsub.s32 1, %v2217_v54  ;;  %v1047_v60 = vsub.s32 2, %v2217_v54  ;;  %vm774_vm2 = vcmp.lt.s32.totalorder %v2217_v54, 1  ;;  %s2374_s20 = scalar_lea.vmem %s3371_s5, %s2035_s17 }
  0x12   : > { %v297_v0 = vld [vmem:[%s284_s29] sm:$0xff]  ;;  %vm805_vm3 = vcmp.ge.s32.totalorder %v2217_v54, 1  ;;  %vm976_vm4 = vcmp.lt.s32.totalorder %v2217_v54, 7  ;;  %s292_s8 = scalar_lea.vmem %s3372_s6, %s3407_s25  ;;  %s295_s11 = scalar_lea.vmem %s3373_s7, %s3407_s25 }
  0x13   : > { %301 = vxpose.xlu0.b32.start.end [1/1] (short) %v297_v0, 128  ;;  %v299_v4 = vcombine.high %v297_v0, %v297_v0  ;;  %v2224_v58 = vrot.slane %v742_v57, %v845_v55  ;;  %v2232_v61 = vrot.slane %v742_v57, %v881_v56 }
  0x15   : > { %v847_v2 = vmul.f32 0.0, %v2224_v58  ;;  %v883_v3 = vmul.f32 0.0, %v2232_v61 }
  0x50   : > { %333 = vxpose.xlu0.b32.start.end [1/1] (short) %v299_v4, 128 }
  0x93   : > { %v317_v5 = vpop.trf.xlu0 }
  0x97   : > { %v318_v6 = vpop.trf.xlu0 }
  0x98   : > { %v365_v7 = vpack.c.bf16 %v318_v6, %v317_v5  ;;  %v2243_v6 = vrot.slane %v742_v57, %v1047_v60 }
  0x9a   : > { %2087 = vmatprep.mubr.msk.bf16.mxu0 %vm383_vm1, %v365_v7 }
  0x9b   : > { %v319_v8 = vpop.trf.xlu0 }
  0x9f   : > { %v320_v9 = vpop.trf.xlu0 }
  0xa0   : > { %v366_v10 = vpack.c.bf16 %v320_v9, %v319_v8  ;;  %v1189_v8 = vsub.s32 4, %v2217_v54  ;;  %v1399_v9 = vsub.s32 7, %v2217_v54 }
  0xa2   : > { %2088 = vmatmul.mubr.msk.bf16.vlgmr.msra.gmra.mrb[0].mxu0 %vm383_vm1, %v366_v10 }
  0xa3   : > { %v321_v11 = vpop.trf.xlu0 }
  0xa7   : > { %v322_v12 = vpop.trf.xlu0 }
  0xa8   : > { %v367_v13 = vpack.c.bf16 %v322_v12, %v321_v11 }
  0xaa   : > { %2091 = vmatprep.mubr.msk.bf16.mxu0 %vm383_vm1, %v367_v13  ;;  %v2251_v13 = vadd.s32 8, %v2217_v54 }
  0xab   : > { %v323_v14 = vpop.trf.xlu0 }
  0xac   : > { %vm1008_vm5 = vcmp.lt.s32.totalorder %v2251_v13, 15 }
  0xaf   : > { %v324_v15 = vpop.trf.xlu0 }
  0xb0   : > { %v368_v16 = vpack.c.bf16 %v324_v15, %v323_v14  ;;  %v1263_v14 = vsub.s32 5, %v2217_v54 }
  0xb2   : > { %2092 = vmatmul.mubr.msk.bf16.gmra.mrb[4].mxu0 %vm383_vm1, %v368_v16 }
  0xb3   : > { %v325_v17 = vpop.trf.xlu0 }
  0xb7   : > { %v326_v18 = vpop.trf.xlu0 }
  0xb8   : > { %v369_v19 = vpack.c.bf16 %v326_v18, %v325_v17  ;;  %v914_v18 = vadd.f32 %v883_v3, %v847_v2 }
  0xba   : > { %2095 = vmatprep.mubr.msk.bf16.mxu0 %vm383_vm1, %v369_v19  ;;  %v1121_v19 = vsub.s32 3, %v2217_v54 }
  0xbb   : > { %v327_v20 = vpop.trf.xlu0 }
  0xbf   : > { %v328_v21 = vpop.trf.xlu0 }
  0xc0   : > { %v370_v22 = vpack.c.bf16 %v328_v21, %v327_v20 }
  0xc2   : > { %2096 = vmatmul.mubr.msk.bf16.gmra.mrb[8].mxu0 %vm383_vm1, %v370_v22  ;;  %v1049_v22 = vmul.f32 0.0, %v2243_v6 }
  0xc3   : > { %v329_v23 = vpop.trf.xlu0 }
  0xc7   : > { %v330_v24 = vpop.trf.xlu0 }
  0xc8   : > { %v371_v25 = vpack.c.bf16 %v330_v24, %v329_v23  ;;  %v1331_v23 = vsub.s32 6, %v2217_v54 }
  0xca   : > { %2099 = vmatprep.mubr.msk.bf16.mxu0 %vm383_vm1, %v371_v25  ;;  %v2260_v25 = vrot.slane %v742_v57, %v1189_v8 }
  0xcb   : > { %v331_v26 = vpop.trf.xlu0 }
  0xcf   : > { %v332_v27 = vpop.trf.xlu0 }
  0xd0   : > { %v372_v28 = vpack.c.bf16 %v332_v27, %v331_v26  ;;  %v2262_v27 = vrot.slane %v742_v57, %v1399_v9 }
  0xd2   : > { %2100 = vmatmul.mubr.msk.bf16.gmra.mrb[12].mxu0 %vm383_vm1, %v372_v28 }
  0xd3   : > { %v349_v29 = vpop.trf.xlu0 }
  0xd7   : > { %v350_v30 = vpop.trf.xlu0 }
  0xd8   : > { %v373_v31 = vpack.c.bf16 %v350_v30, %v349_v29  ;;  %v2268_v30 = vrot.slane %v742_v57, %v1263_v14 }
  0xda   : > { %2103 = vmatprep.mubr.msk.bf16.mxu1 %vm383_vm1, %v373_v31 }
  0xdb   : > { %v351_v32 = vpop.trf.xlu0 }
  0xdf   : > { %v352_v33 = vpop.trf.xlu0 }
  0xe0   : > { %v374_v34 = vpack.c.bf16 %v352_v33, %v351_v32  ;;  %v1081_v32 = vadd.f32 %v1049_v22, %v914_v18  ;;  %v2270_v33 = vrot.slane %v742_v57, %v1121_v19 }
  0xe2   : > { %2104 = vmatmul.mubr.msk.bf16.vlgmr.msra.gmra.mrb[0].mxu1 %vm383_vm1, %v374_v34  ;;  %3376 = vst [vmem:[#allocation2_spill] sm:$0xff] %v2270_v33  ;;  %v2272_v34 = vrot.slane %v742_v57, %v1331_v23 }
  0xe3   : > { %v353_v35 = vpop.trf.xlu0 }
  0xe7   : > { %v354_v36 = vpop.trf.xlu0 }
  0xe8   : > { %v375_v37 = vpack.c.bf16 %v354_v36, %v353_v35 }
  0xea   : > { %2107 = vmatprep.mubr.msk.bf16.mxu1 %vm383_vm1, %v375_v37 }
  0xeb   : > { %v355_v38 = vpop.trf.xlu0 }
  0xef   : > { %v356_v39 = vpop.trf.xlu0 }
  0xf0   : > { %v376_v40 = vpack.c.bf16 %v356_v39, %v355_v38 }
  0xf2   : > { %2108 = vmatmul.mubr.msk.bf16.gmra.mrb[4].mxu1 %vm383_vm1, %v376_v40 }
  0xf3   : > { %v357_v41 = vpop.trf.xlu0 }
  0xf7   : > { %v358_v42 = vpop.trf.xlu0 }
  0xf8   : > { %v377_v43 = vpack.c.bf16 %v358_v42, %v357_v41 }
  0xfa   : > { %2111 = vmatprep.mubr.msk.bf16.mxu1 %vm383_vm1, %v377_v43 }
  0xfb   : > { %v359_v44 = vpop.trf.xlu0 }
  0xff   : > { %v360_v45 = vpop.trf.xlu0 }
 0x100   : > { %v378_v46 = vpack.c.bf16 %v360_v45, %v359_v44 }
 0x102   : > { %2112 = vmatmul.mubr.msk.bf16.gmra.mrb[8].mxu1 %vm383_vm1, %v378_v46 }
 0x103   : > { %v361_v47 = vpop.trf.xlu0 }
 0x107   : > { %v362_v48 = vpop.trf.xlu0 }
 0x108   : > { %v379_v49 = vpack.c.bf16 %v362_v48, %v361_v47 }
 0x10a   : > { %2115 = vmatprep.mubr.msk.bf16.mxu1 %vm383_vm1, %v379_v49 }
 0x10b   : > { %v363_v50 = vpop.trf.xlu0 }
 0x10f   : > { %v364_v51 = vpop.trf.xlu0 }
 0x110   : > { %v380_v52 = vpack.c.bf16 %v364_v51, %v363_v50 }
 0x112   : > { %2116 = vmatmul.mubr.msk.bf16.gmra.mrb[12].mxu1 %vm383_vm1, %v380_v52 }
 0x175   : > { %v2089_v62 = vpop.f32.mrb[0].mxu0 }
 0x176   : > { %v606_v0 = vmul.f32 %v2089_v62, %v2229_v59  ;;  %v470_v1 = vpop.f32.mrb[1].mxu0 }
 0x177   : > { %v604_v4 = vmul.f32 %v2229_v59, %v470_v1  ;;  %v2090_v5 = vpop.f32.mrb[2].mxu0 }
 0x178   : > { %v645_v7 = vadd.f32 %v2237_v63, %v606_v0  ;;  %v607_v10 = vmul.f32 %v2090_v5, %v2229_v59  ;;  %v473_v11 = vpop.f32.mrb[3].mxu0 }
 0x179   : > { %v643_v12 = vadd.f32 %v2237_v63, %v604_v4  ;;  %v605_v15 = vmul.f32 %v2229_v59, %v473_v11 }
 0x17a   : > { %v677_v16 = vmax.f32 %v645_v7, 0.0  ;;  %v646_v17 = vadd.f32 %v2237_v63, %v607_v10 }
 0x17b   : > { %v675_v20 = vmax.f32 %v643_v12, 0.0  ;;  %v644_v21 = vadd.f32 %v2237_v63, %v605_v15 }
 0x17c   : > { %v709_v24 = vmin.f32 %v677_v16, 6.0  ;;  %v678_v26 = vmax.f32 %v646_v17, 0.0 }
 0x17d   : > { %v707_v28 = vmin.f32 %v675_v20, 6.0  ;;  %v676_v29 = vmax.f32 %v644_v21, 0.0 }
 0x17e   : > { %v745_v31 = vrot.slane %v709_v24, 7  ;;  %v886_v35 = vmul.f32 %v2232_v61, %v709_v24  ;;  %v947_v36 = vrot.slane %v709_v24, 1  ;;  %v710_v37 = vmin.f32 %v678_v26, 6.0 }
 0x17f   : > { %v708_v38 = vmin.f32 %v676_v29, 6.0  ;;  %v2276_v39 = vmul.f32 %v2260_v25, %v709_v24  ;;  %v2279_v40 = vmul.f32 %v2262_v27, %v709_v24  ;;  %v744_v41 = vrot.slane %v707_v28, 7 }
 0x180   : > { %v884_v42 = vmul.f32 %v2232_v61, %v707_v28  ;;  %v946_v43 = vrot.slane %v707_v28, 1  ;;  %v1191_v44 = vmul.f32 %v2260_v25, %v707_v28  ;;  %v760_v45 = vrot.slane %v710_v37, 7 }
 0x181   : > { %v962_v46 = vrot.slane %v710_v37, 1  ;;  %v887_v47 = vmul.f32 %v2232_v61, %v710_v37  ;;  %v1194_v48 = vmul.f32 %v2260_v25, %v710_v37  ;;  %v759_v49 = vrot.slane %v708_v38, 7 }
 0x182   : > { %v961_v50 = vrot.slane %v708_v38, 1  ;;  %v776_v51 = vsel %vm774_vm2, %v745_v31, %v760_v45  ;;  %v791_v52 = vsel %vm774_vm2, %v760_v45, %v745_v31  ;;  %v2303_v62 = vmul.f32 %v2262_v27, %v710_v37 }
 0x183   : > { %v2291_v53 = vsel %vm976_vm4, %v947_v36, %v962_v46  ;;  %v993_v55 = vsel %vm976_vm4, %v962_v46, %v947_v36  ;;  %v815_v56 = vsel %vm805_vm3, %v791_v52, 0.0  ;;  %v852_v57 = vmul.f32 %v2224_v58, %v776_v51 }
 0x184   : > { %v2300_v60 = vsel %vm1008_vm5, %v993_v55, 0.0  ;;  %v851_v1 = vmul.f32 %v2224_v58, %v815_v56  ;;  %v1053_v2 = vmul.f32 %v2243_v6, %v2291_v53  ;;  %v885_v4 = vmul.f32 %v2232_v61, %v708_v38 }
 0x185   : > { %v2093_v0 = vpop.f32.mrb[4].mxu0  ;;  %v1054_v3 = vmul.f32 %v2243_v6, %v2300_v60  ;;  %v919_v7 = vadd.f32 %v887_v47, %v852_v57  ;;  %v775_v8 = vsel %vm774_vm2, %v744_v41, %v759_v49  ;;  %v790_v9 = vsel %vm774_vm2, %v759_v49, %v744_v41 }
 0x186   : > { %v486_v5 = vpop.f32.mrb[5].mxu0  ;;  %v977_v10 = vsel %vm976_vm4, %v946_v43, %v961_v50  ;;  %v918_v12 = vadd.f32 %v886_v35, %v851_v1  ;;  %v813_v14 = vsel %vm805_vm3, %v790_v9, 0.0  ;;  %v850_v15 = vmul.f32 %v2224_v58, %v775_v8 }
 0x187   : > { %v2094_v11 = vpop.f32.mrb[6].mxu0  ;;  %v992_v16 = vsel %vm976_vm4, %v961_v50, %v946_v43  ;;  %v2322_v18 = vadd.f32 %v1054_v3, %v919_v7  ;;  %v1267_v19 = vmul.f32 %v2268_v30, %v2291_v53  ;;  %v849_v20 = vmul.f32 %v2224_v58, %v813_v14 }
 0x188   : > { %v489_v17 = vpop.f32.mrb[7].mxu0  ;;  %v1016_v21 = vsel %vm1008_vm5, %v992_v16, 0.0  ;;  %v2329_v22 = vadd.f32 %v1053_v2, %v918_v12  ;;  %v917_v23 = vadd.f32 %v885_v4, %v850_v15  ;;  %v1123_v26 = vmul.f32 %v2270_v33, %v813_v14 }
 0x189   : > { %v1052_v24 = vmul.f32 %v2243_v6, %v1016_v21  ;;  %v916_v28 = vadd.f32 %v884_v42, %v849_v20  ;;  %v1051_v29 = vmul.f32 %v2243_v6, %v977_v10  ;;  %v1124_v31 = vmul.f32 %v2270_v33, %v775_v8 }
 0x18a   : > { %v1125_v35 = vmul.f32 %v2270_v33, %v815_v56  ;;  %v1126_v37 = vmul.f32 %v2270_v33, %v776_v51  ;;  %v1155_v41 = vadd.f32 %v1123_v26, %v1081_v32  ;;  %v1192_v43 = vmul.f32 %v2260_v25, %v708_v38 }
 0x18b   : > { %v1084_v36 = vadd.f32 %v1052_v24, %v917_v23  ;;  %v1083_v45 = vadd.f32 %v1051_v29, %v916_v28  ;;  %v1156_v46 = vadd.f32 %v1124_v31, %v1081_v32  ;;  %v1265_v47 = vmul.f32 %v2268_v30, %v977_v10 }
 0x18c   : > { %v1266_v49 = vmul.f32 %v2268_v30, %v1016_v21  ;;  %v1223_v42 = vadd.f32 %v1191_v44, %v1155_v41  ;;  %v1268_v52 = vmul.f32 %v2268_v30, %v2300_v60  ;;  %v1333_v55 = vmul.f32 %v2272_v34, %v815_v56  ;;  %v2350_v44 = vld [vmem:[%s3370_s4 + $0x8] ss:$0 sm:$0xff] }
 0x18d   : > { %v1158_v50 = vadd.f32 %v1126_v37, %v1084_v36  ;;  %v1157_v57 = vadd.f32 %v1125_v35, %v1083_v45  ;;  %v1224_v1 = vadd.f32 %v1192_v43, %v1156_v46  ;;  %v1334_v2 = vmul.f32 %v2272_v34, %v776_v51 }
 0x18e   : > { %v610_v3 = vmul.f32 %v2093_v0, %v2229_v59  ;;  %v1297_v4 = vadd.f32 %v1265_v47, %v1223_v42  ;;  %v608_v32 = vmul.f32 %v2229_v59, %v486_v5  ;;  %v611_v7 = vmul.f32 %v2094_v11, %v2229_v59 }
 0x18f   : > { %v1226_v38 = vadd.f32 %v1194_v48, %v1158_v50  ;;  %v1225_v56 = vadd.f32 %v2276_v39, %v1157_v57  ;;  %v1298_v8 = vadd.f32 %v1266_v49, %v1224_v1  ;;  %v609_v51 = vmul.f32 %v2229_v59, %v489_v17 }
 0x190   : > { %v649_v9 = vadd.f32 %v2237_v63, %v610_v3  ;;  %v1365_v48 = vadd.f32 %v1333_v55, %v1297_v4  ;;  %v647_v10 = vadd.f32 %v2237_v63, %v608_v32  ;;  %v650_v5 = vadd.f32 %v2237_v63, %v611_v7 }
 0x191   : > { %v2355_v0 = vadd.f32 %v1268_v52, %v1226_v38  ;;  %v2359_v11 = vadd.f32 %v1267_v19, %v1225_v56  ;;  %v1366_v12 = vadd.f32 %v1334_v2, %v1298_v8  ;;  %v648_v15 = vadd.f32 %v2237_v63, %v609_v51 }
 0x192   : > { %v681_v14 = vmax.f32 %v649_v9, 0.0  ;;  %v1468_v39 = vmul.f32 %v2350_v44, %v2291_v53  ;;  %v1432_v16 = vadd.f32 %v2279_v40, %v1365_v48  ;;  %v679_v17 = vmax.f32 %v647_v10, 0.0 }
 0x193   : > { %v682_v20 = vmax.f32 %v650_v5, 0.0  ;;  %v1433_v21 = vadd.f32 %v2303_v62, %v1366_v12  ;;  %v1469_v23 = vmul.f32 %v2350_v44, %v2300_v60  ;;  %v680_v62 = vmax.f32 %v648_v15, 0.0 }
 0x194   : > { %v1500_v24 = vadd.f32 %v1468_v39, %v1432_v16  ;;  %v713_v26 = vmin.f32 %v681_v14, 6.0  ;;  %v2376_v53 = vmin.f32 %v679_v17, 6.0 }
 0x195   : > { %v2097_v19 = vpop.f32.mrb[8].mxu0  ;;  %v1501_v40 = vadd.f32 %v1469_v23, %v1433_v21  ;;  %v714_v36 = vmin.f32 %v682_v20, 6.0  ;;  %v712_v15 = vmin.f32 %v680_v62, 6.0 }
 0x196   : > { %v2369_v28 = vpop.f32.mrb[9].mxu0  ;;  %v2036_v60 = vpack.c.bf16 %v1500_v24, %v1500_v24  ;;  %v1694_v31 = vsel %vm1693_vm6, %v1500_v24, 0.0  ;;  %v1765_v35 = vmul.f32 %v1500_v24, %v1500_v24  ;;  %v614_v46 = vmul.f32 %v2097_v19, %v2229_v59 }
 0x197   : > { %v2378_v29 = vpop.f32.mrb[10].mxu0  ;;  %v2037_v41 = vpack.c.bf16 %v1501_v40, %v1501_v40  ;;  %v1695_v43 = vsel %vm1693_vm6, %v1501_v40, 0.0  ;;  %v1766_v45 = vmul.f32 %v1501_v40, %v1501_v40  ;;  %v747_v50 = vrot.slane %v713_v26, 7 }
 0x198   : > { %v2381_v37 = vpop.f32.mrb[11].mxu0  ;;  %1661 = vst.msk [vmem:[%s2374_s20] sm:$0xf] %vm1660_vm7, %v2036_v60  ;;  %v2387_v47 = vadd.f32 %v1695_v43, %v1694_v31  ;;  %v1797_v49 = vsel %vm1693_vm6, %v1765_v35, 0.0  ;;  %v890_v42 = vmul.f32 %v2232_v61, %v713_v26  ;;  %v949_v55 = vrot.slane %v713_v26, 1 }
 0x199   : > { %1662 = vst.msk [vmem:[%s2374_s20 + $0x4] sm:$0xf] %vm1660_vm7, %v2037_v41  ;;  %v1798_v52 = vsel %vm1693_vm6, %v1766_v45, 0.0  ;;  %v2395_v57 = vmul.f32 %v2260_v25, %v713_v26  ;;  %v2398_v1 = vmul.f32 %v2262_v27, %v713_v26  ;;  %v746_v3 = vrot.slane %v2376_v53, 7 }
 0x19a   : > { %v2400_v2 = vadd.f32 %v1798_v52, %v1797_v49  ;;  %v762_v38 = vrot.slane %v714_v36, 7  ;;  %v964_v4 = vrot.slane %v714_v36, 1  ;;  %v888_v32 = vmul.f32 %v2232_v61, %v2376_v53 }
 0x19b   : > { %v948_v7 = vrot.slane %v2376_v53, 1  ;;  %v1195_v56 = vmul.f32 %v2260_v25, %v2376_v53  ;;  %v891_v8 = vmul.f32 %v2232_v61, %v714_v36  ;;  %v1403_v39 = vmul.f32 %v2262_v27, %v2376_v53 }
 0x19c   : > { %v778_v9 = vsel %vm774_vm2, %v747_v50, %v762_v38  ;;  %v793_v51 = vsel %vm774_vm2, %v762_v38, %v747_v50  ;;  %v2415_v48 = vsel %vm976_vm4, %v949_v55, %v964_v4  ;;  %v995_v10 = vsel %vm976_vm4, %v964_v4, %v949_v55 }
 0x19d   : > { %v819_v5 = vsel %vm805_vm3, %v793_v51, 0.0  ;;  %v856_v12 = vmul.f32 %v2224_v58, %v778_v9  ;;  %v2424_v14 = vsel %vm1008_vm5, %v995_v10, 0.0  ;;  %v2432_v20 = vmul.f32 %v2260_v25, %v714_v36 }
 0x19e   : > { %v855_v16 = vmul.f32 %v2224_v58, %v819_v5  ;;  %v1058_v17 = vmul.f32 %v2243_v6, %v2424_v14  ;;  %v1057_v23 = vmul.f32 %v2243_v6, %v2415_v48  ;;  %v2437_v19 = vmul.f32 %v2262_v27, %v714_v36 }
 0x19f   : > { %v923_v21 = vadd.f32 %v891_v8, %v856_v12  ;;  %v2440_v24 = vadd.f32 %v2237_v63, %v614_v46  ;;  %v1129_v40 = vmul.f32 %v2270_v33, %v819_v5  ;;  %v1130_v53 = vmul.f32 %v2270_v33, %v778_v9 }
 0x1a0   : > { %v922_v26 = vadd.f32 %v890_v42, %v855_v16  ;;  %v2446_v62 = vmul.f32 %v2268_v30, %v2415_v48  ;;  %v2452_v31 = vmul.f32 %v2268_v30, %v2424_v14  ;;  %v761_v35 = vrot.slane %v712_v15, 7 }
 0x1a1   : > { %v2448_v60 = vadd.f32 %v1058_v17, %v923_v21  ;;  %v963_v36 = vrot.slane %v712_v15, 1  ;;  %v1337_v43 = vmul.f32 %v2272_v34, %v819_v5  ;;  %v1338_v45 = vmul.f32 %v2272_v34, %v778_v9 }
 0x1a2   : > { %v2454_v41 = vadd.f32 %v1057_v23, %v922_v26  ;;  %v889_v46 = vmul.f32 %v2232_v61, %v712_v15  ;;  %v777_v49 = vsel %vm774_vm2, %v746_v3, %v761_v35  ;;  %v792_v50 = vsel %vm774_vm2, %v761_v35, %v746_v3 }
 0x1a3   : > { %3377 = vst [vmem:[#allocation3_spill] sm:$0xff] %v2448_v60  ;;  %v979_v42 = vsel %vm976_vm4, %v948_v7, %v963_v36  ;;  %v994_v52 = vsel %vm976_vm4, %v963_v36, %v948_v7  ;;  %v817_v38 = vsel %vm805_vm3, %v792_v50, 0.0  ;;  %v854_v4 = vmul.f32 %v2224_v58, %v777_v49 }
 0x1a4   : > { %3378 = vst [vmem:[#allocation4_spill] sm:$0xff] %v2454_v41  ;;  %v1020_v8 = vsel %vm1008_vm5, %v994_v52, 0.0  ;;  %v1196_v9 = vmul.f32 %v2260_v25, %v712_v15  ;;  %v853_v3 = vmul.f32 %v2224_v58, %v817_v38  ;;  %v1127_v7 = vmul.f32 %v2270_v33, %v817_v38 }
 0x1a5   : > { %v2467_v55 = vpop.f32.mrb[12].mxu0  ;;  %v1056_v10 = vmul.f32 %v2243_v6, %v1020_v8  ;;  %v1128_v5 = vmul.f32 %v2270_v33, %v777_v49  ;;  %v921_v16 = vadd.f32 %v889_v46, %v854_v4  ;;  %v1055_v17 = vmul.f32 %v2243_v6, %v979_v42 }
 0x1a6   : > { %v2475_v51 = vpop.f32.mrb[13].mxu0  ;;  %v1335_v21 = vmul.f32 %v2272_v34, %v817_v38  ;;  %v1404_v23 = vmul.f32 %v2262_v27, %v712_v15  ;;  %v920_v35 = vadd.f32 %v888_v32, %v853_v3  ;;  %v1159_v36 = vadd.f32 %v1127_v7, %v2329_v22 }
 0x1a7   : > { %v2481_v12 = vpop.f32.mrb[14].mxu0  ;;  %v1160_v50 = vadd.f32 %v1128_v5, %v2322_v18  ;;  %v1336_v52 = vmul.f32 %v2272_v34, %v777_v49  ;;  %v1088_v60 = vadd.f32 %v1056_v10, %v921_v16  ;;  %v1269_v41 = vmul.f32 %v2268_v30, %v979_v42 }
 0x1a8   : > { %3379 = vst [vmem:[#allocation5_spill] sm:$0xff] %v2481_v12  ;;  %v2486_v26 = vpop.f32.mrb[15].mxu0  ;;  %v1270_v46 = vmul.f32 %v2268_v30, %v1020_v8  ;;  %v1367_v4 = vadd.f32 %v1335_v21, %v2359_v11  ;;  %v1087_v33 = vadd.f32 %v1055_v17, %v920_v35  ;;  %v1227_v38 = vadd.f32 %v1195_v56, %v1159_v36 }
 0x1a9   : > { %3380 = vst [vmem:[#allocation6_spill] sm:$0xff] %v2486_v26  ;;  %v1228_v12 = vadd.f32 %v1196_v9, %v1160_v50  ;;  %v1368_v15 = vadd.f32 %v1336_v52, %v2355_v0  ;;  %v1162_v26 = vadd.f32 %v1130_v53, %v1088_v60  ;;  %v1470_v22 = vmul.f32 %v2350_v44, %v979_v42 }
 0x1aa   : > { %v1434_v32 = vadd.f32 %v1403_v39, %v1367_v4  ;;  %v1471_v18 = vmul.f32 %v2350_v44, %v1020_v8  ;;  %v1161_v3 = vadd.f32 %v1129_v40, %v1087_v33  ;;  %v1301_v49 = vadd.f32 %v1269_v41, %v1227_v38 }
 0x1ab   : > { %v1302_v10 = vadd.f32 %v1270_v46, %v1228_v12  ;;  %v1435_v7 = vadd.f32 %v1404_v23, %v1368_v15  ;;  %v1472_v5 = vmul.f32 %v2350_v44, %v2415_v48  ;;  %v1473_v11 = vmul.f32 %v2350_v44, %v2424_v14 }
 0x1ac   : > { %v1502_v56 = vadd.f32 %v1470_v22, %v1434_v32  ;;  %v685_v0 = vmax.f32 %v2440_v24, 0.0  ;;  %v1229_v39 = vadd.f32 %v2395_v57, %v1161_v3  ;;  %v1369_v53 = vadd.f32 %v1337_v43, %v1301_v49 }
 0x1ad   : > { %v1370_v60 = vadd.f32 %v1338_v45, %v1302_v10  ;;  %v1503_v42 = vadd.f32 %v1471_v18, %v1435_v7  ;;  %v612_v48 = vmul.f32 %v2229_v59, %v2369_v28  ;;  %v615_v21 = vmul.f32 %v2378_v29, %v2229_v59 }
 0x1ae   : > { %v2038_v33 = vpack.c.bf16 %v1502_v56, %v1502_v56  ;;  %v1697_v40 = vsel %vm1693_vm6, %v1502_v56, 0.0  ;;  %v1767_v41 = vmul.f32 %v1502_v56, %v1502_v56  ;;  %v1436_v8 = vadd.f32 %v2398_v1, %v1369_v53 }
 0x1af   : > { %v1437_v14 = vadd.f32 %v2437_v19, %v1370_v60  ;;  %v2039_v9 = vpack.c.bf16 %v1503_v42, %v1503_v42  ;;  %v1698_v24 = vadd.f32 %v1697_v40, %v2387_v47  ;;  %v1699_v57 = vsel %vm1693_vm6, %v1503_v42, 0.0 }
 0x1b0   : > { %1663 = vst.msk [vmem:[%s2374_s20 + $0x8] sm:$0xf] %vm1660_vm7, %v2038_v33  ;;  %v1768_v43 = vmul.f32 %v1503_v42, %v1503_v42  ;;  %v1800_v45 = vsel %vm1693_vm6, %v1767_v41, 0.0  ;;  %v717_v12 = vmin.f32 %v685_v0, 6.0  ;;  %v1504_v16 = vadd.f32 %v1472_v5, %v1436_v8 }
 0x1b1   : > { %v1505_v17 = vadd.f32 %v1473_v11, %v1437_v14  ;;  %1664 = vst.msk [vmem:[%s2374_s20 + $0xc] sm:$0xf] %vm1660_vm7, %v2039_v9  ;;  %v1700_v28 = vadd.f32 %v1699_v57, %v1698_v24  ;;  %v1801_v1 = vadd.f32 %v1800_v45, %v2400_v2  ;;  %v651_v47 = vadd.f32 %v2237_v63, %v612_v48 }
 0x1b2   : > { %v1802_v19 = vsel %vm1693_vm6, %v1768_v43, 0.0  ;;  %v613_v23 = vmul.f32 %v2229_v59, %v2381_v37  ;;  %v2040_v35 = vpack.c.bf16 %v1504_v16, %v1504_v16  ;;  %v1701_v50 = vsel %vm1693_vm6, %v1504_v16, 0.0 }
 0x1b3   : > { %v2041_v36 = vpack.c.bf16 %v1505_v17, %v1505_v17  ;;  %v1769_v52 = vmul.f32 %v1504_v16, %v1504_v16  ;;  %v1702_v4 = vadd.f32 %v1701_v50, %v1700_v28  ;;  %v1770_v2 = vmul.f32 %v1505_v17, %v1505_v17 }
 0x1b4   : > { %v1803_v38 = vadd.f32 %v1802_v19, %v1801_v1  ;;  %v683_v15 = vmax.f32 %v651_v47, 0.0  ;;  %1665 = vst.msk [vmem:[%s2374_s20 + $0x10] sm:$0xf] %vm1660_vm7, %v2040_v35  ;;  %v654_v37 = vadd.f32 %v2237_v63, %v615_v21  ;;  %v652_v22 = vadd.f32 %v2237_v63, %v613_v23 }
 0x1b5   : > { %v2523_v46 = vpop.f32.mrb[0].mxu1  ;;  %1666 = vst.msk [vmem:[%s2374_s20 + $0x14] sm:$0xf] %vm1660_vm7, %v2041_v36  ;;  %v1804_v29 = vsel %vm1693_vm6, %v1769_v52, 0.0  ;;  %v1230_v18 = vadd.f32 %v2432_v20, %v1162_v26  ;;  %v2538_v7 = vadd.f32 %v2446_v62, %v1229_v39  ;;  %v1703_v5 = vsel %vm1693_vm6, %v1505_v17, 0.0  ;;  %v3381_v52 = vld [vmem:[#allocation5_spill] sm:$0xff] }
 0x1b6   : > { %v2525_v32 = vpop.f32.mrb[1].mxu1  ;;  %v1805_v49 = vadd.f32 %v1804_v29, %v1803_v38  ;;  %v715_v10 = vmin.f32 %v683_v15, 6.0  ;;  %v686_v56 = vmax.f32 %v654_v37, 0.0  ;;  %v684_v0 = vmax.f32 %v652_v22, 0.0  ;;  %v3382_v15 = vld [vmem:[#allocation2_spill] sm:$0xff] }
 0x1b7   : > { %v2535_v3 = vpop.f32.mrb[2].mxu1  ;;  %v2544_v53 = vadd.f32 %v2452_v31, %v1230_v18  ;;  %v2546_v60 = vadd.f32 %v1703_v5, %v1702_v4  ;;  %v749_v42 = vrot.slane %v717_v12, 7  ;;  %v894_v20 = vmul.f32 %v2232_v61, %v717_v12 }
 0x1b8   : > { %v2541_v11 = vpop.f32.mrb[3].mxu1  ;;  %v951_v26 = vrot.slane %v717_v12, 1  ;;  %v2550_v33 = vmul.f32 %v2260_v25, %v717_v12  ;;  %v2552_v62 = vmin.f32 %v686_v56, 6.0  ;;  %v2554_v39 = vmin.f32 %v684_v0, 6.0 }
 0x1b9   : > { %v1806_v40 = vsel %vm1693_vm6, %v1770_v2, 0.0  ;;  %v2558_v41 = vmul.f32 %v2262_v27, %v717_v12  ;;  %v748_v31 = vrot.slane %v715_v10, 7  ;;  %v892_v48 = vmul.f32 %v2232_v61, %v715_v10 }
 0x1ba   : > { %v2561_v8 = vadd.f32 %v1806_v40, %v1805_v49  ;;  %v950_v14 = vrot.slane %v715_v10, 1  ;;  %v1199_v9 = vmul.f32 %v2260_v25, %v715_v10  ;;  %v764_v24 = vrot.slane %v2552_v62, 7 }
 0x1bb   : > { %v966_v57 = vrot.slane %v2552_v62, 1  ;;  %v2567_v43 = vmul.f32 %v2262_v27, %v715_v10  ;;  %v895_v45 = vmul.f32 %v2232_v61, %v2552_v62  ;;  %v763_v12 = vrot.slane %v2554_v39, 7 }
 0x1bc   : > { %v618_v16 = vmul.f32 %v2467_v55, %v2229_v59  ;;  %v780_v17 = vsel %vm774_vm2, %v749_v42, %v764_v24  ;;  %v795_v28 = vsel %vm774_vm2, %v764_v24, %v749_v42  ;;  %v965_v23 = vrot.slane %v2554_v39, 1 }
 0x1bd   : > { %v2580_v1 = vsel %vm976_vm4, %v951_v26, %v966_v57  ;;  %v997_v19 = vsel %vm976_vm4, %v966_v57, %v951_v26  ;;  %v823_v47 = vsel %vm805_vm3, %v795_v28, 0.0  ;;  %v860_v21 = vmul.f32 %v2224_v58, %v780_v17 }
 0x1be   : > { %v2589_v55 = vsel %vm1008_vm5, %v997_v19, 0.0  ;;  %v859_v35 = vmul.f32 %v2224_v58, %v823_v47  ;;  %v616_v50 = vmul.f32 %v2229_v59, %v2475_v51  ;;  %v619_v4 = vmul.f32 %v3381_v52, %v2229_v59 }
 0x1bf   : > { %v1062_v36 = vmul.f32 %v2243_v6, %v2589_v55  ;;  %v927_v2 = vadd.f32 %v895_v45, %v860_v21  ;;  %v1061_v38 = vmul.f32 %v2243_v6, %v2580_v1  ;;  %v1133_v29 = vmul.f32 %v3382_v15, %v823_v47 }
 0x1c0   : > { %v893_v37 = vmul.f32 %v2232_v61, %v2554_v39  ;;  %v926_v22 = vadd.f32 %v894_v20, %v859_v35  ;;  %v1134_v18 = vmul.f32 %v3382_v15, %v780_v17  ;;  %v1341_v49 = vmul.f32 %v2272_v34, %v823_v47  ;;  %v3386_v35 = vld [vmem:[#allocation4_spill] sm:$0xff] }
 0x1c1   : > { %v1342_v10 = vmul.f32 %v2272_v34, %v780_v17  ;;  %v2607_v51 = vadd.f32 %v1062_v36, %v927_v2  ;;  %v779_v5 = vsel %vm774_vm2, %v748_v31, %v763_v12  ;;  %v794_v56 = vsel %vm774_vm2, %v763_v12, %v748_v31 }
 0x1c2   : > { %v981_v0 = vsel %vm976_vm4, %v950_v14, %v965_v23  ;;  %v2615_v42 = vadd.f32 %v1061_v38, %v926_v22  ;;  %v821_v20 = vsel %vm805_vm3, %v794_v56, 0.0  ;;  %v858_v26 = vmul.f32 %v2224_v58, %v779_v5 }
 0x1c3   : > { %v996_v40 = vsel %vm976_vm4, %v965_v23, %v950_v14  ;;  %v857_v57 = vmul.f32 %v2224_v58, %v821_v20  ;;  %v1059_v45 = vmul.f32 %v2243_v6, %v981_v0  ;;  %v1131_v12 = vmul.f32 %v3382_v15, %v821_v20 }
 0x1c4   : > { %v1024_v31 = vsel %vm1008_vm5, %v996_v40, 0.0  ;;  %v925_v28 = vadd.f32 %v893_v37, %v858_v26  ;;  %v1132_v47 = vmul.f32 %v3382_v15, %v779_v5  ;;  %v1200_v14 = vmul.f32 %v2260_v25, %v2554_v39  ;;  %v3388_v37 = vld [vmem:[#allocation3_spill] sm:$0xff] }
 0x1c5   : > { %v2622_v24 = vpop.f32.mrb[4].mxu1  ;;  %v1060_v19 = vmul.f32 %v2243_v6, %v1024_v31  ;;  %v924_v23 = vadd.f32 %v892_v48, %v857_v57  ;;  %v1163_v36 = vadd.f32 %v1131_v12, %v3386_v35  ;;  %v1273_v52 = vmul.f32 %v2268_v30, %v981_v0 }
 0x1c6   : > { %3383 = vst [vmem:[#allocation5_spill] sm:$0xff] %v2622_v24  ;;  %v2629_v17 = vpop.f32.mrb[5].mxu1  ;;  %v1274_v2 = vmul.f32 %v2268_v30, %v1024_v31  ;;  %v1164_v56 = vadd.f32 %v1132_v47, %v3388_v37  ;;  %v1339_v26 = vmul.f32 %v2272_v34, %v821_v20  ;;  %v1340_v40 = vmul.f32 %v2272_v34, %v779_v5 }
 0x1c7   : > { %3384 = vst [vmem:[#allocation2_spill] sm:$0xff] %v2629_v17  ;;  %v2635_v21 = vpop.f32.mrb[6].mxu1  ;;  %v1092_v22 = vadd.f32 %v1060_v19, %v925_v28  ;;  %v1091_v17 = vadd.f32 %v1059_v45, %v924_v23  ;;  %v1231_v24 = vadd.f32 %v1199_v9, %v1163_v36  ;;  %v1408_v48 = vmul.f32 %v2262_v27, %v2554_v39 }
 0x1c8   : > { %3385 = vst [vmem:[#allocation7_spill] sm:$0xff] %v2635_v21  ;;  %v2640_v38 = vpop.f32.mrb[7].mxu1  ;;  %v1474_v57 = vmul.f32 %v2350_v44, %v981_v0  ;;  %v1232_v35 = vadd.f32 %v1200_v14, %v1164_v56  ;;  %v1371_v21 = vadd.f32 %v1339_v26, %v2538_v7  ;;  %v1475_v47 = vmul.f32 %v2350_v44, %v1024_v31 }
 0x1c9   : > { %3387 = vst [vmem:[#allocation4_spill] sm:$0xff] %v2640_v38  ;;  %v1166_v12 = vadd.f32 %v1134_v18, %v1092_v22  ;;  %v1372_v38 = vadd.f32 %v1340_v40, %v2544_v53  ;;  %v1165_v28 = vadd.f32 %v1133_v29, %v1091_v17  ;;  %v1305_v19 = vadd.f32 %v1273_v52, %v1231_v24  ;;  %v3389_v22 = vld [vmem:[#allocation6_spill] sm:$0xff] }
 0x1ca   : > { %v657_v20 = vadd.f32 %v2237_v63, %v618_v16  ;;  %v1306_v5 = vadd.f32 %v1274_v2, %v1232_v35  ;;  %v1438_v9 = vadd.f32 %v2567_v43, %v1371_v21  ;;  %v655_v39 = vadd.f32 %v2237_v63, %v616_v50 }
 0x1cb   : > { %v1439_v45 = vadd.f32 %v1408_v48, %v1372_v38  ;;  %v1410_v18 = vmul.f32 %v2262_v27, %v2552_v62  ;;  %v1233_v0 = vadd.f32 %v2550_v33, %v1165_v28  ;;  %v1373_v7 = vadd.f32 %v1341_v49, %v1305_v19 }
 0x1cc   : > { %v658_v53 = vadd.f32 %v2237_v63, %v619_v4  ;;  %v1476_v29 = vmul.f32 %v2350_v44, %v2580_v1  ;;  %v1374_v24 = vadd.f32 %v1342_v10, %v1306_v5  ;;  %v1506_v16 = vadd.f32 %v1474_v57, %v1438_v9 }
 0x1cd   : > { %v1507_v31 = vadd.f32 %v1475_v47, %v1439_v45  ;;  %v1477_v43 = vmul.f32 %v2350_v44, %v2589_v55  ;;  %v1440_v50 = vadd.f32 %v2558_v41, %v1373_v7  ;;  %v689_v17 = vmax.f32 %v657_v20, 0.0 }
 0x1ce   : > { %v687_v14 = vmax.f32 %v655_v39, 0.0  ;;  %v1441_v21 = vadd.f32 %v1410_v18, %v1374_v24  ;;  %v2042_v33 = vpack.c.bf16 %v1506_v16, %v1506_v16  ;;  %v1705_v4 = vsel %vm1693_vm6, %v1506_v16, 0.0 }
 0x1cf   : > { %v2043_v49 = vpack.c.bf16 %v1507_v31, %v1507_v31  ;;  %v1508_v23 = vadd.f32 %v1476_v29, %v1440_v50  ;;  %v1706_v36 = vadd.f32 %v1705_v4, %v2546_v60  ;;  %v1771_v10 = vmul.f32 %v1506_v16, %v1506_v16 }
 0x1d0   : > { %v690_v52 = vmax.f32 %v658_v53, 0.0  ;;  %v1509_v2 = vadd.f32 %v1477_v43, %v1441_v21  ;;  %1667 = vst.msk [vmem:[%s2374_s20 + $0x18] sm:$0xf] %vm1660_vm7, %v2042_v33  ;;  %v1707_v41 = vsel %vm1693_vm6, %v1507_v31, 0.0  ;;  %v1772_v38 = vmul.f32 %v1507_v31, %v1507_v31 }
 0x1d1   : > { %1668 = vst.msk [vmem:[%s2374_s20 + $0x1c] sm:$0xf] %vm1660_vm7, %v2043_v49  ;;  %v617_v37 = vmul.f32 %v2229_v59, %v3389_v22  ;;  %v2044_v56 = vpack.c.bf16 %v1508_v23, %v1508_v23  ;;  %v1708_v26 = vadd.f32 %v1707_v41, %v1706_v36  ;;  %v1709_v40 = vsel %vm1693_vm6, %v1508_v23, 0.0 }
 0x1d2   : > { %v1773_v60 = vmul.f32 %v1508_v23, %v1508_v23  ;;  %v2045_v48 = vpack.c.bf16 %v1509_v2, %v1509_v2  ;;  %v1808_v57 = vsel %vm1693_vm6, %v1771_v10, 0.0  ;;  %v721_v35 = vmin.f32 %v689_v17, 6.0 }
 0x1d3   : > { %v1202_v19 = vmul.f32 %v2260_v25, %v2552_v62  ;;  %v1275_v47 = vmul.f32 %v2268_v30, %v2580_v1  ;;  %1669 = vst.msk [vmem:[%s2374_s20 + $0x20] sm:$0xf] %vm1660_vm7, %v2044_v56  ;;  %v1710_v20 = vadd.f32 %v1709_v40, %v1708_v26  ;;  %v1809_v5 = vadd.f32 %v1808_v57, %v2561_v8 }
 0x1d4   : > { %1670 = vst.msk [vmem:[%s2374_s20 + $0x24] sm:$0xf] %vm1660_vm7, %v2045_v48  ;;  %v1810_v45 = vsel %vm1693_vm6, %v1772_v38, 0.0  ;;  %v1812_v39 = vsel %vm1693_vm6, %v1773_v60, 0.0  ;;  %v719_v18 = vmin.f32 %v687_v14, 6.0  ;;  %v2689_v7 = vmin.f32 %v690_v52, 6.0 }
 0x1d5   : > { %v2674_v28 = vpop.f32.mrb[8].mxu1  ;;  %v1811_v53 = vadd.f32 %v1810_v45, %v1809_v5  ;;  %v656_v1 = vadd.f32 %v2237_v63, %v617_v37  ;;  %v1234_v29 = vadd.f32 %v1202_v19, %v1166_v12  ;;  %v2694_v24 = vadd.f32 %v1275_v47, %v1233_v0 }
 0x1d6   : > { %v2683_v9 = vpop.f32.mrb[9].mxu1  ;;  %v1276_v16 = vmul.f32 %v2268_v30, %v2589_v55  ;;  %v1774_v31 = vmul.f32 %v1509_v2, %v1509_v2  ;;  %v751_v43 = vrot.slane %v721_v35, 7  ;;  %v898_v50 = vmul.f32 %v2232_v61, %v721_v35 }
 0x1d7   : > { %v2691_v62 = vpop.f32.mrb[10].mxu1  ;;  %v1813_v17 = vadd.f32 %v1812_v39, %v1811_v53  ;;  %v953_v14 = vrot.slane %v721_v35, 1  ;;  %v2702_v21 = vmul.f32 %v2260_v25, %v721_v35  ;;  %v766_v33 = vrot.slane %v2689_v7, 7 }
 0x1d8   : > { %3390 = vst [vmem:[#allocation3_spill] sm:$0xff] %v2691_v62  ;;  %v2696_v8 = vpop.f32.mrb[11].mxu1  ;;  %v2706_v12 = vmul.f32 %v2262_v27, %v721_v35  ;;  %v750_v0 = vrot.slane %v719_v18, 7  ;;  %v899_v49 = vmul.f32 %v2232_v61, %v2689_v7  ;;  %v968_v55 = vrot.slane %v2689_v7, 1 }
 0x1d9   : > { %3391 = vst [vmem:[#allocation6_spill] sm:$0xff] %v2696_v8  ;;  %v782_v4 = vsel %vm774_vm2, %v751_v43, %v766_v33  ;;  %v797_v23 = vsel %vm774_vm2, %v766_v33, %v751_v43  ;;  %v688_v36 = vmax.f32 %v656_v1, 0.0  ;;  %v2715_v10 = vadd.f32 %v1276_v16, %v1234_v29 }
 0x1da   : > { %v827_v52 = vsel %vm805_vm3, %v797_v23, 0.0  ;;  %v864_v41 = vmul.f32 %v2224_v58, %v782_v4  ;;  %v2722_v38 = vsel %vm976_vm4, %v953_v14, %v968_v55  ;;  %v999_v22 = vsel %vm976_vm4, %v968_v55, %v953_v14 }
 0x1db   : > { %v896_v37 = vmul.f32 %v2232_v61, %v719_v18  ;;  %v952_v56 = vrot.slane %v719_v18, 1  ;;  %v863_v26 = vmul.f32 %v2224_v58, %v827_v52  ;;  %v2730_v40 = vsel %vm1008_vm5, %v999_v22, 0.0 }
 0x1dc   : > { %v1203_v60 = vmul.f32 %v2260_v25, %v719_v18  ;;  %v1411_v48 = vmul.f32 %v2262_v27, %v719_v18  ;;  %v931_v57 = vadd.f32 %v899_v49, %v864_v41  ;;  %v1066_v35 = vmul.f32 %v2243_v6, %v2730_v40 }
 0x1dd   : > { %v930_v19 = vadd.f32 %v898_v50, %v863_v26  ;;  %v1065_v47 = vmul.f32 %v2243_v6, %v2722_v38  ;;  %v2740_v5 = vmul.f32 %v2262_v27, %v2689_v7  ;;  %v1711_v45 = vsel %vm1693_vm6, %v1509_v2, 0.0 }
 0x1de   : > { %v2743_v39 = vadd.f32 %v1066_v35, %v931_v57  ;;  %v1137_v53 = vmul.f32 %v3382_v15, %v827_v52  ;;  %v1138_v18 = vmul.f32 %v3382_v15, %v782_v4  ;;  %v720_v1 = vmin.f32 %v688_v36, 6.0 }
 0x1df   : > { %v2747_v29 = vadd.f32 %v1065_v47, %v930_v19  ;;  %v1345_v16 = vmul.f32 %v2272_v34, %v827_v52  ;;  %v2750_v43 = vadd.f32 %v1711_v45, %v1710_v20  ;;  %v622_v50 = vmul.f32 %v2523_v46, %v2229_v59 }
 0x1e0   : > { %v1346_v14 = vmul.f32 %v2272_v34, %v782_v4  ;;  %v765_v33 = vrot.slane %v720_v1, 7  ;;  %v967_v2 = vrot.slane %v720_v1, 1  ;;  %v1814_v49 = vsel %vm1693_vm6, %v1774_v31, 0.0 }
 0x1e1   : > { %v897_v55 = vmul.f32 %v2232_v61, %v720_v1  ;;  %v1204_v23 = vmul.f32 %v2260_v25, %v720_v1  ;;  %v1412_v36 = vmul.f32 %v2262_v27, %v720_v1  ;;  %v2759_v41 = vadd.f32 %v1814_v49, %v1813_v17 }
 0x1e2   : > { %v781_v20 = vsel %vm774_vm2, %v750_v0, %v765_v33  ;;  %v796_v46 = vsel %vm774_vm2, %v765_v33, %v750_v0  ;;  %v983_v4 = vsel %vm976_vm4, %v952_v56, %v967_v2  ;;  %v998_v31 = vsel %vm976_vm4, %v967_v2, %v952_v56 }
 0x1e3   : > { %v825_v22 = vsel %vm805_vm3, %v796_v46, 0.0  ;;  %v862_v17 = vmul.f32 %v2224_v58, %v781_v20  ;;  %v1028_v26 = vsel %vm1008_vm5, %v998_v31, 0.0  ;;  %v661_v57 = vadd.f32 %v2237_v63, %v622_v50 }
 0x1e4   : > { %v861_v0 = vmul.f32 %v2224_v58, %v825_v22  ;;  %v1064_v19 = vmul.f32 %v2243_v6, %v1028_v26  ;;  %v1135_v56 = vmul.f32 %v3382_v15, %v825_v22  ;;  %v1136_v47 = vmul.f32 %v3382_v15, %v781_v20 }
 0x1e5   : > { %v2769_v52 = vpop.f32.mrb[12].mxu1  ;;  %v929_v1 = vadd.f32 %v897_v55, %v862_v17  ;;  %v1063_v33 = vmul.f32 %v2243_v6, %v983_v4  ;;  %v1343_v2 = vmul.f32 %v2272_v34, %v825_v22  ;;  %v620_v63 = vmul.f32 %v2229_v59, %v2525_v32 }
 0x1e6   : > { %3392 = vst [vmem:[#allocation8_spill] sm:$0xff] %v2769_v52  ;;  %v2777_v35 = vpop.f32.mrb[13].mxu1  ;;  %v928_v49 = vadd.f32 %v896_v37, %v861_v0  ;;  %v1167_v46 = vadd.f32 %v1135_v56, %v2615_v42  ;;  %v1168_v31 = vadd.f32 %v1136_v47, %v2607_v51  ;;  %v1278_v55 = vmul.f32 %v2268_v30, %v1028_v26 }
 0x1e7   : > { %3393 = vst [vmem:[#allocation9_spill] sm:$0xff] %v2777_v35  ;;  %v2783_v45 = vpop.f32.mrb[14].mxu1  ;;  %v1344_v35 = vmul.f32 %v2272_v34, %v781_v20  ;;  %v1096_v52 = vadd.f32 %v1064_v19, %v929_v1  ;;  %v1375_v17 = vadd.f32 %v1343_v2, %v2694_v24  ;;  %v1478_v42 = vmul.f32 %v2350_v44, %v983_v4 }
 0x1e8   : > { %3394 = vst [vmem:[#allocation10_spill] sm:$0xff] %v2783_v45  ;;  %v2789_v50 = vpop.f32.mrb[15].mxu1  ;;  %v1277_v45 = vmul.f32 %v2268_v30, %v983_v4  ;;  %v1095_v22 = vadd.f32 %v1063_v33, %v928_v49  ;;  %v1235_v8 = vadd.f32 %v1203_v60, %v1167_v46  ;;  %v1236_v62 = vadd.f32 %v1204_v23, %v1168_v31 }
 0x1e9   : > { %3395 = vst [vmem:[#allocation11_spill] sm:$0xff] %v2789_v50  ;;  %v1376_v59 = vadd.f32 %v1344_v35, %v2715_v10  ;;  %v1170_v32 = vadd.f32 %v1138_v18, %v1096_v52  ;;  %v1442_v37 = vadd.f32 %v1411_v48, %v1375_v17  ;;  %v1479_v51 = vmul.f32 %v2350_v44, %v1028_v26 }
 0x1ea   : > { %v1169_v0 = vadd.f32 %v1137_v53, %v1095_v22  ;;  %v1309_v20 = vadd.f32 %v1277_v45, %v1235_v8  ;;  %v1310_v19 = vadd.f32 %v1278_v55, %v1236_v62  ;;  %v1480_v47 = vmul.f32 %v2350_v44, %v2722_v38  ;;  %v2809_v8 = vld [vmem:[%s3369_s3] ss:$0 sm:$0xff] }
 0x1eb   : > { %v1443_v56 = vadd.f32 %v1412_v36, %v1376_v59  ;;  %v1481_v24 = vmul.f32 %v2350_v44, %v2730_v40  ;;  %v1510_v60 = vadd.f32 %v1478_v42, %v1442_v37  ;;  %v693_v23 = vmax.f32 %v661_v57, 0.0  ;;  %v2822_v45 = vld [vmem:[%s3368_s2] ss:$0 sm:$0xff] }
 0x1ec   : > { %v1237_v10 = vadd.f32 %v2702_v21, %v1169_v0  ;;  %v1377_v48 = vadd.f32 %v1345_v16, %v1309_v20  ;;  %v1378_v18 = vadd.f32 %v1346_v14, %v1310_v19  ;;  %v659_v44 = vadd.f32 %v2809_v8, %v620_v63 }
 0x1ed   : > { %v1511_v4 = vadd.f32 %v1479_v51, %v1443_v56  ;;  %v2046_v52 = vpack.c.bf16 %v1510_v60, %v1510_v60  ;;  %v1713_v53 = vsel %vm1693_vm6, %v1510_v60, 0.0  ;;  %v1775_v62 = vmul.f32 %v1510_v60, %v1510_v60 }
 0x1ee   : > { %v1444_v36 = vadd.f32 %v2706_v12, %v1377_v48  ;;  %v1445_v26 = vadd.f32 %v2740_v5, %v1378_v18  ;;  %v1714_v16 = vadd.f32 %v1713_v53, %v2750_v43  ;;  %v623_v12 = vmul.f32 %v2822_v45, %v2535_v3 }
 0x1ef   : > { %v2047_v21 = vpack.c.bf16 %v1511_v4, %v1511_v4  ;;  %1671 = vst.msk [vmem:[%s2374_s20 + $0x28] sm:$0xf] %vm1660_vm7, %v2046_v52  ;;  %v1715_v14 = vsel %vm1693_vm6, %v1511_v4, 0.0  ;;  %v1776_v57 = vmul.f32 %v1511_v4, %v1511_v4  ;;  %v1816_v35 = vsel %vm1693_vm6, %v1775_v62, 0.0 }
 0x1f0   : > { %v1512_v1 = vadd.f32 %v1480_v47, %v1444_v36  ;;  %v1513_v5 = vadd.f32 %v1481_v24, %v1445_v26  ;;  %v1716_v43 = vadd.f32 %v1715_v14, %v1714_v16  ;;  %v1817_v33 = vadd.f32 %v1816_v35, %v2759_v41 }
 0x1f1   : > { %1672 = vst.msk [vmem:[%s2374_s20 + $0x2c] sm:$0xf] %vm1660_vm7, %v2047_v21  ;;  %v1206_v2 = vmul.f32 %v2260_v25, %v2689_v7  ;;  %v1818_v63 = vsel %vm1693_vm6, %v1776_v57, 0.0  ;;  %v725_v49 = vmin.f32 %v693_v23, 6.0  ;;  %v691_v46 = vmax.f32 %v659_v44, 0.0 }
 0x1f2   : > { %v2048_v31 = vpack.c.bf16 %v1512_v1, %v1512_v1  ;;  %v2049_v55 = vpack.c.bf16 %v1513_v5, %v1513_v5  ;;  %v1717_v3 = vsel %vm1693_vm6, %v1512_v1, 0.0  ;;  %v1777_v17 = vmul.f32 %v1512_v1, %v1512_v1 }
 0x1f3   : > { %v1279_v22 = vmul.f32 %v2268_v30, %v2722_v38  ;;  %v1718_v59 = vadd.f32 %v1717_v3, %v1716_v43  ;;  %v1778_v37 = vmul.f32 %v1513_v5, %v1513_v5  ;;  %v1819_v42 = vadd.f32 %v1818_v63, %v1817_v33 }
 0x1f4   : > { %1673 = vst.msk [vmem:[%s2374_s20 + $0x30] sm:$0xf] %vm1660_vm7, %v2048_v31  ;;  %1674 = vst.msk [vmem:[%s2374_s20 + $0x34] sm:$0xf] %vm1660_vm7, %v2049_v55  ;;  %v1820_v7 = vsel %vm1693_vm6, %v1777_v17, 0.0  ;;  %v662_v41 = vadd.f32 %v2809_v8, %v623_v12  ;;  %v621_v51 = vmul.f32 %v2822_v45, %v2541_v11  ;;  %v1238_v0 = vadd.f32 %v1206_v2, %v1170_v32  ;;  %v3396_v12 = vld [vmem:[#allocation5_spill] sm:$0xff] }
 0x1f5   : > { %v1280_v20 = vmul.f32 %v2268_v30, %v2730_v40  ;;  %v1821_v19 = vadd.f32 %v1820_v7, %v1819_v42  ;;  %v753_v38 = vrot.slane %v725_v49, 7  ;;  %v723_v56 = vmin.f32 %v691_v46, 6.0  ;;  %v3399_v42 = vld [vmem:[#allocation4_spill] sm:$0xff] }
 0x1f6   : > { %v902_v47 = vmul.f32 %v2232_v61, %v725_v49  ;;  %v955_v24 = vrot.slane %v725_v49, 1  ;;  %v694_v60 = vmax.f32 %v662_v41, 0.0  ;;  %v660_v23 = vadd.f32 %v2809_v8, %v621_v51 }
 0x1f7   : > { %v2847_v48 = vadd.f32 %v1279_v22, %v1237_v10  ;;  %v2849_v18 = vadd.f32 %v1280_v20, %v1238_v0  ;;  %v1719_v4 = vsel %vm1693_vm6, %v1513_v5, 0.0  ;;  %v1822_v11 = vsel %vm1693_vm6, %v1778_v37, 0.0  ;;  %v3397_v5 = vld [vmem:[#allocation2_spill] sm:$0xff] }
 0x1f8   : > { %v2854_v32 = vmul.f32 %v2260_v25, %v725_v49  ;;  %v726_v40 = vmin.f32 %v694_v60, 6.0  ;;  %v2856_v52 = vadd.f32 %v1719_v4, %v1718_v59  ;;  %v2858_v53 = vadd.f32 %v1822_v11, %v1821_v19  ;;  %v3398_v59 = vld [vmem:[#allocation7_spill] sm:$0xff] }
 0x1f9   : > { %v2861_v62 = vmul.f32 %v2262_v27, %v725_v49  ;;  %v752_v44 = vrot.slane %v723_v56, 7  ;;  %v900_v10 = vmul.f32 %v2232_v61, %v723_v56  ;;  %v692_v36 = vmax.f32 %v660_v23, 0.0 }
 0x1fa   : > { %v954_v26 = vrot.slane %v723_v56, 1  ;;  %v1207_v21 = vmul.f32 %v2260_v25, %v723_v56  ;;  %v768_v16 = vrot.slane %v726_v40, 7  ;;  %v970_v14 = vrot.slane %v726_v40, 1 }
 0x1fb   : > { %v1415_v57 = vmul.f32 %v2262_v27, %v723_v56  ;;  %v903_v35 = vmul.f32 %v2232_v61, %v726_v40  ;;  %v626_v1 = vmul.f32 %v2822_v45, %v3396_v12  ;;  %v2871_v43 = vmul.f32 %v2822_v45, %v3397_v5 }
 0x1fc   : > { %v784_v33 = vsel %vm774_vm2, %v753_v38, %v768_v16  ;;  %v799_v2 = vsel %vm774_vm2, %v768_v16, %v753_v38  ;;  %v2879_v63 = vsel %vm976_vm4, %v955_v24, %v970_v14  ;;  %v1001_v49 = vsel %vm976_vm4, %v970_v14, %v955_v24 }
 0x1fd   : > { %v831_v46 = vsel %vm805_vm3, %v799_v2, 0.0  ;;  %v868_v31 = vmul.f32 %v2224_v58, %v784_v33  ;;  %v2888_v55 = vsel %vm1008_vm5, %v1001_v49, 0.0  ;;  %v724_v3 = vmin.f32 %v692_v36, 6.0 }
 0x1fe   : > { %v867_v17 = vmul.f32 %v2224_v58, %v831_v46  ;;  %v1070_v22 = vmul.f32 %v2243_v6, %v2888_v55  ;;  %v2895_v37 = vmul.f32 %v2822_v45, %v3398_v59  ;;  %v2899_v7 = vmul.f32 %v2822_v45, %v3399_v42 }
 0x1ff   : > { %v935_v41 = vadd.f32 %v903_v35, %v868_v31  ;;  %v2902_v51 = vmul.f32 %v2260_v25, %v726_v40  ;;  %v2905_v0 = vmul.f32 %v2262_v27, %v726_v40  ;;  %v665_v20 = vadd.f32 %v2809_v8, %v626_v1 }
 0x200   : > { %v934_v19 = vadd.f32 %v902_v47, %v867_v17  ;;  %v1069_v38 = vmul.f32 %v2243_v6, %v2879_v63  ;;  %v1141_v56 = vmul.f32 %v3382_v15, %v831_v46  ;;  %v1142_v24 = vmul.f32 %v3382_v15, %v784_v33 }
 0x201   : > { %v2912_v60 = vadd.f32 %v1070_v22, %v935_v41  ;;  %v1349_v23 = vmul.f32 %v2272_v34, %v831_v46  ;;  %v767_v4 = vrot.slane %v724_v3, 7  ;;  %v969_v11 = vrot.slane %v724_v3, 1 }
 0x202   : > { %v2915_v36 = vadd.f32 %v1069_v38, %v934_v19  ;;  %v1350_v40 = vmul.f32 %v2272_v34, %v784_v33  ;;  %v901_v16 = vmul.f32 %v2232_v61, %v724_v3  ;;  %v1208_v47 = vmul.f32 %v2260_v25, %v724_v3 }
 0x203   : > { %v783_v14 = vsel %vm774_vm2, %v752_v44, %v767_v4  ;;  %v798_v35 = vsel %vm774_vm2, %v767_v4, %v752_v44  ;;  %v985_v12 = vsel %vm976_vm4, %v954_v26, %v969_v11  ;;  %v1000_v1 = vsel %vm976_vm4, %v969_v11, %v954_v26 }
 0x204   : > { %v829_v5 = vsel %vm805_vm3, %v798_v35, 0.0  ;;  %v866_v33 = vmul.f32 %v2224_v58, %v783_v14  ;;  %v1032_v2 = vsel %vm1008_vm5, %v1000_v1, 0.0  ;;  %v1416_v49 = vmul.f32 %v2262_v27, %v724_v3 }
 0x205   : > { %v865_v46 = vmul.f32 %v2224_v58, %v829_v5  ;;  %v1068_v44 = vmul.f32 %v2243_v6, %v1032_v2  ;;  %v1139_v31 = vmul.f32 %v3382_v15, %v829_v5  ;;  %v1140_v17 = vmul.f32 %v3382_v15, %v783_v14 }
 0x206   : > { %v933_v22 = vadd.f32 %v901_v16, %v866_v33  ;;  %v1067_v26 = vmul.f32 %v2243_v6, %v985_v12  ;;  %v1347_v59 = vmul.f32 %v2272_v34, %v829_v5  ;;  %v697_v42 = vmax.f32 %v665_v20, 0.0 }
 0x207   : > { %v932_v41 = vadd.f32 %v900_v10, %v865_v46  ;;  %v1171_v19 = vadd.f32 %v1139_v31, %v2747_v29  ;;  %v1172_v38 = vadd.f32 %v1140_v17, %v2743_v39  ;;  %v1348_v3 = vmul.f32 %v2272_v34, %v783_v14  ;;  %v2950_v39 = vld [vmem:[%s3370_s4 + $0x8] ss:$0 sm:$0xff] }
 0x208   : > { %v1100_v4 = vadd.f32 %v1068_v44, %v933_v22  ;;  %v1281_v11 = vmul.f32 %v2268_v30, %v985_v12  ;;  %v1282_v35 = vmul.f32 %v2268_v30, %v1032_v2  ;;  %v1379_v1 = vadd.f32 %v1347_v59, %v2847_v48 }
 0x209   : > { %v1099_v16 = vadd.f32 %v1067_v26, %v932_v41  ;;  %v1239_v33 = vadd.f32 %v1207_v21, %v1171_v19  ;;  %v1240_v50 = vadd.f32 %v1208_v47, %v1172_v38  ;;  %v1380_v5 = vadd.f32 %v1348_v3, %v2849_v18 }
 0x20a   : > { %v1174_v20 = vadd.f32 %v1142_v24, %v1100_v4  ;;  %v1446_v10 = vadd.f32 %v1415_v57, %v1379_v1  ;;  %v1482_v29 = vmul.f32 %v2950_v39, %v985_v12  ;;  %v1483_v14 = vmul.f32 %v2950_v39, %v1032_v2 }
 0x20b   : > { %v1173_v46 = vadd.f32 %v1141_v56, %v1099_v16  ;;  %v1313_v44 = vadd.f32 %v1281_v11, %v1239_v33  ;;  %v1314_v31 = vadd.f32 %v1282_v35, %v1240_v50  ;;  %v1447_v48 = vadd.f32 %v1416_v49, %v1380_v5 }
 0x20c   : > { %v1484_v21 = vmul.f32 %v2950_v39, %v2879_v63  ;;  %v1485_v18 = vmul.f32 %v2950_v39, %v2888_v55  ;;  %v1514_v57 = vadd.f32 %v1482_v29, %v1446_v10  ;;  %v663_v24 = vadd.f32 %v2809_v8, %v2871_v43 }
 0x20d   : > { %v1241_v47 = vadd.f32 %v2854_v32, %v1173_v46  ;;  %v1381_v12 = vadd.f32 %v1349_v23, %v1313_v44  ;;  %v1382_v17 = vadd.f32 %v1350_v40, %v1314_v31  ;;  %v1515_v2 = vadd.f32 %v1483_v14, %v1447_v48 }
 0x20e   : > { %v2050_v56 = vpack.c.bf16 %v1514_v57, %v1514_v57  ;;  %v1721_v50 = vsel %vm1693_vm6, %v1514_v57, 0.0  ;;  %v1779_v49 = vmul.f32 %v1514_v57, %v1514_v57  ;;  %v729_v22 = vmin.f32 %v697_v42, 6.0 }
 0x20f   : > { %v1448_v26 = vadd.f32 %v2861_v62, %v1381_v12  ;;  %v1449_v59 = vadd.f32 %v2905_v0, %v1382_v17  ;;  %v2051_v41 = vpack.c.bf16 %v1515_v2, %v1515_v2  ;;  %v1722_v19 = vadd.f32 %v1721_v50, %v2856_v52 }
 0x210   : > { %1675 = vst.msk [vmem:[%s2374_s20 + $0x38] sm:$0xf] %vm1660_vm7, %v2050_v56  ;;  %v1723_v32 = vsel %vm1693_vm6, %v1515_v2, 0.0  ;;  %v1780_v43 = vmul.f32 %v1515_v2, %v1515_v2  ;;  %v1824_v23 = vsel %vm1693_vm6, %v1779_v49, 0.0  ;;  %v695_v40 = vmax.f32 %v663_v24, 0.0 }
 0x211   : > { %v1516_v38 = vadd.f32 %v1484_v21, %v1448_v26  ;;  %v1517_v3 = vadd.f32 %v1485_v18, %v1449_v59  ;;  %1676 = vst.msk [vmem:[%s2374_s20 + $0x3c] sm:$0xf] %vm1660_vm7, %v2051_v41  ;;  %v1724_v62 = vadd.f32 %v1723_v32, %v1722_v19  ;;  %v1825_v0 = vadd.f32 %v1824_v23, %v2858_v53 }
 0x212   : > { %v1283_v52 = vmul.f32 %v2268_v30, %v2879_v63  ;;  %v1826_v42 = vsel %vm1693_vm6, %v1780_v43, 0.0  ;;  %v666_v4 = vadd.f32 %v2809_v8, %v2895_v37  ;;  %v664_v11 = vadd.f32 %v2809_v8, %v2899_v7 }
 0x213   : > { %v2052_v35 = vpack.c.bf16 %v1516_v38, %v1516_v38  ;;  %v2053_v1 = vpack.c.bf16 %v1517_v3, %v1517_v3  ;;  %v1725_v16 = vsel %vm1693_vm6, %v1516_v38, 0.0  ;;  %v1781_v33 = vmul.f32 %v1516_v38, %v1516_v38 }
 0x214   : > { %v1284_v5 = vmul.f32 %v2268_v30, %v2888_v55  ;;  %v1726_v53 = vadd.f32 %v1725_v16, %v1724_v62  ;;  %v1782_v10 = vmul.f32 %v1517_v3, %v1517_v3  ;;  %v1827_v29 = vadd.f32 %v1826_v42, %v1825_v0 }
 0x215   : > { %1677 = vst.msk [vmem:[%s2374_s20 + $0x40] sm:$0xf] %vm1660_vm7, %v2052_v35  ;;  %1678 = vst.msk [vmem:[%s2374_s20 + $0x44] sm:$0xf] %vm1660_vm7, %v2053_v1  ;;  %v1828_v63 = vsel %vm1693_vm6, %v1781_v33, 0.0  ;;  %v755_v37 = vrot.slane %v729_v22, 7  ;;  %v906_v7 = vmul.f32 %v2232_v61, %v729_v22  ;;  %v1242_v21 = vadd.f32 %v2902_v51, %v1174_v20 }
 0x216   : > { %v727_v14 = vmin.f32 %v695_v40, 6.0  ;;  %v1829_v46 = vadd.f32 %v1828_v63, %v1827_v29  ;;  %v957_v44 = vrot.slane %v729_v22, 1  ;;  %v698_v31 = vmax.f32 %v666_v4, 0.0 }
 0x217   : > { %v696_v48 = vmax.f32 %v664_v11, 0.0  ;;  %v2989_v55 = vadd.f32 %v1283_v52, %v1241_v47  ;;  %v1727_v18 = vsel %vm1693_vm6, %v1517_v3, 0.0  ;;  %v1830_v57 = vsel %vm1693_vm6, %v1782_v10, 0.0 }
 0x218   : > { %v2993_v24 = vmin.f32 %v698_v31, 6.0  ;;  %v2995_v17 = vadd.f32 %v1727_v18, %v1726_v53  ;;  %v2997_v2 = vadd.f32 %v1830_v57, %v1829_v46  ;;  %v3000_v56 = vmul.f32 %v2260_v25, %v729_v22 }
 0x219   : > { %v728_v12 = vmin.f32 %v696_v48, 6.0  ;;  %v3003_v50 = vmul.f32 %v2262_v27, %v729_v22  ;;  %v754_v51 = vrot.slane %v727_v14, 7  ;;  %v1316_v20 = vadd.f32 %v1284_v5, %v1242_v21  ;;  %v3400_v5 = vld [vmem:[#allocation3_spill] sm:$0xff] }
 0x21a   : > { %v904_v47 = vmul.f32 %v2232_v61, %v727_v14  ;;  %v956_v49 = vrot.slane %v727_v14, 1  ;;  %v770_v26 = vrot.slane %v2993_v24, 7  ;;  %v972_v59 = vrot.slane %v2993_v24, 1 }
 0x21b   : > { %v1211_v41 = vmul.f32 %v2260_v25, %v727_v14  ;;  %v1419_v19 = vmul.f32 %v2262_v27, %v727_v14  ;;  %v907_v32 = vmul.f32 %v2232_v61, %v2993_v24  ;;  %v769_v43 = vrot.slane %v728_v12, 7 }
 0x21c   : > { %v786_v22 = vsel %vm774_vm2, %v755_v37, %v770_v26  ;;  %v801_v23 = vsel %vm774_vm2, %v770_v26, %v755_v37  ;;  %v3018_v40 = vsel %vm976_vm4, %v957_v44, %v972_v59  ;;  %v1003_v38 = vsel %vm976_vm4, %v972_v59, %v957_v44 }
 0x21d   : > { %v835_v3 = vsel %vm805_vm3, %v801_v23, 0.0  ;;  %v872_v62 = vmul.f32 %v2224_v58, %v786_v22  ;;  %v3027_v0 = vsel %vm1008_vm5, %v1003_v38, 0.0  ;;  %v971_v52 = vrot.slane %v728_v12, 1 }
 0x21e   : > { %v871_v42 = vmul.f32 %v2224_v58, %v835_v3  ;;  %v1074_v4 = vmul.f32 %v2243_v6, %v3027_v0  ;;  %v630_v11 = vmul.f32 %v2822_v45, %v2674_v28  ;;  %v628_v35 = vmul.f32 %v2822_v45, %v2683_v9 }
 0x21f   : > { %v939_v1 = vadd.f32 %v907_v32, %v872_v62  ;;  %v1073_v16 = vmul.f32 %v2243_v6, %v3018_v40  ;;  %v905_v33 = vmul.f32 %v2232_v61, %v728_v12  ;;  %v631_v53 = vmul.f32 %v2822_v45, %v3400_v5 }
 0x220   : > { %v938_v10 = vadd.f32 %v906_v7, %v871_v42  ;;  %v1145_v29 = vmul.f32 %v3382_v15, %v835_v3  ;;  %v1146_v63 = vmul.f32 %v3382_v15, %v786_v22  ;;  %v1353_v37 = vmul.f32 %v2272_v34, %v835_v3 }
 0x221   : > { %v3044_v28 = vadd.f32 %v1074_v4, %v939_v1  ;;  %v785_v9 = vsel %vm774_vm2, %v754_v51, %v769_v43  ;;  %v800_v14 = vsel %vm774_vm2, %v769_v43, %v754_v51  ;;  %v987_v46 = vsel %vm976_vm4, %v956_v49, %v971_v52 }
 0x222   : > { %v3052_v44 = vadd.f32 %v1073_v16, %v938_v10  ;;  %v833_v7 = vsel %vm805_vm3, %v800_v14, 0.0  ;;  %v870_v31 = vmul.f32 %v2224_v58, %v785_v9  ;;  %v1002_v48 = vsel %vm976_vm4, %v971_v52, %v956_v49 }
 0x223   : > { %v1354_v21 = vmul.f32 %v2272_v34, %v786_v22  ;;  %v869_v18 = vmul.f32 %v2224_v58, %v833_v7  ;;  %v1036_v57 = vsel %vm1008_vm5, %v1002_v48, 0.0  ;;  %v1143_v51 = vmul.f32 %v3382_v15, %v833_v7 }
 0x224   : > { %v937_v26 = vadd.f32 %v905_v33, %v870_v31  ;;  %v1071_v59 = vmul.f32 %v2243_v6, %v987_v46  ;;  %v1072_v32 = vmul.f32 %v2243_v6, %v1036_v57  ;;  %v1144_v43 = vmul.f32 %v3382_v15, %v785_v9 }
 0x225   : > { %v936_v23 = vadd.f32 %v904_v47, %v869_v18  ;;  %v1175_v38 = vadd.f32 %v1143_v51, %v2915_v36  ;;  %v1212_v49 = vmul.f32 %v2260_v25, %v728_v12  ;;  %v1285_v22 = vmul.f32 %v2268_v30, %v987_v46 }
 0x226   : > { %v1104_v3 = vadd.f32 %v1072_v32, %v937_v26  ;;  %v1176_v62 = vadd.f32 %v1144_v43, %v2912_v60  ;;  %v1351_v52 = vmul.f32 %v2272_v34, %v833_v7  ;;  %v1352_v42 = vmul.f32 %v2272_v34, %v785_v9 }
 0x227   : > { %v1103_v4 = vadd.f32 %v1071_v59, %v936_v23  ;;  %v1243_v1 = vadd.f32 %v1211_v41, %v1175_v38  ;;  %v1286_v16 = vmul.f32 %v2268_v30, %v1036_v57  ;;  %v1420_v33 = vmul.f32 %v2262_v27, %v728_v12 }
 0x228   : > { %v1178_v47 = vadd.f32 %v1146_v63, %v1104_v3  ;;  %v1244_v5 = vadd.f32 %v1212_v49, %v1176_v62  ;;  %v1383_v36 = vadd.f32 %v1351_v52, %v2989_v55  ;;  %v1384_v10 = vadd.f32 %v1352_v42, %v1316_v20 }
 0x229   : > { %v1177_v14 = vadd.f32 %v1145_v29, %v1103_v4  ;;  %v1317_v31 = vadd.f32 %v1285_v22, %v1243_v1  ;;  %v1486_v48 = vmul.f32 %v2950_v39, %v987_v46  ;;  %v669_v60 = vadd.f32 %v2809_v8, %v630_v11  ;;  %v3401_v22 = vld [vmem:[#allocation6_spill] sm:$0xff] }
 0x22a   : > { %v1318_v7 = vadd.f32 %v1286_v16, %v1244_v5  ;;  %v1450_v18 = vadd.f32 %v1419_v19, %v1383_v36  ;;  %v1451_v9 = vadd.f32 %v1420_v33, %v1384_v10  ;;  %v1487_v41 = vmul.f32 %v2950_v39, %v1036_v57 }
 0x22b   : > { %v1422_v51 = vmul.f32 %v2262_v27, %v2993_v24  ;;  %v1245_v12 = vadd.f32 %v3000_v56, %v1177_v14  ;;  %v1385_v63 = vadd.f32 %v1353_v37, %v1317_v31  ;;  %v670_v55 = vadd.f32 %v2809_v8, %v631_v53 }
 0x22c   : > { %v1488_v20 = vmul.f32 %v2950_v39, %v3018_v40  ;;  %v1386_v29 = vadd.f32 %v1354_v21, %v1318_v7  ;;  %v1518_v46 = vadd.f32 %v1486_v48, %v1450_v18  ;;  %v1519_v11 = vadd.f32 %v1487_v41, %v1451_v9 }
 0x22d   : > { %v1489_v19 = vmul.f32 %v2950_v39, %v3027_v0  ;;  %v1452_v57 = vadd.f32 %v3003_v50, %v1385_v63  ;;  %v701_v26 = vmax.f32 %v669_v60, 0.0  ;;  %v667_v59 = vadd.f32 %v2809_v8, %v628_v35 }
 0x22e   : > { %v1453_v56 = vadd.f32 %v1422_v51, %v1386_v29  ;;  %v2054_v37 = vpack.c.bf16 %v1518_v46, %v1518_v46  ;;  %v2055_v32 = vpack.c.bf16 %v1519_v11, %v1519_v11  ;;  %v1729_v53 = vsel %vm1693_vm6, %v1518_v46, 0.0 }
 0x22f   : > { %v1520_v43 = vadd.f32 %v1488_v20, %v1452_v57  ;;  %v1730_v21 = vadd.f32 %v1729_v53, %v2995_v17  ;;  %v1783_v23 = vmul.f32 %v1518_v46, %v1518_v46  ;;  %v702_v38 = vmax.f32 %v670_v55, 0.0 }
 0x230   : > { %v1521_v49 = vadd.f32 %v1489_v19, %v1453_v56  ;;  %1679 = vst.msk [vmem:[%s2374_s20 + $0x48] sm:$0xf] %vm1660_vm7, %v2054_v37  ;;  %1680 = vst.msk [vmem:[%s2374_s20 + $0x4c] sm:$0xf] %vm1660_vm7, %v2055_v32  ;;  %v1731_v50 = vsel %vm1693_vm6, %v1519_v11, 0.0  ;;  %v1784_v35 = vmul.f32 %v1519_v11, %v1519_v11  ;;  %v629_v3 = vmul.f32 %v2822_v45, %v3401_v22 }
 0x231   : > { %v2056_v62 = vpack.c.bf16 %v1520_v43, %v1520_v43  ;;  %v1732_v52 = vadd.f32 %v1731_v50, %v1730_v21  ;;  %v1733_v42 = vsel %vm1693_vm6, %v1520_v43, 0.0  ;;  %v1785_v17 = vmul.f32 %v1520_v43, %v1520_v43 }
 0x232   : > { %v1214_v4 = vmul.f32 %v2260_v25, %v2993_v24  ;;  %v2057_v1 = vpack.c.bf16 %v1521_v49, %v1521_v49  ;;  %v1832_v16 = vsel %vm1693_vm6, %v1783_v23, 0.0  ;;  %v733_v33 = vmin.f32 %v701_v26, 6.0 }
 0x233   : > { %v1287_v5 = vmul.f32 %v2268_v30, %v3018_v40  ;;  %1681 = vst.msk [vmem:[%s2374_s20 + $0x50] sm:$0xf] %vm1660_vm7, %v2056_v62  ;;  %v1734_v36 = vadd.f32 %v1733_v42, %v1732_v52  ;;  %v1833_v10 = vadd.f32 %v1832_v16, %v2997_v2  ;;  %v699_v14 = vmax.f32 %v667_v59, 0.0 }
 0x234   : > { %1682 = vst.msk [vmem:[%s2374_s20 + $0x54] sm:$0xf] %vm1660_vm7, %v2057_v1  ;;  %v1834_v31 = vsel %vm1693_vm6, %v1784_v35, 0.0  ;;  %v1836_v48 = vsel %vm1693_vm6, %v1785_v17, 0.0  ;;  %v3111_v24 = vmin.f32 %v702_v38, 6.0  ;;  %v668_v7 = vadd.f32 %v2809_v8, %v629_v3 }
 0x235   : > { %v1835_v60 = vadd.f32 %v1834_v31, %v1833_v10  ;;  %v1246_v18 = vadd.f32 %v1214_v4, %v1178_v47  ;;  %v3114_v9 = vadd.f32 %v1287_v5, %v1245_v12  ;;  %v1288_v40 = vmul.f32 %v2268_v30, %v3027_v0 }
 0x236   : > { %v757_v41 = vrot.slane %v733_v33, 7  ;;  %v910_v2 = vmul.f32 %v2232_v61, %v733_v33  ;;  %v1786_v51 = vmul.f32 %v1521_v49, %v1521_v49  ;;  %v731_v55 = vmin.f32 %v699_v14, 6.0 }
 0x237   : > { %v1837_v63 = vadd.f32 %v1836_v48, %v1835_v60  ;;  %v772_v20 = vrot.slane %v3111_v24, 7  ;;  %v959_v29 = vrot.slane %v733_v33, 1  ;;  %v3121_v46 = vmul.f32 %v2260_v25, %v733_v33 }
 0x238   : > { %v911_v47 = vmul.f32 %v2232_v61, %v3111_v24  ;;  %v974_v12 = vrot.slane %v3111_v24, 1  ;;  %v700_v19 = vmax.f32 %v668_v7, 0.0  ;;  %v1320_v57 = vadd.f32 %v1288_v40, %v1246_v18 }
 0x239   : > { %v788_v0 = vsel %vm774_vm2, %v757_v41, %v772_v20  ;;  %v803_v11 = vsel %vm774_vm2, %v772_v20, %v757_v41  ;;  %v3140_v32 = vmul.f32 %v2262_v27, %v733_v33  ;;  %v756_v53 = vrot.slane %v731_v55, 7 }
 0x23a   : > { %v839_v26 = vsel %vm805_vm3, %v803_v11, 0.0  ;;  %v876_v59 = vmul.f32 %v2224_v58, %v788_v0  ;;  %v3135_v56 = vsel %vm976_vm4, %v959_v29, %v974_v12  ;;  %v1005_v37 = vsel %vm976_vm4, %v974_v12, %v959_v29 }
 0x23b   : > { %v875_v43 = vmul.f32 %v2224_v58, %v839_v26  ;;  %v3145_v21 = vsel %vm1008_vm5, %v1005_v37, 0.0  ;;  %v908_v23 = vmul.f32 %v2232_v61, %v731_v55  ;;  %v958_v38 = vrot.slane %v731_v55, 1 }
 0x23c   : > { %v943_v50 = vadd.f32 %v911_v47, %v876_v59  ;;  %v1078_v35 = vmul.f32 %v2243_v6, %v3145_v21  ;;  %v1215_v22 = vmul.f32 %v2260_v25, %v731_v55  ;;  %v1423_v3 = vmul.f32 %v2262_v27, %v731_v55 }
 0x23d   : > { %v942_v62 = vadd.f32 %v910_v2, %v875_v43  ;;  %v1077_v52 = vmul.f32 %v2243_v6, %v3135_v56  ;;  %v3158_v17 = vmul.f32 %v2262_v27, %v3111_v24  ;;  %v732_v4 = vmin.f32 %v700_v19, 6.0 }
 0x23e   : > { %v3154_v42 = vadd.f32 %v1078_v35, %v943_v50  ;;  %v1735_v1 = vsel %vm1693_vm6, %v1521_v49, 0.0  ;;  %v1149_v33 = vmul.f32 %v3382_v15, %v839_v26  ;;  %v1150_v5 = vmul.f32 %v3382_v15, %v788_v0  ;;  %v3402_v49 = vld [vmem:[#allocation8_spill] sm:$0xff] }
 0x23f   : > { %v3161_v16 = vadd.f32 %v1077_v52, %v942_v62  ;;  %v1736_v10 = vadd.f32 %v1735_v1, %v1734_v36  ;;  %v1357_v14 = vmul.f32 %v2272_v34, %v839_v26  ;;  %v771_v31 = vrot.slane %v732_v4, 7 }
 0x240   : > { %v973_v48 = vrot.slane %v732_v4, 1  ;;  %v1838_v60 = vsel %vm1693_vm6, %v1786_v51, 0.0  ;;  %v1358_v7 = vmul.f32 %v2272_v34, %v788_v0  ;;  %v909_v18 = vmul.f32 %v2232_v61, %v732_v4 }
 0x241   : > { %v3169_v40 = vadd.f32 %v1838_v60, %v1837_v63  ;;  %v634_v41 = vmul.f32 %v2822_v45, %v3402_v49  ;;  %v787_v2 = vsel %vm774_vm2, %v756_v53, %v771_v31  ;;  %v802_v36 = vsel %vm774_vm2, %v771_v31, %v756_v53 }
 0x242   : > { %v989_v55 = vsel %vm976_vm4, %v958_v38, %v973_v48  ;;  %v1004_v51 = vsel %vm976_vm4, %v973_v48, %v958_v38  ;;  %v837_v20 = vsel %vm805_vm3, %v802_v36, 0.0  ;;  %v874_v63 = vmul.f32 %v2224_v58, %v787_v2 }
 0x243   : > { %v1040_v29 = vsel %vm1008_vm5, %v1004_v51, 0.0  ;;  %v1216_v47 = vmul.f32 %v2260_v25, %v732_v4  ;;  %v873_v12 = vmul.f32 %v2224_v58, %v837_v20  ;;  %v1147_v11 = vmul.f32 %v3382_v15, %v837_v20 }
 0x244   : > { %v1076_v0 = vmul.f32 %v2243_v6, %v1040_v29  ;;  %v1148_v19 = vmul.f32 %v3382_v15, %v787_v2  ;;  %v941_v26 = vadd.f32 %v909_v18, %v874_v63  ;;  %v1075_v59 = vmul.f32 %v2243_v6, %v989_v55 }
 0x245   : > { %v1355_v37 = vmul.f32 %v2272_v34, %v837_v20  ;;  %v1424_v53 = vmul.f32 %v2262_v27, %v732_v4  ;;  %v940_v43 = vadd.f32 %v908_v23, %v873_v12  ;;  %v1179_v38 = vadd.f32 %v1147_v11, %v3052_v44 }
 0x246   : > { %v1180_v50 = vadd.f32 %v1148_v19, %v3044_v28  ;;  %v1356_v35 = vmul.f32 %v2272_v34, %v787_v2  ;;  %v1108_v62 = vadd.f32 %v1076_v0, %v941_v26  ;;  %v1289_v52 = vmul.f32 %v2268_v30, %v989_v55 }
 0x247   : > { %v1290_v1 = vmul.f32 %v2268_v30, %v1040_v29  ;;  %v1387_v31 = vadd.f32 %v1355_v37, %v3114_v9  ;;  %v1107_v48 = vadd.f32 %v1075_v59, %v940_v43  ;;  %v1247_v60 = vadd.f32 %v1215_v22, %v1179_v38 }
 0x248   : > { %v1248_v18 = vadd.f32 %v1216_v47, %v1180_v50  ;;  %v1388_v49 = vadd.f32 %v1356_v35, %v1320_v57  ;;  %v1182_v36 = vadd.f32 %v1150_v5, %v1108_v62  ;;  %v1490_v23 = vmul.f32 %v2950_v39, %v989_v55  ;;  %v3403_v47 = vld [vmem:[#allocation9_spill] sm:$0xff]  ;;  %v3404_v50 = vld [vmem:[#allocation10_spill] sm:$0xff] }
 0x249   : > { %v1454_v4 = vadd.f32 %v1423_v3, %v1387_v31  ;;  %v1491_v44 = vmul.f32 %v2950_v39, %v1040_v29  ;;  %v1181_v28 = vadd.f32 %v1149_v33, %v1107_v48  ;;  %v1321_v51 = vadd.f32 %v1289_v52, %v1247_v60 }
 0x24a   : > { %v1322_v2 = vadd.f32 %v1290_v1, %v1248_v18  ;;  %v1455_v20 = vadd.f32 %v1424_v53, %v1388_v49  ;;  %v1492_v63 = vmul.f32 %v2950_v39, %v3135_v56  ;;  %v1493_v9 = vmul.f32 %v2950_v39, %v3145_v21 }
 0x24b   : > { %v1522_v22 = vadd.f32 %v1490_v23, %v1454_v4  ;;  %v632_v57 = vmul.f32 %v2822_v45, %v3403_v47  ;;  %v1249_v3 = vadd.f32 %v3121_v46, %v1181_v28  ;;  %v1389_v5 = vadd.f32 %v1357_v14, %v1321_v51  ;;  %v3405_v51 = vld [vmem:[#allocation11_spill] sm:$0xff] }
 0x24c   : > { %v1390_v55 = vadd.f32 %v1358_v7, %v1322_v2  ;;  %v1523_v29 = vadd.f32 %v1491_v44, %v1455_v20  ;;  %v673_v11 = vadd.f32 %v2809_v8, %v634_v41  ;;  %v635_v35 = vmul.f32 %v2822_v45, %v3404_v50 }
 0x24d   : > { %v2058_v33 = vpack.c.bf16 %v1522_v22, %v1522_v22  ;;  %v1737_v12 = vsel %vm1693_vm6, %v1522_v22, 0.0  ;;  %v1787_v0 = vmul.f32 %v1522_v22, %v1522_v22  ;;  %v1456_v19 = vadd.f32 %v3140_v32, %v1389_v5 }
 0x24e   : > { %v1457_v26 = vadd.f32 %v3158_v17, %v1390_v55  ;;  %v2059_v59 = vpack.c.bf16 %v1523_v29, %v1523_v29  ;;  %v1738_v37 = vadd.f32 %v1737_v12, %v1736_v10  ;;  %v1739_v46 = vsel %vm1693_vm6, %v1523_v29, 0.0 }
 0x24f   : > { %1683 = vst.msk [vmem:[%s2374_s20 + $0x58] sm:$0xf] %vm1660_vm7, %v2058_v33  ;;  %v1788_v14 = vmul.f32 %v1523_v29, %v1523_v29  ;;  %v1840_v7 = vsel %vm1693_vm6, %v1787_v0, 0.0  ;;  %v671_v53 = vadd.f32 %v2809_v8, %v632_v57  ;;  %v1524_v43 = vadd.f32 %v1492_v63, %v1456_v19 }
 0x250   : > { %v1525_v38 = vadd.f32 %v1493_v9, %v1457_v26  ;;  %1684 = vst.msk [vmem:[%s2374_s20 + $0x5c] sm:$0xf] %vm1660_vm7, %v2059_v59  ;;  %v1740_v32 = vadd.f32 %v1739_v46, %v1738_v37  ;;  %v1841_v17 = vadd.f32 %v1840_v7, %v3169_v40  ;;  %v705_v41 = vmax.f32 %v673_v11, 0.0 }
 0x251   : > { %v1842_v10 = vsel %vm1693_vm6, %v1788_v14, 0.0  ;;  %v2060_v62 = vpack.c.bf16 %v1524_v43, %v1524_v43  ;;  %v1741_v1 = vsel %vm1693_vm6, %v1524_v43, 0.0  ;;  %v1789_v31 = vmul.f32 %v1524_v43, %v1524_v43 }
 0x252   : > { %v2061_v52 = vpack.c.bf16 %v1525_v38, %v1525_v38  ;;  %v1218_v48 = vmul.f32 %v2260_v25, %v3111_v24  ;;  %v1742_v60 = vadd.f32 %v1741_v1, %v1740_v32  ;;  %v1843_v18 = vadd.f32 %v1842_v10, %v1841_v17 }
 0x253   : > { %v1291_v49 = vmul.f32 %v2268_v30, %v3135_v56  ;;  %1685 = vst.msk [vmem:[%s2374_s20 + $0x60] sm:$0xf] %vm1660_vm7, %v2060_v62  ;;  %v1790_v40 = vmul.f32 %v1525_v38, %v1525_v38  ;;  %v1844_v4 = vsel %vm1693_vm6, %v1789_v31, 0.0  ;;  %v703_v23 = vmax.f32 %v671_v53, 0.0 }
 0x254   : > { %1686 = vst.msk [vmem:[%s2374_s20 + $0x64] sm:$0xf] %vm1660_vm7, %v2061_v52  ;;  %v1845_v44 = vadd.f32 %v1844_v4, %v1843_v18  ;;  %v674_v28 = vadd.f32 %v2809_v8, %v635_v35  ;;  %v633_v2 = vmul.f32 %v2822_v45, %v3405_v51  ;;  %v1292_v24 = vmul.f32 %v2268_v30, %v3145_v21 }
 0x255   : > { %v737_v20 = vmin.f32 %v705_v41, 6.0  ;;  %v1250_v63 = vadd.f32 %v1218_v48, %v1182_v36  ;;  %v3239_v56 = vadd.f32 %v1291_v49, %v1249_v3  ;;  %v1743_v47 = vsel %vm1693_vm6, %v1525_v38, 0.0 }
 0x256   : > { %v706_v9 = vmax.f32 %v674_v28, 0.0  ;;  %v672_v22 = vadd.f32 %v2809_v8, %v633_v2  ;;  %v735_v57 = vmin.f32 %v703_v23, 6.0  ;;  %v3245_v55 = vadd.f32 %v1743_v47, %v1742_v60 }
 0x257   : > { %v3243_v5 = vadd.f32 %v1292_v24, %v1250_v63  ;;  %v1846_v29 = vsel %vm1693_vm6, %v1790_v40, 0.0  ;;  %v1113_v21 = vrot.slane %v737_v20, 7  ;;  %v3251_v36 = vmul.f32 %v2260_v25, %v737_v20 }
 0x258   : > { %v738_v45 = vmin.f32 %v706_v9, 6.0  ;;  %v704_v33 = vmax.f32 %v672_v22, 0.0  ;;  %v3248_v12 = vadd.f32 %v1846_v29, %v1845_v44  ;;  %v1255_v3 = vrot.slane %v737_v20, 1 }
 0x259   : > { %v3254_v11 = vmul.f32 %v2262_v27, %v737_v20  ;;  %v758_v19 = vrot.slane %v735_v57, 7  ;;  %v912_v26 = vmul.f32 %v2232_v61, %v735_v57  ;;  %v960_v53 = vrot.slane %v735_v57, 1 }
 0x25a   : > { %v1114_v0 = vrot.slane %v738_v45, 7  ;;  %v1256_v8 = vrot.slane %v738_v45, 1  ;;  %v736_v59 = vmin.f32 %v704_v33, 6.0  ;;  %v1219_v43 = vmul.f32 %v2260_v25, %v735_v57 }
 0x25b   : > { %v1427_v17 = vmul.f32 %v2262_v27, %v735_v57  ;;  %v3272_v10 = vmul.f32 0.0, %v2272_v34  ;;  %v3275_v41 = vmul.f32 0.0, %v2262_v27  ;;  %v3278_v50 = vmul.f32 0.0, %v2950_v39 }
 0x25c   : > { %v1115_v37 = vsel %vm774_vm2, %v1113_v21, %v1114_v0  ;;  %v1116_v46 = vsel %vm774_vm2, %v1114_v0, %v1113_v21  ;;  %v1257_v14 = vsel %vm976_vm4, %v1255_v3, %v1256_v8  ;;  %v1258_v7 = vsel %vm976_vm4, %v1256_v8, %v1255_v3 }
 0x25d   : > { %v1117_v38 = vsel %vm805_vm3, %v1116_v46, 0.0  ;;  %v1260_v32 = vsel %vm1008_vm5, %v1258_v7, 0.0  ;;  %v1154_v35 = vmul.f32 %v3382_v15, %v1115_v37  ;;  %v1222_v62 = vmul.f32 %v2260_v25, %v738_v45 }
 0x25e   : > { %v1430_v52 = vmul.f32 %v2262_v27, %v738_v45  ;;  %v773_v1 = vrot.slane %v736_v59, 7  ;;  %v1153_v31 = vmul.f32 %v3382_v15, %v1117_v38  ;;  %v1295_v48 = vmul.f32 %v2268_v30, %v1257_v14 }
 0x25f   : > { %v1296_v60 = vmul.f32 %v2268_v30, %v1260_v32  ;;  %v975_v18 = vrot.slane %v736_v59, 1  ;;  %v1361_v49 = vmul.f32 %v2272_v34, %v1117_v38  ;;  %v913_v23 = vmul.f32 %v2232_v61, %v736_v59 }
 0x260   : > { %v789_v40 = vsel %vm774_vm2, %v758_v19, %v773_v1  ;;  %v804_v4 = vsel %vm774_vm2, %v773_v1, %v758_v19  ;;  %v1362_v24 = vmul.f32 %v2272_v34, %v1115_v37  ;;  %v1220_v57 = vmul.f32 %v2260_v25, %v736_v59 }
 0x261   : > { %v841_v44 = vsel %vm805_vm3, %v804_v4, 0.0  ;;  %v878_v28 = vmul.f32 %v2224_v58, %v789_v40  ;;  %v991_v51 = vsel %vm976_vm4, %v960_v53, %v975_v18  ;;  %v1006_v2 = vsel %vm976_vm4, %v975_v18, %v960_v53 }
 0x262   : > { %v877_v20 = vmul.f32 %v2224_v58, %v841_v44  ;;  %v1044_v63 = vsel %vm1008_vm5, %v1006_v2, 0.0  ;;  %v1151_v61 = vmul.f32 %v3382_v15, %v841_v44  ;;  %v1152_v47 = vmul.f32 %v3382_v15, %v789_v40 }
 0x263   : > { %v945_v9 = vadd.f32 %v913_v23, %v878_v28  ;;  %v1080_v22 = vmul.f32 %v2243_v6, %v1044_v63  ;;  %v1079_v54 = vmul.f32 %v2243_v6, %v991_v51  ;;  %v1359_v33 = vmul.f32 %v2272_v34, %v841_v44 }
 0x264   : > { %v944_v29 = vadd.f32 %v912_v26, %v877_v20  ;;  %v1183_v45 = vadd.f32 %v1151_v61, %v3161_v16  ;;  %v1184_v13 = vadd.f32 %v1152_v47, %v3154_v42  ;;  %v1360_v21 = vmul.f32 %v2272_v34, %v789_v40 }
 0x265   : > { %v1112_v58 = vadd.f32 %v1080_v22, %v945_v9  ;;  %v1428_v3 = vmul.f32 %v2262_v27, %v736_v59  ;;  %v1293_v15 = vmul.f32 %v2268_v30, %v991_v51  ;;  %v1391_v25 = vadd.f32 %v1359_v33, %v3239_v56 }
 0x266   : > { %v1111_v0 = vadd.f32 %v1079_v54, %v944_v29  ;;  %v1251_v8 = vadd.f32 %v1219_v43, %v1183_v45  ;;  %v1252_v26 = vadd.f32 %v1220_v57, %v1184_v13  ;;  %v1294_v6 = vmul.f32 %v2268_v30, %v1044_v63 }
 0x267   : > { %v1186_v19 = vadd.f32 %v1154_v35, %v1112_v58  ;;  %v1392_v16 = vadd.f32 %v1360_v21, %v3243_v5  ;;  %v1458_v7 = vadd.f32 %v1427_v17, %v1391_v25  ;;  %v1494_v42 = vmul.f32 %v2950_v39, %v991_v51 }
 0x268   : > { %v1185_v37 = vadd.f32 %v1153_v31, %v1111_v0  ;;  %v1325_v46 = vadd.f32 %v1293_v15, %v1251_v8  ;;  %v1326_v53 = vadd.f32 %v1294_v6, %v1252_v26  ;;  %v1495_v59 = vmul.f32 %v2950_v39, %v1044_v63 }
 0x269   : > { %v1254_v34 = vadd.f32 %v1222_v62, %v1186_v19  ;;  %v1459_v27 = vadd.f32 %v1428_v3, %v1392_v16  ;;  %v1496_v43 = vmul.f32 %v2950_v39, %v1257_v14  ;;  %v1526_v35 = vadd.f32 %v1494_v42, %v1458_v7 }
 0x26a   : > { %v1253_v56 = vadd.f32 %v3251_v36, %v1185_v37  ;;  %v1393_v38 = vadd.f32 %v1361_v49, %v1325_v46  ;;  %v1497_v30 = vmul.f32 %v2950_v39, %v1260_v32  ;;  %v1394_v1 = vadd.f32 %v1362_v24, %v1326_v53 }
 0x26b   : > { %v1328_v5 = vadd.f32 %v1296_v60, %v1254_v34  ;;  %v1527_v31 = vadd.f32 %v1495_v59, %v1459_v27  ;;  %v2062_v18 = vpack.c.bf16 %v1526_v35, %v1526_v35  ;;  %v1745_v40 = vsel %vm1693_vm6, %v1526_v35, 0.0 }
 0x26c   : > { %v1327_v17 = vadd.f32 %v1295_v48, %v1253_v56  ;;  %v1460_v62 = vadd.f32 %v3254_v11, %v1393_v38  ;;  %v1461_v14 = vadd.f32 %v1430_v52, %v1394_v1  ;;  %v1746_v36 = vadd.f32 %v1745_v40, %v3245_v55 }
 0x26d   : > { %v1396_v4 = vadd.f32 %v3272_v10, %v1328_v5  ;;  %v2063_v23 = vpack.c.bf16 %v1527_v31, %v1527_v31  ;;  %1687 = vst.msk [vmem:[%s2374_s20 + $0x68] sm:$0xf] %vm1660_vm7, %v2062_v18  ;;  %v1747_v39 = vsel %vm1693_vm6, %v1527_v31, 0.0  ;;  %v1791_v32 = vmul.f32 %v1526_v35, %v1526_v35 }
 0x26e   : > { %v1395_v49 = vadd.f32 %v3272_v10, %v1327_v17  ;;  %v1528_v44 = vadd.f32 %v1496_v43, %v1460_v62  ;;  %v1529_v48 = vadd.f32 %v1497_v30, %v1461_v14  ;;  %v1748_v60 = vadd.f32 %v1747_v39, %v1746_v36 }
 0x26f   : > { %v1463_v11 = vadd.f32 %v3275_v41, %v1396_v4  ;;  %1688 = vst.msk [vmem:[%s2374_s20 + $0x6c] sm:$0xf] %vm1660_vm7, %v2063_v23  ;;  %v1792_v10 = vmul.f32 %v1527_v31, %v1527_v31  ;;  %v1848_v9 = vsel %vm1693_vm6, %v1791_v32, 0.0 }
 0x270   : > { %v1462_v52 = vadd.f32 %v3275_v41, %v1395_v49  ;;  %v2064_v28 = vpack.c.bf16 %v1528_v44, %v1528_v44  ;;  %v1749_v55 = vsel %vm1693_vm6, %v1528_v44, 0.0  ;;  %v2065_v2 = vpack.c.bf16 %v1529_v48, %v1529_v48 }
 0x271   : > { %v1531_v51 = vadd.f32 %v3278_v50, %v1463_v11  ;;  %v1750_v24 = vadd.f32 %v1749_v55, %v1748_v60  ;;  %v1793_v20 = vmul.f32 %v1528_v44, %v1528_v44  ;;  %v1751_v61 = vsel %vm1693_vm6, %v1529_v48, 0.0 }
 0x272   : > { %v1530_v63 = vadd.f32 %v3278_v50, %v1462_v52  ;;  %1689 = vst.msk [vmem:[%s2374_s20 + $0x70] sm:$0xf] %vm1660_vm7, %v2064_v28  ;;  %1690 = vst.msk [vmem:[%s2374_s20 + $0x74] sm:$0xf] %vm1660_vm7, %v2065_v2  ;;  %v1794_v29 = vmul.f32 %v1529_v48, %v1529_v48  ;;  %v1849_v54 = vadd.f32 %v1848_v9, %v3248_v12  ;;  %v1850_v33 = vsel %vm1693_vm6, %v1792_v10, 0.0 }
 0x273   : > { %v2067_v41 = vpack.c.bf16 %v1531_v51, %v1531_v51  ;;  %v1752_v22 = vadd.f32 %v1751_v61, %v1750_v24  ;;  %v1852_v58 = vsel %vm1693_vm6, %v1793_v20, 0.0  ;;  %v1755_v13 = vsel %vm1693_vm6, %v1531_v51, 0.0 }
 0x274   : > { %v2066_v47 = vpack.c.bf16 %v1530_v63, %v1530_v63  ;;  %v1753_v57 = vsel %vm1693_vm6, %v1530_v63, 0.0  ;;  %v1795_v45 = vmul.f32 %v1530_v63, %v1530_v63  ;;  %v1851_v21 = vadd.f32 %v1850_v33, %v1849_v54 }
 0x275   : > { %1692 = vst.msk [vmem:[%s2374_s20 + $0x7c] sm:$0xf] %vm1660_vm7, %v2067_v41  ;;  %v1754_v50 = vadd.f32 %v1753_v57, %v1752_v22  ;;  %v1796_v15 = vmul.f32 %v1531_v51, %v1531_v51  ;;  %v1854_v12 = vsel %vm1693_vm6, %v1794_v29, 0.0 }
 0x276   : > { %1691 = vst.msk [vmem:[%s2374_s20 + $0x78] sm:$0xf] %vm1660_vm7, %v2066_v47  ;;  %v1853_v0 = vadd.f32 %v1852_v58, %v1851_v21  ;;  %v1856_v25 = vsel %vm1693_vm6, %v1795_v45, 0.0 }
 0x277   : > { %v1756_v3 = vadd.f32 %v1755_v13, %v1754_v50  ;;  %v1858_v37 = vsel %vm1693_vm6, %v1796_v15, 0.0 }
 0x278   : > { %v1855_v19 = vadd.f32 %v1854_v12, %v1853_v0 }
 0x279   : > { %v1757_v8 = vrot.slane %v1756_v3, 4 }
 0x27a   : > { %v1857_v6 = vadd.f32 %v1856_v25, %v1855_v19 }
 0x27b   : > { %v1758_v26 = vadd.f32 %v1757_v8, %v1756_v3 }
 0x27c   : > { %v1859_v46 = vadd.f32 %v1858_v37, %v1857_v6 }
 0x27d   : > { %v1759_v16 = vrot.slane %v1758_v26, 2 }
 0x27e   : > { %v1860_v42 = vrot.slane %v1859_v46, 4 }
 0x27f   : > { %v1760_v7 = vadd.f32 %v1759_v16, %v1758_v26 }
 0x280   : > { %v1861_v53 = vadd.f32 %v1860_v42, %v1859_v46 }
 0x281   : > { %v1761_v34 = vrot.slane %v1760_v7, 1 }
 0x282   : > { %v1862_v59 = vrot.slane %v1861_v53, 2 }
 0x283   : > { %v1762_v27 = vadd.f32 %v1761_v34, %v1760_v7 }
 0x284   : > { %v1863_v43 = vadd.f32 %v1862_v59, %v1861_v53 }
 0x285   : > { %1764 = vst.msk [vmem:[%s292_s8] sm:$0x1] %vm1763_vm8, %v1762_v27 }
 0x286   : > { %v1864_v56 = vrot.slane %v1863_v43, 1 }
 0x288   : > { %v1865_v38 = vadd.f32 %v1864_v56, %v1863_v43 }
 0x28a   : > { %1866 = vst.msk [vmem:[%s295_s11] sm:$0x1] %vm1763_vm8, %v1865_v38 }
 0x28b PF: > { %s18_s24 = sadd.s32 1, %s2142_s24  }
 0x28c   : > { %p15_p4 = scmp.ge.s32.totalorder %s18_s24, 4  }
 0x28e   :  { %17 = sbr.rel (!%p15_p4) target bundleno = 1 (0x1), region = 94 }

</bundles_post_ra>
